<compile_context>
chip_gen: v6e
topology: v6e:2x2x1
jax: 0.10.0
libtpu: 0.0.40
codegen_flags: <defaults>
</compile_context>

<pallas_src>
import numpy as np
import jax
import jax.numpy as jnp
from jax.experimental import pallas as pl
from jax.experimental.pallas import tpu as pltpu

H = W = 7
HW = H * W                        # 49 flattened spatial positions (lane axis)
C_SPLITS = (256, 320, 128, 128)   # channel counts of the four concatenated inputs
C_IN = sum(C_SPLITS)              # 832
C_OUT = 128
BN_EPS = 1e-3


def _build_shift_mats():
    """(4, 49, 49) exact 0/1 selection matrices for the pool-window shifts.

    shifted[:, p] = x[:, src(p)] with src = p-1 / p+1 / p-7 / p+7 (W-left, W-right,
    H-up, H-down).  At spatial borders the column selects the center element itself,
    which is a no-op under max -> equivalent to MaxPool2d's -inf padding.
    """
    mats = np.zeros((4, HW, HW), np.float32)
    for p in range(HW):
        h, w = divmod(p, W)
        mats[0, p - 1 if w > 0 else p, p] = 1.0
        mats[1, p + 1 if w < W - 1 else p, p] = 1.0
        mats[2, p - W if h > 0 else p, p] = 1.0
        mats[3, p + W if h < H - 1 else p, p] = 1.0
    return mats


def fused_kernel(x1_ref, x2_ref, x3_ref, x4_ref, s_ref, w_ref, g_ref, b_ref,
                 out_ref, cat_ref):
    # x*_ref : (C_i, 49) f32   channels-major slabs (free reshapes of NCHW inputs)
    # s_ref  : (4, 49, 49) f32 selection matrices (see _build_shift_mats)
    # w_ref  : (128, 832) bf16 1x1 conv weight in natural PyTorch (out, in) layout
    # g_ref, b_ref: (128, 1) f32 BN affine params
    # out_ref: (128, 49) f32   NCHW-flat output
    # cat_ref: (832, 49) f32   scratch: channel-concatenated activations
    f32 = jnp.float32

    # ---- channel concat (sublane-aligned offsets: 0 / 256 / 576 / 704) ----
    cat_ref[0:256, :] = x1_ref[...]
    cat_ref[256:576, :] = x2_ref[...]
    cat_ref[576:704, :] = x3_ref[...]
    cat_ref[704:832, :] = x4_ref[...]
    x = cat_ref[...]                                             # (832, 49)

    # ---- 3x3 max pool, stride 1, pad 1 (separable; shifts via MXU selections) ----
    left = jnp.dot(x, s_ref[0], preferred_element_type=f32)      # x[:, w-1] (or self)
    right = jnp.dot(x, s_ref[1], preferred_element_type=f32)     # x[:, w+1] (or self)
    pw = jnp.maximum(jnp.maximum(left, right), x)                # max over W window
    up = jnp.dot(pw, s_ref[2], preferred_element_type=f32)       # pw[:, h-1] (or self)
    down = jnp.dot(pw, s_ref[3], preferred_element_type=f32)     # pw[:, h+1] (or self)
    pooled = jnp.maximum(jnp.maximum(up, down), pw)              # (832, 49)

    # ---- Conv2d 1x1 (no bias): (128,832) @ (832,49), f32 accumulation ----
    wmat = w_ref[...].astype(f32)                                # bf16 DMA, f32 math
    y = jnp.dot(wmat, pooled, preferred_element_type=f32)        # (128, 49)

    # ---- BatchNorm2d, training-mode batch statistics (biased variance) ----
    n = f32(HW)
    s1 = jnp.sum(y, axis=1, keepdims=True)                       # (128, 1)
    s2 = jnp.sum(y * y, axis=1, keepdims=True)
    mean = s1 / n
    var = jnp.maximum(s2 / n - mean * mean, 0.0)                 # clamp: no NaN rsqrt
    scale = jax.lax.rsqrt(var + BN_EPS) * g_ref[...]
    out_ref[...] = (y - mean) * scale + b_ref[...]


def prepare_params(conv_w, gamma, beta):
    """One-time parameter prep, hoisted out of the per-call jit path."""
    w2d = conv_w.reshape(C_OUT, C_IN).astype(jnp.bfloat16)       # (128, 832)
    g2d = gamma.reshape(C_OUT, 1).astype(jnp.float32)
    b2d = beta.reshape(C_OUT, 1).astype(jnp.float32)
    return w2d, g2d, b2d


@jax.jit
def forward(x169, x175, x181, x185, w2d, g2d, b2d, shift_mats):
    """Inputs are NCHW (N=1). Returns NCHW (1, 128, 7, 7)."""
    # Free reshapes: NCHW with N=1 is already channels-major over a flat HW axis.
    x1 = x169.reshape(C_SPLITS[0], HW)
    x2 = x175.reshape(C_SPLITS[1], HW)
    x3 = x181.reshape(C_SPLITS[2], HW)
    x4 = x185.reshape(C_SPLITS[3], HW)

    cost = pl.CostEstimate(
        flops=2 * C_IN * HW * HW * 4          # 4 selection matmuls (pool shifts)
        + 2 * C_OUT * C_IN * HW               # 1x1 conv
        + 4 * C_OUT * HW,                     # BN stats / normalize (order of magnitude)
        transcendentals=C_OUT,                # rsqrt per output channel
        bytes_accessed=4 * C_IN * HW          # activations in
        + 4 * 4 * HW * HW                     # selection matrices
        + 2 * C_OUT * C_IN                    # bf16 weight
        + 2 * 4 * C_OUT                       # gamma/beta
        + 4 * C_OUT * HW,                     # output
    )

    vmem = pl.BlockSpec(memory_space=pltpu.MemorySpace.VMEM)
    out = pl.pallas_call(
        fused_kernel,
        out_shape=jax.ShapeDtypeStruct((C_OUT, HW), jnp.float32),
        in_specs=[vmem] * 8,
        out_specs=vmem,
        scratch_shapes=[pltpu.VMEM((C_IN, HW), jnp.float32)],
        cost_estimate=cost,
    )(x1, x2, x3, x4, shift_mats, w2d, g2d, b2d)

    # (128, 49) -> (1, 128, 7, 7) is a free reshape (no relayout).
    return out.reshape(1, C_OUT, H, W)


def reference(x169, x175, x181, x185, conv_w, gamma, beta):
    """Pure-JAX reference of the PyTorch module forward (training-mode BN)."""
    x = jnp.concatenate([x169, x175, x181, x185], axis=1)
    pooled = jax.lax.reduce_window(
        x, jnp.float32(-jnp.inf), jax.lax.max,
        window_dimensions=(1, 1, 3, 3), window_strides=(1, 1, 1, 1),
        padding=((0, 0), (0, 0), (1, 1), (1, 1)))
    wmat = conv_w.reshape(C_OUT, C_IN)
    y = jnp.einsum("oc,nchw->nohw", wmat, pooled,
                   precision=jax.lax.Precision.HIGHEST)
    mean = y.mean(axis=(0, 2, 3), keepdims=True)
    var = y.var(axis=(0, 2, 3), keepdims=True)
    g = gamma.reshape(1, C_OUT, 1, 1)
    b = beta.reshape(1, C_OUT, 1, 1)
    return (y - mean) * jax.lax.rsqrt(var + BN_EPS) * g + b


if __name__ == "__main__":
    key = jax.random.PRNGKey(0)
    k1, k2, k3, k4, kw, kg, kb = jax.random.split(key, 7)

    # module-implied shapes (channel counts fixed by the 832->128 conv)
    x169 = jax.random.normal(k1, (1, C_SPLITS[0], H, W), jnp.float32)
    x175 = jax.random.normal(k2, (1, C_SPLITS[1], H, W), jnp.float32)
    x181 = jax.random.normal(k3, (1, C_SPLITS[2], H, W), jnp.float32)
    x185 = jax.random.normal(k4, (1, C_SPLITS[3], H, W), jnp.float32)

    conv_w = jax.random.normal(kw, (C_OUT, C_IN, 1, 1), jnp.float32) * 0.02
    gamma = 1.0 + 0.1 * jax.random.normal(kg, (C_OUT,), jnp.float32)
    beta = 0.1 * jax.random.normal(kb, (C_OUT,), jnp.float32)

    w2d, g2d, b2d = prepare_params(conv_w, gamma, beta)   # hoisted constant prep
    shift_mats = jnp.asarray(_build_shift_mats())         # (4, 49, 49) constant

    out = forward(x169, x175, x181, x185, w2d, g2d, b2d, shift_mats)
    jax.block_until_ready(out)
    assert out.shape == (1, C_OUT, H, W)

    # sanity check against a pure-JAX reference (loose tol: bf16 weight DMA)
    ref = reference(x169, x175, x181, x185, conv_w, gamma, beta)
    max_err = float(jnp.max(jnp.abs(out - ref)))
    assert max_err < 1e-1, f"max abs error too large: {max_err}"
    print("KERNEL_OK")
</pallas_src>

<mosaic_0001>
module attributes {stable_mosaic.version = 11 : i64} {
  func.func @fused_kernel(%arg0: memref<256x49xf32, #tpu.memory_space<vmem>>, %arg1: memref<320x49xf32, #tpu.memory_space<vmem>>, %arg2: memref<128x49xf32, #tpu.memory_space<vmem>>, %arg3: memref<128x49xf32, #tpu.memory_space<vmem>>, %arg4: memref<4x49x49xf32, #tpu.memory_space<vmem>>, %arg5: memref<128x832xbf16, #tpu.memory_space<vmem>>, %arg6: memref<128x1xf32, #tpu.memory_space<vmem>>, %arg7: memref<128x1xf32, #tpu.memory_space<vmem>>, %arg8: memref<128x49xf32, #tpu.memory_space<vmem>>, %arg9: memref<832x49xf32, #tpu.memory_space<vmem>>) attributes {dimension_semantics = [], scalar_prefetch = 0 : i64, scratch_operands = 1 : i64, tpu.core_type = #tpu.core_type<tc>} {
    %c0 = arith.constant 0 : index
    %c0_0 = arith.constant 0 : index
    %0 = vector.load %arg0[%c0, %c0_0] : memref<256x49xf32, #tpu.memory_space<vmem>>, vector<256x49xf32>
    %c0_1 = arith.constant 0 : index
    %c0_2 = arith.constant 0 : index
    %1 = vector.load %arg9[%c0_1, %c0_2] : memref<832x49xf32, #tpu.memory_space<vmem>>, vector<256x49xf32>
    tpu.vector_store %arg9[%c0_1, %c0_2], %0 {strides = array<i32>} : memref<832x49xf32, #tpu.memory_space<vmem>>, vector<256x49xf32>,
    %c0_3 = arith.constant 0 : index
    %c0_4 = arith.constant 0 : index
    %2 = vector.load %arg1[%c0_3, %c0_4] : memref<320x49xf32, #tpu.memory_space<vmem>>, vector<320x49xf32>
    %c256 = arith.constant 256 : index
    %c0_5 = arith.constant 0 : index
    %3 = vector.load %arg9[%c256, %c0_5] : memref<832x49xf32, #tpu.memory_space<vmem>>, vector<320x49xf32>
    tpu.vector_store %arg9[%c256, %c0_5], %2 {strides = array<i32>} : memref<832x49xf32, #tpu.memory_space<vmem>>, vector<320x49xf32>,
    %c0_6 = arith.constant 0 : index
    %c0_7 = arith.constant 0 : index
    %4 = vector.load %arg2[%c0_6, %c0_7] : memref<128x49xf32, #tpu.memory_space<vmem>>, vector<128x49xf32>
    %c576 = arith.constant 576 : index
    %c0_8 = arith.constant 0 : index
    %5 = vector.load %arg9[%c576, %c0_8] : memref<832x49xf32, #tpu.memory_space<vmem>>, vector<128x49xf32>
    tpu.vector_store %arg9[%c576, %c0_8], %4 {strides = array<i32>} : memref<832x49xf32, #tpu.memory_space<vmem>>, vector<128x49xf32>,
    %c0_9 = arith.constant 0 : index
    %c0_10 = arith.constant 0 : index
    %6 = vector.load %arg3[%c0_9, %c0_10] : memref<128x49xf32, #tpu.memory_space<vmem>>, vector<128x49xf32>
    %c704 = arith.constant 704 : index
    %c0_11 = arith.constant 0 : index
    %7 = vector.load %arg9[%c704, %c0_11] : memref<832x49xf32, #tpu.memory_space<vmem>>, vector<128x49xf32>
    tpu.vector_store %arg9[%c704, %c0_11], %6 {strides = array<i32>} : memref<832x49xf32, #tpu.memory_space<vmem>>, vector<128x49xf32>,
    %c0_12 = arith.constant 0 : index
    %c0_13 = arith.constant 0 : index
    %8 = vector.load %arg9[%c0_12, %c0_13] : memref<832x49xf32, #tpu.memory_space<vmem>>, vector<832x49xf32>
    %c0_14 = arith.constant 0 : index
    %c0_15 = arith.constant 0 : index
    %c0_16 = arith.constant 0 : index
    %9 = vector.load %arg4[%c0_14, %c0_15, %c0_16] : memref<4x49x49xf32, #tpu.memory_space<vmem>>, vector<1x49x49xf32>
    %10 = vector.shape_cast %9 : vector<1x49x49xf32> to vector<49x49xf32>
    %cst = arith.constant dense<0.000000e+00> : vector<832x49xf32>
    %11 = tpu.matmul %8, %10, %cst {dimension_numbers = #tpu.dot_dimension_numbers<[1], [0], [0], [1], [0, 0, 1, 1], [], []>} : vector<832x49xf32>, vector<49x49xf32>, vector<832x49xf32> -> vector<832x49xf32>
    %c1 = arith.constant 1 : index
    %c0_17 = arith.constant 0 : index
    %c0_18 = arith.constant 0 : index
    %12 = vector.load %arg4[%c1, %c0_17, %c0_18] : memref<4x49x49xf32, #tpu.memory_space<vmem>>, vector<1x49x49xf32>
    %13 = vector.shape_cast %12 : vector<1x49x49xf32> to vector<49x49xf32>
    %cst_19 = arith.constant dense<0.000000e+00> : vector<832x49xf32>
    %14 = tpu.matmul %8, %13, %cst_19 {dimension_numbers = #tpu.dot_dimension_numbers<[1], [0], [0], [1], [0, 0, 1, 1], [], []>} : vector<832x49xf32>, vector<49x49xf32>, vector<832x49xf32> -> vector<832x49xf32>
    %15 = arith.maximumf %11, %14 : vector<832x49xf32>
    %16 = arith.maximumf %15, %8 : vector<832x49xf32>
    %c2 = arith.constant 2 : index
    %c0_20 = arith.constant 0 : index
    %c0_21 = arith.constant 0 : index
    %17 = vector.load %arg4[%c2, %c0_20, %c0_21] : memref<4x49x49xf32, #tpu.memory_space<vmem>>, vector<1x49x49xf32>
    %18 = vector.shape_cast %17 : vector<1x49x49xf32> to vector<49x49xf32>
    %cst_22 = arith.constant dense<0.000000e+00> : vector<832x49xf32>
    %19 = tpu.matmul %16, %18, %cst_22 {dimension_numbers = #tpu.dot_dimension_numbers<[1], [0], [0], [1], [0, 0, 1, 1], [], []>} : vector<832x49xf32>, vector<49x49xf32>, vector<832x49xf32> -> vector<832x49xf32>
    %c3 = arith.constant 3 : index
    %c0_23 = arith.constant 0 : index
    %c0_24 = arith.constant 0 : index
    %20 = vector.load %arg4[%c3, %c0_23, %c0_24] : memref<4x49x49xf32, #tpu.memory_space<vmem>>, vector<1x49x49xf32>
    %21 = vector.shape_cast %20 : vector<1x49x49xf32> to vector<49x49xf32>
    %cst_25 = arith.constant dense<0.000000e+00> : vector<832x49xf32>
    %22 = tpu.matmul %16, %21, %cst_25 {dimension_numbers = #tpu.dot_dimension_numbers<[1], [0], [0], [1], [0, 0, 1, 1], [], []>} : vector<832x49xf32>, vector<49x49xf32>, vector<832x49xf32> -> vector<832x49xf32>
    %23 = arith.maximumf %19, %22 : vector<832x49xf32>
    %24 = arith.maximumf %23, %16 : vector<832x49xf32>
    %c0_26 = arith.constant 0 : index
    %c0_27 = arith.constant 0 : index
    %25 = vector.load %arg5[%c0_26, %c0_27] : memref<128x832xbf16, #tpu.memory_space<vmem>>, vector<128x832xbf16>
    %26 = arith.extf %25 : vector<128x832xbf16> to vector<128x832xf32>
    %cst_28 = arith.constant dense<0.000000e+00> : vector<128x49xf32>
    %27 = tpu.matmul %26, %24, %cst_28 {dimension_numbers = #tpu.dot_dimension_numbers<[1], [0], [0], [1], [0, 0, 1, 1], [], []>} : vector<128x832xf32>, vector<832x49xf32>, vector<128x49xf32> -> vector<128x49xf32>
    %cst_29 = arith.constant dense<0.000000e+00> : vector<128xf32>
    %28 = vector.multi_reduction <add>, %27, %cst_29 [1] : vector<128x49xf32> to vector<128xf32>
    %29 = vector.shape_cast %28 : vector<128xf32> to vector<128x1xf32>
    %30 = arith.mulf %27, %27 : vector<128x49xf32>
    %cst_30 = arith.constant dense<0.000000e+00> : vector<128xf32>
    %31 = vector.multi_reduction <add>, %30, %cst_30 [1] : vector<128x49xf32> to vector<128xf32>
    %32 = vector.shape_cast %31 : vector<128xf32> to vector<128x1xf32>
    %cst_31 = arith.constant 4.900000e+01 : f32
    %33 = vector.broadcast %cst_31 : f32 to vector<128x1xf32>
    %34 = arith.divf %29, %33 : vector<128x1xf32>
    %cst_32 = arith.constant 4.900000e+01 : f32
    %35 = vector.broadcast %cst_32 : f32 to vector<128x1xf32>
    %36 = arith.divf %32, %35 : vector<128x1xf32>
    %37 = arith.mulf %34, %34 : vector<128x1xf32>
    %38 = arith.subf %36, %37 : vector<128x1xf32>
    %cst_33 = arith.constant 0.000000e+00 : f32
    %39 = vector.broadcast %cst_33 : f32 to vector<128x1xf32>
    %40 = arith.maximumf %38, %39 : vector<128x1xf32>
    %cst_34 = arith.constant 1.000000e-03 : f32
    %41 = vector.broadcast %cst_34 : f32 to vector<128x1xf32>
    %42 = arith.addf %40, %41 : vector<128x1xf32>
    %43 = math.rsqrt %42 : vector<128x1xf32>
    %c0_35 = arith.constant 0 : index
    %c0_36 = arith.constant 0 : index
    %44 = vector.load %arg6[%c0_35, %c0_36] : memref<128x1xf32, #tpu.memory_space<vmem>>, vector<128x1xf32>
    %45 = arith.mulf %43, %44 : vector<128x1xf32>
    %46 = vector.broadcast %34 : vector<128x1xf32> to vector<128x49xf32>
    %47 = arith.subf %27, %46 : vector<128x49xf32>
    %48 = vector.broadcast %45 : vector<128x1xf32> to vector<128x49xf32>
    %49 = arith.mulf %47, %48 : vector<128x49xf32>
    %c0_37 = arith.constant 0 : index
    %c0_38 = arith.constant 0 : index
    %50 = vector.load %arg7[%c0_37, %c0_38] : memref<128x1xf32, #tpu.memory_space<vmem>>, vector<128x1xf32>
    %51 = vector.broadcast %50 : vector<128x1xf32> to vector<128x49xf32>
    %52 = arith.addf %49, %51 : vector<128x49xf32>
    %c0_39 = arith.constant 0 : index
    %c0_40 = arith.constant 0 : index
    %53 = vector.load %arg8[%c0_39, %c0_40] : memref<128x49xf32, #tpu.memory_space<vmem>>, vector<128x49xf32>
    tpu.vector_store %arg8[%c0_39, %c0_40], %52 {strides = array<i32>} : memref<128x49xf32, #tpu.memory_space<vmem>>, vector<128x49xf32>,
    return
  }
}

</mosaic_0001>

<bundles_post_ra>
// kernel: forward.1
= control target key start
LH: loop header
LB: loop body
LE: loop exit
PB: predicated region body
PF: predicated region fallthrough
CT: control target
= control target key end

     0   :  { %vm661_vm0 = vcmask 1040384   ;;  %vm61_vm1 = vcmask 400384   ;;  %vm3942_vm2 = vcmask 523264   ;;  %s10179_s4 = inlined_call_operand.vmem [shape: f32[4,49,49], index: 4, kind: input, shape index: {}]   ;;  %s10180_s3 = inlined_call_operand.vmem [shape: f32[128,49], index: 3, kind: input, shape index: {}]   ;;  %s10181_s0 = inlined_call_operand.vmem [shape: f32[256,49], index: 0, kind: input, shape index: {}]   ;;  %s10182_s1 = inlined_call_operand.vmem [shape: f32[320,49], index: 1, kind: input, shape index: {}]   ;;  %s10183_s2 = inlined_call_operand.vmem [shape: f32[128,49], index: 2, kind: input, shape index: {}]   ;;  %s10184_s5 = inlined_call_operand.vmem [shape: bf16[128,832], index: 5, kind: input, shape index: {}]   ;;  %s10185_s7 = inlined_call_operand.vmem [shape: f32[128,1], index: 7, kind: input, shape index: {}]   ;;  %s10186_s6 = inlined_call_operand.vmem [shape: f32[128,1], index: 6, kind: input, shape index: {}]   ;;  %s10187_s8 = inlined_call_operand.vmem [shape: f32[128,49], index: 8, kind: output, shape index: {}]  }
   0x1   :  { %v348_v0 = vld [vmem:[%s10179_s4 + $0x30] sm:$0x1]  ;;  %v347_v1 = vld [vmem:[%s10179_s4 + $0x28] sm:$0xff]  ;;  %v346_v2 = vld [vmem:[%s10179_s4 + $0x20] sm:$0xff] }
   0x2   :  { %6957 = vmatprep.subr.msk.mxu1 %vm661_vm0, %v348_v0  ;;  %6237 = vmatprep.subr.msk.mxu0 %vm661_vm0, %v348_v0  ;;  %v214_v3 = vld [vmem:[%s10180_s3 + $0x40] sm:$0xff]  ;;  %v215_v4 = vld [vmem:[%s10180_s3 + $0x48] sm:$0xff]  ;;  %v216_v5 = vld [vmem:[%s10180_s3 + $0x50] sm:$0xff] }
   0x3   :  { %6964 = vmatpush3.msk.msra.mxu1 %vm661_vm0, %v348_v0  ;;  %6238 = vmatpush3.msk.msra.mxu0 %vm661_vm0, %v348_v0  ;;  %230 = vst.msk [vmem:[#allocation2 + $0x300] sm:$0xff] %vm61_vm1, %v214_v3  ;;  %231 = vst.msk [vmem:[#allocation2 + $0x308] sm:$0xff] %vm61_vm1, %v215_v4  ;;  %v217_v6 = vld [vmem:[%s10180_s3 + $0x58] sm:$0xff]  ;;  %v218_v8 = vld [vmem:[%s10180_s3 + $0x60] sm:$0xff] }
   0x4   :  { %6958 = vmatprep.subr.mxu1 %v347_v1  ;;  %6239 = vmatprep.subr.mxu0 %v347_v1  ;;  %v345_v7 = vld [vmem:[%s10179_s4 + $0x18] sm:$0xff]  ;;  %232 = vst.msk [vmem:[#allocation2 + $0x310] sm:$0xff] %vm61_vm1, %v216_v5  ;;  %233 = vst.msk [vmem:[#allocation2 + $0x318] sm:$0xff] %vm61_vm1, %v217_v6  ;;  %v219_v9 = vld [vmem:[%s10180_s3 + $0x68] sm:$0xff] }
   0x5   :  { %6965 = vmatpush3.msra.mxu1 %v347_v1  ;;  %6240 = vmatpush3.msra.mxu0 %v347_v1  ;;  %234 = vst.msk [vmem:[#allocation2 + $0x320] sm:$0xff] %vm61_vm1, %v218_v8  ;;  %v344_v10 = vld [vmem:[%s10179_s4 + $0x10] sm:$0xff]  ;;  %235 = vst.msk [vmem:[#allocation2 + $0x328] sm:$0xff] %vm61_vm1, %v219_v9  ;;  %v221_v12 = vld [vmem:[%s10180_s3 + $0x78] sm:$0xff] }
   0x6   :  { %6959 = vmatprep.subr.mxu1 %v346_v2  ;;  %6241 = vmatprep.subr.mxu0 %v346_v2  ;;  %v220_v11 = vld [vmem:[%s10180_s3 + $0x70] sm:$0xff]  ;;  %v343_v13 = vld [vmem:[%s10179_s4 + $0x8] sm:$0xff]  ;;  %237 = vst.msk [vmem:[#allocation2 + $0x338] sm:$0xff] %vm61_vm1, %v221_v12  ;;  %v29_v14 = vld [vmem:[%s10181_s0] sm:$0xff] }
   0x7   :  { %6966 = vmatpush3.msra.mxu1 %v346_v2  ;;  %6242 = vmatpush3.msra.mxu0 %v346_v2  ;;  %236 = vst.msk [vmem:[#allocation2 + $0x330] sm:$0xff] %vm61_vm1, %v220_v11  ;;  %v30_v15 = vld [vmem:[%s10181_s0 + $0x8] sm:$0xff]  ;;  %62 = vst.msk [vmem:[#allocation2] sm:$0xff] %vm61_vm1, %v29_v14  ;;  %v31_v16 = vld [vmem:[%s10181_s0 + $0x10] sm:$0xff] }
   0x8   :  { %6960 = vmatprep.subr.mxu1 %v345_v7  ;;  %6243 = vmatprep.subr.mxu0 %v345_v7  ;;  %63 = vst.msk [vmem:[#allocation2 + $0x8] sm:$0xff] %vm61_vm1, %v30_v15  ;;  %v32_v17 = vld [vmem:[%s10181_s0 + $0x18] sm:$0xff]  ;;  %v33_v18 = vld [vmem:[%s10181_s0 + $0x20] sm:$0xff]  ;;  %64 = vst.msk [vmem:[#allocation2 + $0x10] sm:$0xff] %vm61_vm1, %v31_v16 }
   0x9   :  { %6967 = vmatpush3.msra.mxu1 %v345_v7  ;;  %6244 = vmatpush3.msra.mxu0 %v345_v7  ;;  %65 = vst.msk [vmem:[#allocation2 + $0x18] sm:$0xff] %vm61_vm1, %v32_v17  ;;  %66 = vst.msk [vmem:[#allocation2 + $0x20] sm:$0xff] %vm61_vm1, %v33_v18  ;;  %v34_v19 = vld [vmem:[%s10181_s0 + $0x28] sm:$0xff]  ;;  %v35_v20 = vld [vmem:[%s10181_s0 + $0x30] sm:$0xff] }
   0xa   :  { %6961 = vmatprep.subr.mxu1 %v344_v10  ;;  %6245 = vmatprep.subr.mxu0 %v344_v10  ;;  %v36_v21 = vld [vmem:[%s10181_s0 + $0x38] sm:$0xff]  ;;  %v342_v22 = vld [vmem:[%s10179_s4] sm:$0xff]  ;;  %67 = vst.msk [vmem:[#allocation2 + $0x28] sm:$0xff] %vm61_vm1, %v34_v19  ;;  %68 = vst.msk [vmem:[#allocation2 + $0x30] sm:$0xff] %vm61_vm1, %v35_v20 }
   0xb   :  { %6968 = vmatpush3.msra.mxu1 %v344_v10  ;;  %v334_v23 = vld [vmem:[#allocation2 + $0x300] sm:$0xff]  ;;  %6246 = vmatpush3.msra.mxu0 %v344_v10  ;;  %69 = vst.msk [vmem:[#allocation2 + $0x38] sm:$0xff] %vm61_vm1, %v36_v21  ;;  %v5183_v25 = vld [vmem:[%s10179_s4 + $0x68] sm:$0x1]  ;;  %v39_v28 = vld [vmem:[%s10181_s0 + $0x50] sm:$0xff] }
   0xc   :  { %v37_v24 = vld [vmem:[%s10181_s0 + $0x40] sm:$0xff]  ;;  %6962 = vmatprep.subr.mxu1 %v343_v13  ;;  %6395 = vmatprep.mubr.msk.f32.mxu1 %vm61_vm1, %v334_v23  ;;  %v38_v26 = vld [vmem:[%s10181_s0 + $0x48] sm:$0xff]  ;;  %v40_v29 = vld [vmem:[%s10181_s0 + $0x58] sm:$0xff]  ;;  %72 = vst.msk [vmem:[#allocation2 + $0x50] sm:$0xff] %vm61_vm1, %v39_v28 }
   0xd   :  { %70 = vst.msk [vmem:[#allocation2 + $0x40] sm:$0xff] %vm61_vm1, %v37_v24  ;;  %6969 = vmatpush3.msra.mxu1 %v343_v13  ;;  %v335_v27 = vld [vmem:[#allocation2 + $0x308] sm:$0xff]  ;;  %6247 = vmatprep.subr.mxu0 %v343_v13  ;;  %71 = vst.msk [vmem:[#allocation2 + $0x48] sm:$0xff] %vm61_vm1, %v38_v26  ;;  %v336_v30 = vld [vmem:[#allocation2 + $0x310] sm:$0xff] }
   0xe   :  { %6963 = vmatprep.subr.mxu1 %v342_v22  ;;  %6248 = vmatpush3.msra.mxu0 %v343_v13  ;;  %73 = vst.msk [vmem:[#allocation2 + $0x58] sm:$0xff] %vm61_vm1, %v40_v29  ;;  %v41_v31 = vld [vmem:[%s10181_s0 + $0x60] sm:$0xff]  ;;  %v42_v32 = vld [vmem:[%s10181_s0 + $0x68] sm:$0xff]  ;;  %v43_v34 = vld [vmem:[%s10181_s0 + $0x70] sm:$0xff] }
   0xf   :  { %6970 = vmatpush3.msra.mxu1 %v342_v22  ;;  %v5182_v33 = vld [vmem:[%s10179_s4 + $0x60] sm:$0xff]  ;;  %6249 = vmatprep.subr.mxu0 %v342_v22  ;;  %74 = vst.msk [vmem:[#allocation2 + $0x60] sm:$0xff] %vm61_vm1, %v41_v31  ;;  %75 = vst.msk [vmem:[#allocation2 + $0x68] sm:$0xff] %vm61_vm1, %v42_v32  ;;  %v44_v36 = vld [vmem:[%s10181_s0 + $0x78] sm:$0xff] }
  0x10   :  { %6396 = vmatmul.mubr.msk.f32.vlgmr.msra.gmra.mxu1 %vm61_vm1, %v335_v27  ;;  %6407 = vmatprep.subr.msk.mxu1 %vm661_vm0, %v5183_v25  ;;  %v7229_v35 = vld [vmem:[#allocation2] sm:$0xff]  ;;  %76 = vst.msk [vmem:[#allocation2 + $0x70] sm:$0xff] %vm61_vm1, %v43_v34  ;;  %v337_v37 = vld [vmem:[#allocation2 + $0x318] sm:$0xff]  ;;  %77 = vst.msk [vmem:[#allocation2 + $0x78] sm:$0xff] %vm61_vm1, %v44_v36 }
  0x11   :  { %6398 = vmatprep.mubr.msk.f32.mxu1 %vm61_vm1, %v336_v30  ;;  %6408 = vmatpush3.msk.msra.mxu1 %vm661_vm0, %v5183_v25  ;;  %v5181_v38 = vld [vmem:[%s10179_s4 + $0x58] sm:$0xff]  ;;  %v338_v39 = vld [vmem:[#allocation2 + $0x320] sm:$0xff]  ;;  %v5180_v40 = vld [vmem:[%s10179_s4 + $0x50] sm:$0xff] }
  0x12   :  { %6409 = vmatprep.subr.mxu1 %v5182_v33  ;;  %6250 = vmatpush3.msra.mxu0 %v342_v22  ;;  %v7246_v41 = vld [vmem:[#allocation2 + $0x8] sm:$0xff]  ;;  %v45_v42 = vld [vmem:[%s10181_s0 + $0x80] sm:$0xff]  ;;  %v7255_v44 = vld [vmem:[#allocation2 + $0x10] sm:$0xff] }
  0x13   :  { %6410 = vmatpush3.msra.mxu1 %v5182_v33  ;;  %6251 = vmatprep.mubr.msk.f32.mxu0 %vm61_vm1, %v7229_v35  ;;  %v46_v43 = vld [vmem:[%s10181_s0 + $0x88] sm:$0xff]  ;;  %78 = vst.msk [vmem:[#allocation2 + $0x80] sm:$0xff] %vm61_vm1, %v45_v42  ;;  %v47_v45 = vld [vmem:[%s10181_s0 + $0x90] sm:$0xff]  ;;  %v48_v46 = vld [vmem:[%s10181_s0 + $0x98] sm:$0xff] }
  0x14   :  { %6399 = vmatmul.mubr.msk.f32.gmra.mxu1 %vm61_vm1, %v337_v37  ;;  %6411 = vmatprep.subr.mxu1 %v5181_v38  ;;  %79 = vst.msk [vmem:[#allocation2 + $0x88] sm:$0xff] %vm61_vm1, %v46_v43  ;;  %v339_v47 = vld [vmem:[#allocation2 + $0x328] sm:$0xff]  ;;  %80 = vst.msk [vmem:[#allocation2 + $0x90] sm:$0xff] %vm61_vm1, %v47_v45  ;;  %v49_v49 = vld [vmem:[%s10181_s0 + $0xa0] sm:$0xff] }
  0x15   :  { %6401 = vmatprep.mubr.msk.f32.mxu1 %vm61_vm1, %v338_v39  ;;  %6412 = vmatpush3.msra.mxu1 %v5181_v38  ;;  %v5179_v48 = vld [vmem:[%s10179_s4 + $0x48] sm:$0xff]  ;;  %81 = vst.msk [vmem:[#allocation2 + $0x98] sm:$0xff] %vm61_vm1, %v48_v46  ;;  %v340_v50 = vld [vmem:[#allocation2 + $0x330] sm:$0xff]  ;;  %v5178_v51 = vld [vmem:[%s10179_s4 + $0x40] sm:$0xff] }
  0x16   :  { %6413 = vmatprep.subr.mxu1 %v5180_v40  ;;  %6252 = vmatmul.mubr.msk.f32.vlgmr.msra.gmra.mxu0 %vm61_vm1, %v7246_v41  ;;  %82 = vst.msk [vmem:[#allocation2 + $0xa0] sm:$0xff] %vm61_vm1, %v49_v49  ;;  %v50_v52 = vld [vmem:[%s10181_s0 + $0xa8] sm:$0xff]  ;;  %v341_v53 = vld [vmem:[#allocation2 + $0x338] sm:$0xff]  ;;  %v51_v56 = vld [vmem:[%s10181_s0 + $0xb0] sm:$0xff] }
  0x17   :  { %6414 = vmatpush3.msra.mxu1 %v5180_v40  ;;  %v5177_v54 = vld [vmem:[%s10179_s4 + $0x38] sm:$0xff]  ;;  %6254 = vmatprep.mubr.msk.f32.mxu0 %vm61_vm1, %v7255_v44  ;;  %83 = vst.msk [vmem:[#allocation2 + $0xa8] sm:$0xff] %vm61_vm1, %v50_v52  ;;  %v7298_v58 = vld [vmem:[#allocation2 + $0x20] sm:$0xff]  ;;  %84 = vst.msk [vmem:[#allocation2 + $0xb0] sm:$0xff] %vm61_vm1, %v51_v56 }
  0x18   :  { %v7288_v55 = vld [vmem:[#allocation2 + $0x18] sm:$0xff]  ;;  %6402 = vmatmul.mubr.msk.f32.gmra.mxu1 %vm61_vm1, %v339_v47  ;;  %6415 = vmatprep.subr.mxu1 %v5179_v48  ;;  %v53_v59 = vld [vmem:[%s10181_s0 + $0xc0] sm:$0xff]  ;;  %v54_v60 = vld [vmem:[%s10181_s0 + $0xc8] sm:$0xff] }
  0x19   :  { %v52_v57 = vld [vmem:[%s10181_s0 + $0xb8] sm:$0xff]  ;;  %6404 = vmatprep.mubr.msk.f32.mxu1 %vm61_vm1, %v340_v50  ;;  %6416 = vmatpush3.msra.mxu1 %v5179_v48  ;;  %86 = vst.msk [vmem:[#allocation2 + $0xc0] sm:$0xff] %vm61_vm1, %v53_v59  ;;  %87 = vst.msk [vmem:[#allocation2 + $0xc8] sm:$0xff] %vm61_vm1, %v54_v60  ;;  %v55_v61 = vld [vmem:[%s10181_s0 + $0xd0] sm:$0xff] }
  0x1a   :  { %85 = vst.msk [vmem:[#allocation2 + $0xb8] sm:$0xff] %vm61_vm1, %v52_v57  ;;  %v56_v62 = vld [vmem:[%s10181_s0 + $0xd8] sm:$0xff]  ;;  %v57_v63 = vld [vmem:[%s10181_s0 + $0xe0] sm:$0xff]  ;;  %6417 = vmatprep.subr.mxu1 %v5178_v51  ;;  %6255 = vmatmul.mubr.msk.f32.gmra.mxu0 %vm61_vm1, %v7288_v55  ;;  %88 = vst.msk [vmem:[#allocation2 + $0xd0] sm:$0xff] %vm61_vm1, %v55_v61 }
  0x1b   :  { %89 = vst.msk [vmem:[#allocation2 + $0xd8] sm:$0xff] %vm61_vm1, %v56_v62  ;;  %90 = vst.msk [vmem:[#allocation2 + $0xe0] sm:$0xff] %vm61_vm1, %v57_v63  ;;  %v58_v0 = vld [vmem:[%s10181_s0 + $0xe8] sm:$0xff]  ;;  %v59_v1 = vld [vmem:[%s10181_s0 + $0xf0] sm:$0xff]  ;;  %6418 = vmatpush3.msra.mxu1 %v5178_v51  ;;  %6257 = vmatprep.mubr.msk.f32.mxu0 %vm61_vm1, %v7298_v58 }
  0x1c   :  { %v60_v2 = vld [vmem:[%s10181_s0 + $0xf8] sm:$0xff]  ;;  %v7336_v3 = vld [vmem:[#allocation2 + $0x28] sm:$0xff]  ;;  %91 = vst.msk [vmem:[#allocation2 + $0xe8] sm:$0xff] %vm61_vm1, %v58_v0  ;;  %92 = vst.msk [vmem:[#allocation2 + $0xf0] sm:$0xff] %vm61_vm1, %v59_v1  ;;  %6405 = vmatmul.mubr.msk.f32.gmra.mxu1 %vm61_vm1, %v341_v53  ;;  %6419 = vmatprep.subr.mxu1 %v5177_v54 }
  0x1d   :  { %93 = vst.msk [vmem:[#allocation2 + $0xf8] sm:$0xff] %vm61_vm1, %v60_v2  ;;  %v94_v4 = vld [vmem:[%s10182_s1] sm:$0xff]  ;;  %v7345_v5 = vld [vmem:[#allocation2 + $0x30] sm:$0xff]  ;;  %v95_v6 = vld [vmem:[%s10182_s1 + $0x8] sm:$0xff]  ;;  %6420 = vmatpush3.msra.mxu1 %v5177_v54  ;;  %6421 = vmatprep.mubr.msk.f32.mxu1 %vm61_vm1, %v7229_v35 }
  0x1e   :  { %134 = vst.msk [vmem:[#allocation2 + $0x100] sm:$0xff] %vm61_vm1, %v94_v4  ;;  %135 = vst.msk [vmem:[#allocation2 + $0x108] sm:$0xff] %vm61_vm1, %v95_v6  ;;  %v96_v7 = vld [vmem:[%s10182_s1 + $0x10] sm:$0xff]  ;;  %v97_v8 = vld [vmem:[%s10182_s1 + $0x18] sm:$0xff]  ;;  %6258 = vmatmul.mubr.msk.f32.gmra.mxu0 %vm61_vm1, %v7336_v3 }
  0x1f   :  { %136 = vst.msk [vmem:[#allocation2 + $0x110] sm:$0xff] %vm61_vm1, %v96_v7  ;;  %137 = vst.msk [vmem:[#allocation2 + $0x118] sm:$0xff] %vm61_vm1, %v97_v8  ;;  %v98_v9 = vld [vmem:[%s10182_s1 + $0x20] sm:$0xff]  ;;  %v99_v10 = vld [vmem:[%s10182_s1 + $0x28] sm:$0xff]  ;;  %6260 = vmatprep.mubr.msk.f32.mxu0 %vm61_vm1, %v7345_v5 }
  0x20   :  { %v7372_v11 = vld [vmem:[#allocation2 + $0x38] sm:$0xff]  ;;  %138 = vst.msk [vmem:[#allocation2 + $0x120] sm:$0xff] %vm61_vm1, %v98_v9  ;;  %139 = vst.msk [vmem:[#allocation2 + $0x128] sm:$0xff] %vm61_vm1, %v99_v10  ;;  %v100_v12 = vld [vmem:[%s10182_s1 + $0x30] sm:$0xff]  ;;  %6422 = vmatmul.mubr.msk.f32.vlgmr.msra.gmra.mxu1 %vm61_vm1, %v7246_v41 }
  0x21   :  { %v7381_v13 = vld [vmem:[#allocation2 + $0x40] sm:$0xff]  ;;  %140 = vst.msk [vmem:[#allocation2 + $0x130] sm:$0xff] %vm61_vm1, %v100_v12  ;;  %v101_v14 = vld [vmem:[%s10182_s1 + $0x38] sm:$0xff]  ;;  %6424 = vmatprep.mubr.msk.f32.mxu1 %vm61_vm1, %v7255_v44  ;;  %v7394_v15 = vld [vmem:[#allocation2 + $0x48] sm:$0xff] }
  0x22   :  { %141 = vst.msk [vmem:[#allocation2 + $0x138] sm:$0xff] %vm61_vm1, %v101_v14  ;;  %6261 = vmatmul.mubr.msk.f32.gmra.mxu0 %vm61_vm1, %v7372_v11  ;;  %v102_v16 = vld [vmem:[%s10182_s1 + $0x40] sm:$0xff]  ;;  %v103_v17 = vld [vmem:[%s10182_s1 + $0x48] sm:$0xff]  ;;  %v7404_v18 = vld [vmem:[#allocation2 + $0x50] sm:$0xff] }
  0x23   :  { %6263 = vmatprep.mubr.msk.f32.mxu0 %vm61_vm1, %v7381_v13  ;;  %142 = vst.msk [vmem:[#allocation2 + $0x140] sm:$0xff] %vm61_vm1, %v102_v16  ;;  %143 = vst.msk [vmem:[#allocation2 + $0x148] sm:$0xff] %vm61_vm1, %v103_v17  ;;  %v104_v19 = vld [vmem:[%s10182_s1 + $0x50] sm:$0xff]  ;;  %v105_v20 = vld [vmem:[%s10182_s1 + $0x58] sm:$0xff] }
  0x24   :  { %6425 = vmatmul.mubr.msk.f32.gmra.mxu1 %vm61_vm1, %v7288_v55  ;;  %144 = vst.msk [vmem:[#allocation2 + $0x150] sm:$0xff] %vm61_vm1, %v104_v19  ;;  %145 = vst.msk [vmem:[#allocation2 + $0x158] sm:$0xff] %vm61_vm1, %v105_v20  ;;  %v106_v21 = vld [vmem:[%s10182_s1 + $0x60] sm:$0xff]  ;;  %v107_v22 = vld [vmem:[%s10182_s1 + $0x68] sm:$0xff] }
  0x25   :  { %6427 = vmatprep.mubr.msk.f32.mxu1 %vm61_vm1, %v7298_v58  ;;  %146 = vst.msk [vmem:[#allocation2 + $0x160] sm:$0xff] %vm61_vm1, %v106_v21  ;;  %v7429_v23 = vld [vmem:[#allocation2 + $0x58] sm:$0xff]  ;;  %147 = vst.msk [vmem:[#allocation2 + $0x168] sm:$0xff] %vm61_vm1, %v107_v22  ;;  %v108_v24 = vld [vmem:[%s10182_s1 + $0x70] sm:$0xff] }
  0x26   :  { %6264 = vmatmul.mubr.msk.f32.gmra.mxu0 %vm61_vm1, %v7394_v15  ;;  %v109_v25 = vld [vmem:[%s10182_s1 + $0x78] sm:$0xff]  ;;  %v7440_v26 = vld [vmem:[#allocation2 + $0x60] sm:$0xff]  ;;  %148 = vst.msk [vmem:[#allocation2 + $0x170] sm:$0xff] %vm61_vm1, %v108_v24  ;;  %v111_v28 = vld [vmem:[%s10182_s1 + $0x88] sm:$0xff] }
  0x27   :  { %6266 = vmatprep.mubr.msk.f32.mxu0 %vm61_vm1, %v7404_v18  ;;  %149 = vst.msk [vmem:[#allocation2 + $0x178] sm:$0xff] %vm61_vm1, %v109_v25  ;;  %v110_v27 = vld [vmem:[%s10182_s1 + $0x80] sm:$0xff]  ;;  %151 = vst.msk [vmem:[#allocation2 + $0x188] sm:$0xff] %vm61_vm1, %v111_v28  ;;  %v112_v29 = vld [vmem:[%s10182_s1 + $0x90] sm:$0xff] }
  0x28   :  { %6428 = vmatmul.mubr.msk.f32.gmra.mxu1 %vm61_vm1, %v7336_v3  ;;  %150 = vst.msk [vmem:[#allocation2 + $0x180] sm:$0xff] %vm61_vm1, %v110_v27  ;;  %v113_v30 = vld [vmem:[%s10182_s1 + $0x98] sm:$0xff]  ;;  %v114_v31 = vld [vmem:[%s10182_s1 + $0xa0] sm:$0xff]  ;;  %152 = vst.msk [vmem:[#allocation2 + $0x190] sm:$0xff] %vm61_vm1, %v112_v29 }
  0x29   :  { %6430 = vmatprep.mubr.msk.f32.mxu1 %vm61_vm1, %v7345_v5  ;;  %153 = vst.msk [vmem:[#allocation2 + $0x198] sm:$0xff] %vm61_vm1, %v113_v30  ;;  %154 = vst.msk [vmem:[#allocation2 + $0x1a0] sm:$0xff] %vm61_vm1, %v114_v31  ;;  %v115_v32 = vld [vmem:[%s10182_s1 + $0xa8] sm:$0xff]  ;;  %v116_v33 = vld [vmem:[%s10182_s1 + $0xb0] sm:$0xff] }
  0x2a   :  { %6267 = vmatmul.mubr.msk.f32.gmra.mxu0 %vm61_vm1, %v7429_v23  ;;  %v117_v34 = vld [vmem:[%s10182_s1 + $0xb8] sm:$0xff]  ;;  %v7479_v35 = vld [vmem:[#allocation2 + $0x68] sm:$0xff]  ;;  %155 = vst.msk [vmem:[#allocation2 + $0x1a8] sm:$0xff] %vm61_vm1, %v115_v32  ;;  %156 = vst.msk [vmem:[#allocation2 + $0x1b0] sm:$0xff] %vm61_vm1, %v116_v33 }
  0x2b   :  { %6269 = vmatprep.mubr.msk.f32.mxu0 %vm61_vm1, %v7440_v26  ;;  %157 = vst.msk [vmem:[#allocation2 + $0x1b8] sm:$0xff] %vm61_vm1, %v117_v34  ;;  %v118_v36 = vld [vmem:[%s10182_s1 + $0xc0] sm:$0xff]  ;;  %v7489_v37 = vld [vmem:[#allocation2 + $0x70] sm:$0xff]  ;;  %v119_v38 = vld [vmem:[%s10182_s1 + $0xc8] sm:$0xff] }
  0x2c   :  { %6431 = vmatmul.mubr.msk.f32.gmra.mxu1 %vm61_vm1, %v7372_v11  ;;  %158 = vst.msk [vmem:[#allocation2 + $0x1c0] sm:$0xff] %vm61_vm1, %v118_v36  ;;  %159 = vst.msk [vmem:[#allocation2 + $0x1c8] sm:$0xff] %vm61_vm1, %v119_v38  ;;  %v120_v39 = vld [vmem:[%s10182_s1 + $0xd0] sm:$0xff]  ;;  %v121_v40 = vld [vmem:[%s10182_s1 + $0xd8] sm:$0xff] }
  0x2d   :  { %6433 = vmatprep.mubr.msk.f32.mxu1 %vm61_vm1, %v7381_v13  ;;  %160 = vst.msk [vmem:[#allocation2 + $0x1d0] sm:$0xff] %vm61_vm1, %v120_v39  ;;  %161 = vst.msk [vmem:[#allocation2 + $0x1d8] sm:$0xff] %vm61_vm1, %v121_v40  ;;  %v122_v41 = vld [vmem:[%s10182_s1 + $0xe0] sm:$0xff]  ;;  %v123_v42 = vld [vmem:[%s10182_s1 + $0xe8] sm:$0xff] }
  0x2e   :  { %6270 = vmatmul.mubr.msk.f32.gmra.mxu0 %vm61_vm1, %v7479_v35  ;;  %v7516_v43 = vld [vmem:[#allocation2 + $0x78] sm:$0xff]  ;;  %162 = vst.msk [vmem:[#allocation2 + $0x1e0] sm:$0xff] %vm61_vm1, %v122_v41  ;;  %163 = vst.msk [vmem:[#allocation2 + $0x1e8] sm:$0xff] %vm61_vm1, %v123_v42  ;;  %v124_v44 = vld [vmem:[%s10182_s1 + $0xf0] sm:$0xff] }
  0x2f   :  { %6272 = vmatprep.mubr.msk.f32.mxu0 %vm61_vm1, %v7489_v37  ;;  %v7525_v45 = vld [vmem:[#allocation2 + $0x80] sm:$0xff]  ;;  %164 = vst.msk [vmem:[#allocation2 + $0x1f0] sm:$0xff] %vm61_vm1, %v124_v44  ;;  %v125_v46 = vld [vmem:[%s10182_s1 + $0xf8] sm:$0xff]  ;;  %v7538_v47 = vld [vmem:[#allocation2 + $0x88] sm:$0xff] }
  0x30   :  { %6434 = vmatmul.mubr.msk.f32.gmra.mxu1 %vm61_vm1, %v7394_v15  ;;  %165 = vst.msk [vmem:[#allocation2 + $0x1f8] sm:$0xff] %vm61_vm1, %v125_v46  ;;  %v126_v48 = vld [vmem:[%s10182_s1 + $0x100] sm:$0xff]  ;;  %v127_v49 = vld [vmem:[%s10182_s1 + $0x108] sm:$0xff]  ;;  %v7548_v50 = vld [vmem:[#allocation2 + $0x90] sm:$0xff] }
  0x31   :  { %6436 = vmatprep.mubr.msk.f32.mxu1 %vm61_vm1, %v7404_v18  ;;  %166 = vst.msk [vmem:[#allocation2 + $0x200] sm:$0xff] %vm61_vm1, %v126_v48  ;;  %167 = vst.msk [vmem:[#allocation2 + $0x208] sm:$0xff] %vm61_vm1, %v127_v49  ;;  %v128_v51 = vld [vmem:[%s10182_s1 + $0x110] sm:$0xff]  ;;  %v129_v52 = vld [vmem:[%s10182_s1 + $0x118] sm:$0xff] }
  0x32   :  { %6273 = vmatmul.mubr.msk.f32.gmra.mxu0 %vm61_vm1, %v7516_v43  ;;  %168 = vst.msk [vmem:[#allocation2 + $0x210] sm:$0xff] %vm61_vm1, %v128_v51  ;;  %169 = vst.msk [vmem:[#allocation2 + $0x218] sm:$0xff] %vm61_vm1, %v129_v52  ;;  %v130_v53 = vld [vmem:[%s10182_s1 + $0x120] sm:$0xff]  ;;  %v131_v54 = vld [vmem:[%s10182_s1 + $0x128] sm:$0xff] }
  0x33   :  { %6275 = vmatprep.mubr.msk.f32.mxu0 %vm61_vm1, %v7525_v45  ;;  %170 = vst.msk [vmem:[#allocation2 + $0x220] sm:$0xff] %vm61_vm1, %v130_v53  ;;  %v7573_v55 = vld [vmem:[#allocation2 + $0x98] sm:$0xff]  ;;  %171 = vst.msk [vmem:[#allocation2 + $0x228] sm:$0xff] %vm61_vm1, %v131_v54  ;;  %v132_v56 = vld [vmem:[%s10182_s1 + $0x130] sm:$0xff] }
  0x34   :  { %6437 = vmatmul.mubr.msk.f32.gmra.mxu1 %vm61_vm1, %v7429_v23  ;;  %v133_v57 = vld [vmem:[%s10182_s1 + $0x138] sm:$0xff]  ;;  %v7584_v58 = vld [vmem:[#allocation2 + $0xa0] sm:$0xff]  ;;  %172 = vst.msk [vmem:[#allocation2 + $0x230] sm:$0xff] %vm61_vm1, %v132_v56  ;;  %v175_v60 = vld [vmem:[%s10183_s2 + $0x8] sm:$0xff] }
  0x35   :  { %6439 = vmatprep.mubr.msk.f32.mxu1 %vm61_vm1, %v7440_v26  ;;  %173 = vst.msk [vmem:[#allocation2 + $0x238] sm:$0xff] %vm61_vm1, %v133_v57  ;;  %v174_v59 = vld [vmem:[%s10183_s2] sm:$0xff]  ;;  %191 = vst.msk [vmem:[#allocation2 + $0x248] sm:$0xff] %vm61_vm1, %v175_v60  ;;  %v176_v61 = vld [vmem:[%s10183_s2 + $0x10] sm:$0xff] }
  0x36   :  { %6276 = vmatmul.mubr.msk.f32.gmra.mxu0 %vm61_vm1, %v7538_v47  ;;  %190 = vst.msk [vmem:[#allocation2 + $0x240] sm:$0xff] %vm61_vm1, %v174_v59  ;;  %v177_v62 = vld [vmem:[%s10183_s2 + $0x18] sm:$0xff]  ;;  %v178_v63 = vld [vmem:[%s10183_s2 + $0x20] sm:$0xff]  ;;  %192 = vst.msk [vmem:[#allocation2 + $0x250] sm:$0xff] %vm61_vm1, %v176_v61 }
  0x37   :  { %6278 = vmatprep.mubr.msk.f32.mxu0 %vm61_vm1, %v7548_v50  ;;  %193 = vst.msk [vmem:[#allocation2 + $0x258] sm:$0xff] %vm61_vm1, %v177_v62  ;;  %194 = vst.msk [vmem:[#allocation2 + $0x260] sm:$0xff] %vm61_vm1, %v178_v63  ;;  %v179_v0 = vld [vmem:[%s10183_s2 + $0x28] sm:$0xff]  ;;  %v180_v1 = vld [vmem:[%s10183_s2 + $0x30] sm:$0xff] }
  0x38   :  { %6440 = vmatmul.mubr.msk.f32.gmra.mxu1 %vm61_vm1, %v7479_v35  ;;  %v181_v2 = vld [vmem:[%s10183_s2 + $0x38] sm:$0xff]  ;;  %v7623_v4 = vld [vmem:[#allocation2 + $0xa8] sm:$0xff]  ;;  %195 = vst.msk [vmem:[#allocation2 + $0x268] sm:$0xff] %vm61_vm1, %v179_v0  ;;  %196 = vst.msk [vmem:[#allocation2 + $0x270] sm:$0xff] %vm61_vm1, %v180_v1 }
  0x39   :  { %6442 = vmatprep.mubr.msk.f32.mxu1 %vm61_vm1, %v7489_v37  ;;  %197 = vst.msk [vmem:[#allocation2 + $0x278] sm:$0xff] %vm61_vm1, %v181_v2  ;;  %v182_v6 = vld [vmem:[%s10183_s2 + $0x40] sm:$0xff]  ;;  %v7633_v7 = vld [vmem:[#allocation2 + $0xb0] sm:$0xff]  ;;  %v183_v8 = vld [vmem:[%s10183_s2 + $0x48] sm:$0xff] }
  0x3a   :  { %6279 = vmatmul.mubr.msk.f32.gmra.mxu0 %vm61_vm1, %v7573_v55  ;;  %198 = vst.msk [vmem:[#allocation2 + $0x280] sm:$0xff] %vm61_vm1, %v182_v6  ;;  %199 = vst.msk [vmem:[#allocation2 + $0x288] sm:$0xff] %vm61_vm1, %v183_v8  ;;  %v184_v9 = vld [vmem:[%s10183_s2 + $0x50] sm:$0xff]  ;;  %v185_v10 = vld [vmem:[%s10183_s2 + $0x58] sm:$0xff] }
  0x3b   :  { %6281 = vmatprep.mubr.msk.f32.mxu0 %vm61_vm1, %v7584_v58  ;;  %200 = vst.msk [vmem:[#allocation2 + $0x290] sm:$0xff] %vm61_vm1, %v184_v9  ;;  %201 = vst.msk [vmem:[#allocation2 + $0x298] sm:$0xff] %vm61_vm1, %v185_v10  ;;  %v186_v12 = vld [vmem:[%s10183_s2 + $0x60] sm:$0xff]  ;;  %v7657_v14 = vld [vmem:[#allocation2 + $0xb8] sm:$0xff] }
  0x3c   :  { %6443 = vmatmul.mubr.msk.f32.gmra.mxu1 %vm61_vm1, %v7516_v43  ;;  %202 = vst.msk [vmem:[#allocation2 + $0x2a0] sm:$0xff] %vm61_vm1, %v186_v12  ;;  %v187_v16 = vld [vmem:[%s10183_s2 + $0x68] sm:$0xff]  ;;  %v7665_v17 = vld [vmem:[#allocation2 + $0xc0] sm:$0xff]  ;;  %v188_v20 = vld [vmem:[%s10183_s2 + $0x70] sm:$0xff] }
  0x3d   :  { %6445 = vmatprep.mubr.msk.f32.mxu1 %vm61_vm1, %v7525_v45  ;;  %203 = vst.msk [vmem:[#allocation2 + $0x2a8] sm:$0xff] %vm61_vm1, %v187_v16  ;;  %v7674_v19 = vld [vmem:[#allocation2 + $0xc8] sm:$0xff]  ;;  %v189_v21 = vld [vmem:[%s10183_s2 + $0x78] sm:$0xff]  ;;  %v7684_v22 = vld [vmem:[#allocation2 + $0xd0] sm:$0xff] }
  0x3e   :  { %6282 = vmatmul.mubr.msk.f32.gmra.mxu0 %vm61_vm1, %v7623_v4  ;;  %v5407_v24 = vld [vmem:[%s10179_s4 + $0xd8] sm:$0x1]  ;;  %204 = vst.msk [vmem:[#allocation2 + $0x2b0] sm:$0xff] %vm61_vm1, %v188_v20  ;;  %205 = vst.msk [vmem:[#allocation2 + $0x2b8] sm:$0xff] %vm61_vm1, %v189_v21  ;;  %v206_v25 = vld [vmem:[%s10180_s3] sm:$0xff] }
  0x3f   :  { %6284 = vmatprep.mubr.msk.f32.mxu0 %vm61_vm1, %v7633_v7  ;;  %6747 = vmatprep.subr.msk.mxu1 %vm661_vm0, %v5407_v24  ;;  %v7702_v27 = vld [vmem:[#allocation2 + $0xd8] sm:$0xff]  ;;  %222 = vst.msk [vmem:[#allocation2 + $0x2c0] sm:$0xff] %vm61_vm1, %v206_v25  ;;  %v207_v28 = vld [vmem:[%s10180_s3 + $0x8] sm:$0xff]  ;;  %v7710_v29 = vld [vmem:[#allocation2 + $0xe0] sm:$0xff] }
  0x40   :  { %6446 = vmatmul.mubr.msk.f32.gmra.mxu1 %vm61_vm1, %v7538_v47  ;;  %223 = vst.msk [vmem:[#allocation2 + $0x2c8] sm:$0xff] %vm61_vm1, %v207_v28  ;;  %v208_v30 = vld [vmem:[%s10180_s3 + $0x10] sm:$0xff]  ;;  %v7722_v31 = vld [vmem:[#allocation2 + $0xe8] sm:$0xff]  ;;  %v209_v32 = vld [vmem:[%s10180_s3 + $0x18] sm:$0xff] }
  0x41   :  { %6448 = vmatprep.mubr.msk.f32.mxu1 %vm61_vm1, %v7548_v50  ;;  %6748 = vmatpush3.msk.msra.mxu1 %vm661_vm0, %v5407_v24  ;;  %224 = vst.msk [vmem:[#allocation2 + $0x2d0] sm:$0xff] %vm61_vm1, %v208_v30  ;;  %v7730_v33 = vld [vmem:[#allocation2 + $0xf0] sm:$0xff]  ;;  %225 = vst.msk [vmem:[#allocation2 + $0x2d8] sm:$0xff] %vm61_vm1, %v209_v32  ;;  %v210_v34 = vld [vmem:[%s10180_s3 + $0x20] sm:$0xff] }
  0x42   :  { %6285 = vmatmul.mubr.msk.f32.gmra.mxu0 %vm61_vm1, %v7657_v14  ;;  %v7742_v36 = vld [vmem:[#allocation2 + $0xf8] sm:$0xff]  ;;  %226 = vst.msk [vmem:[#allocation2 + $0x2e0] sm:$0xff] %vm61_vm1, %v210_v34  ;;  %v211_v38 = vld [vmem:[%s10180_s3 + $0x28] sm:$0xff]  ;;  %v7750_v39 = vld [vmem:[#allocation2 + $0x100] sm:$0xff] }
  0x43   :  { %6287 = vmatprep.mubr.msk.f32.mxu0 %vm61_vm1, %v7665_v17  ;;  %227 = vst.msk [vmem:[#allocation2 + $0x2e8] sm:$0xff] %vm61_vm1, %v211_v38  ;;  %v212_v40 = vld [vmem:[%s10180_s3 + $0x30] sm:$0xff]  ;;  %v7762_v41 = vld [vmem:[#allocation2 + $0x108] sm:$0xff]  ;;  %v213_v42 = vld [vmem:[%s10180_s3 + $0x38] sm:$0xff] }
  0x44   :  { %6449 = vmatmul.mubr.msk.f32.gmra.mxu1 %vm61_vm1, %v7573_v55  ;;  %228 = vst.msk [vmem:[#allocation2 + $0x2f0] sm:$0xff] %vm61_vm1, %v212_v40  ;;  %v7770_v44 = vld [vmem:[#allocation2 + $0x110] sm:$0xff]  ;;  %229 = vst.msk [vmem:[#allocation2 + $0x2f8] sm:$0xff] %vm61_vm1, %v213_v42  ;;  %v5295_v46 = vld [vmem:[%s10179_s4 + $0xa0] sm:$0x1] }
  0x45   :  { %6451 = vmatprep.mubr.msk.f32.mxu1 %vm61_vm1, %v7584_v58  ;;  %v7782_v48 = vld [vmem:[#allocation2 + $0x118] sm:$0xff]  ;;  %6577 = vmatprep.subr.msk.mxu0 %vm661_vm0, %v5295_v46  ;;  %v7787_v49 = vld [vmem:[#allocation2 + $0x120] sm:$0xff]  ;;  %v7796_v51 = vld [vmem:[#allocation2 + $0x128] sm:$0xff] }
  0x46   :  { %6288 = vmatmul.mubr.msk.f32.gmra.mxu0 %vm61_vm1, %v7674_v19  ;;  %v5294_v52 = vld [vmem:[%s10179_s4 + $0x98] sm:$0xff]  ;;  %v7803_v53 = vld [vmem:[#allocation2 + $0x130] sm:$0xff]  ;;  %v5292_v57 = vld [vmem:[%s10179_s4 + $0x88] sm:$0xff] }
  0x47   :  { %6290 = vmatprep.mubr.msk.f32.mxu0 %vm61_vm1, %v7684_v22  ;;  %6578 = vmatpush3.msk.msra.mxu0 %vm661_vm0, %v5295_v46  ;;  %v5293_v54 = vld [vmem:[%s10179_s4 + $0x90] sm:$0xff]  ;;  %v7814_v56 = vld [vmem:[#allocation2 + $0x138] sm:$0xff]  ;;  %v7821_v59 = vld [vmem:[#allocation2 + $0x140] sm:$0xff] }
  0x48   :  { %6452 = vmatmul.mubr.msk.f32.gmra.mxu1 %vm61_vm1, %v7623_v4  ;;  %6579 = vmatprep.subr.mxu0 %v5294_v52  ;;  %v5291_v60 = vld [vmem:[%s10179_s4 + $0x80] sm:$0xff]  ;;  %v7832_v61 = vld [vmem:[#allocation2 + $0x148] sm:$0xff]  ;;  %v5290_v62 = vld [vmem:[%s10179_s4 + $0x78] sm:$0xff] }
  0x49   :  { %6454 = vmatprep.mubr.msk.f32.mxu1 %vm61_vm1, %v7633_v7  ;;  %6580 = vmatpush3.msra.mxu0 %v5294_v52  ;;  %v5406_v63 = vld [vmem:[%s10179_s4 + $0xd0] sm:$0xff]  ;;  %v5405_v2 = vld [vmem:[%s10179_s4 + $0xc8] sm:$0xff]  ;;  %v7856_v6 = vld [vmem:[#allocation2 + $0x158] sm:$0xff] }
  0x4a   :  { %6291 = vmatmul.mubr.msk.f32.gmra.mxu0 %vm61_vm1, %v7702_v27  ;;  %6581 = vmatprep.subr.mxu0 %v5293_v54  ;;  %v7842_v0 = vld [vmem:[#allocation2 + $0x150] sm:$0xff]  ;;  %v7860_v8 = vld [vmem:[#allocation2 + $0x160] sm:$0xff]  ;;  %v7871_v10 = vld [vmem:[#allocation2 + $0x168] sm:$0xff] }
  0x4b   :  { %6293 = vmatprep.mubr.msk.f32.mxu0 %vm61_vm1, %v7710_v29  ;;  %6582 = vmatpush3.msra.mxu0 %v5293_v54  ;;  %v5289_v1 = vld [vmem:[%s10179_s4 + $0x70] sm:$0xff]  ;;  %v5404_v9 = vld [vmem:[%s10179_s4 + $0xc0] sm:$0xff]  ;;  %v5403_v12 = vld [vmem:[%s10179_s4 + $0xb8] sm:$0xff] }
  0x4c   :  { %6455 = vmatmul.mubr.msk.f32.gmra.mxu1 %vm61_vm1, %v7657_v14  ;;  %6583 = vmatprep.subr.mxu0 %v5292_v57  ;;  %v7878_v16 = vld [vmem:[#allocation2 + $0x170] sm:$0xff]  ;;  %v7889_v21 = vld [vmem:[#allocation2 + $0x178] sm:$0xff]  ;;  %v5401_v24 = vld [vmem:[%s10179_s4 + $0xa8] sm:$0xff] }
  0x4d   :  { %6457 = vmatprep.mubr.msk.f32.mxu1 %vm61_vm1, %v7665_v17  ;;  %6584 = vmatpush3.msra.mxu0 %v5292_v57  ;;  %v5402_v20 = vld [vmem:[%s10179_s4 + $0xb0] sm:$0xff]  ;;  %10322 = vst [vmem:[#allocation3_spill] sm:$0xff] %v7889_v21  ;;  %v7896_v25 = vld [vmem:[#allocation2 + $0x180] sm:$0xff]  ;;  %v7904_v28 = vld [vmem:[#allocation2 + $0x188] sm:$0xff] }
  0x4e   :  { %6294 = vmatmul.mubr.msk.f32.gmra.mxu0 %vm61_vm1, %v7722_v31  ;;  %6585 = vmatprep.subr.mxu0 %v5291_v60  ;;  %10323 = vst [vmem:[#allocation4_spill] sm:$0xff] %v7896_v25  ;;  %10324 = vst [vmem:[#allocation5_spill] sm:$0xff] %v7904_v28  ;;  %v7908_v30 = vld [vmem:[#allocation2 + $0x190] sm:$0xff]  ;;  %v7916_v32 = vld [vmem:[#allocation2 + $0x198] sm:$0xff] }
  0x4f   :  { %6296 = vmatprep.mubr.msk.f32.mxu0 %vm61_vm1, %v7730_v33  ;;  %6586 = vmatpush3.msra.mxu0 %v5291_v60  ;;  %10325 = vst [vmem:[#allocation6_spill] sm:$0xff] %v7908_v30  ;;  %10326 = vst [vmem:[#allocation7_spill] sm:$0xff] %v7916_v32  ;;  %v7920_v34 = vld [vmem:[#allocation2 + $0x1a0] sm:$0xff]  ;;  %v7928_v38 = vld [vmem:[#allocation2 + $0x1a8] sm:$0xff] }
  0x50   :  { %6458 = vmatmul.mubr.msk.f32.gmra.mxu1 %vm61_vm1, %v7674_v19  ;;  %6587 = vmatprep.subr.mxu0 %v5290_v62  ;;  %10327 = vst [vmem:[#allocation8_spill] sm:$0xff] %v7920_v34  ;;  %10328 = vst [vmem:[#allocation9_spill] sm:$0xff] %v7928_v38  ;;  %v7932_v40 = vld [vmem:[#allocation2 + $0x1b0] sm:$0xff]  ;;  %v7940_v42 = vld [vmem:[#allocation2 + $0x1b8] sm:$0xff] }
  0x51   :  { %6460 = vmatprep.mubr.msk.f32.mxu1 %vm61_vm1, %v7684_v22  ;;  %6749 = vmatprep.subr.mxu1 %v5406_v63  ;;  %10329 = vst [vmem:[#allocation10_spill] sm:$0xff] %v7932_v40  ;;  %10330 = vst [vmem:[#allocation11_spill] sm:$0xff] %v7940_v42  ;;  %v7944_v46 = vld [vmem:[#allocation2 + $0x1c0] sm:$0xff]  ;;  %v7952_v52 = vld [vmem:[#allocation2 + $0x1c8] sm:$0xff] }
  0x52   :  { %6297 = vmatmul.mubr.msk.f32.gmra.mxu0 %vm61_vm1, %v7742_v36  ;;  %6750 = vmatpush3.msra.mxu1 %v5406_v63  ;;  %10331 = vst [vmem:[#allocation12_spill] sm:$0xff] %v7944_v46  ;;  %10332 = vst [vmem:[#allocation13_spill] sm:$0xff] %v7952_v52  ;;  %v7956_v54 = vld [vmem:[#allocation2 + $0x1d0] sm:$0xff]  ;;  %v7964_v57 = vld [vmem:[#allocation2 + $0x1d8] sm:$0xff] }
  0x53   :  { %6299 = vmatprep.mubr.msk.f32.mxu0 %vm61_vm1, %v7750_v39  ;;  %6588 = vmatpush3.msra.mxu0 %v5290_v62  ;;  %10333 = vst [vmem:[#allocation14_spill] sm:$0xff] %v7956_v54  ;;  %10334 = vst [vmem:[#allocation15_spill] sm:$0xff] %v7964_v57  ;;  %v7968_v60 = vld [vmem:[#allocation2 + $0x1e0] sm:$0xff]  ;;  %v7976_v62 = vld [vmem:[#allocation2 + $0x1e8] sm:$0xff] }
  0x54   :  { %6461 = vmatmul.mubr.msk.f32.gmra.mxu1 %vm61_vm1, %v7702_v27  ;;  %6589 = vmatprep.subr.mxu0 %v5289_v1  ;;  %10335 = vst [vmem:[#allocation16_spill] sm:$0xff] %v7968_v60  ;;  %10336 = vst [vmem:[#allocation17_spill] sm:$0xff] %v7976_v62  ;;  %v7980_v63 = vld [vmem:[#allocation2 + $0x1f0] sm:$0xff] }
  0x55   :  { %6463 = vmatprep.mubr.msk.f32.mxu1 %vm61_vm1, %v7710_v29  ;;  %6751 = vmatprep.subr.mxu1 %v5405_v2  ;;  %10337 = vst [vmem:[#allocation18_spill] sm:$0xff] %v7980_v63 }
  0x56   :  { %6300 = vmatmul.mubr.msk.f32.gmra.mxu0 %vm61_vm1, %v7762_v41  ;;  %6752 = vmatpush3.msra.mxu1 %v5405_v2  ;;  %v302_v2 = vld [vmem:[#allocation2 + $0x200] sm:$0xff] }
  0x57   :  { %6302 = vmatprep.mubr.msk.f32.mxu0 %vm61_vm1, %v7770_v44  ;;  %6590 = vmatpush3.msra.mxu0 %v5289_v1  ;;  %v7988_v1 = vld [vmem:[#allocation2 + $0x1f8] sm:$0xff] }
  0x58   :  { %6464 = vmatmul.mubr.msk.f32.gmra.mxu1 %vm61_vm1, %v7722_v31  ;;  %6753 = vmatprep.subr.mxu1 %v5404_v9  ;;  %10338 = vst [vmem:[#allocation19_spill] sm:$0xff] %v7988_v1 }
  0x59   :  { %6466 = vmatprep.mubr.msk.f32.mxu1 %vm61_vm1, %v7730_v33  ;;  %6754 = vmatpush3.msra.mxu1 %v5404_v9  ;;  %v7997_v9 = vld [vmem:[#allocation2 + $0x208] sm:$0xff] }
  0x5a   :  { %6303 = vmatmul.mubr.msk.f32.gmra.mxu0 %vm61_vm1, %v7782_v48  ;;  %6755 = vmatprep.subr.mxu1 %v5403_v12  ;;  %10339 = vst [vmem:[#allocation20_spill] sm:$0xff] %v7997_v9 }
  0x5b   :  { %6305 = vmatprep.mubr.msk.f32.mxu0 %vm61_vm1, %v7787_v49  ;;  %6756 = vmatpush3.msra.mxu1 %v5403_v12  ;;  %v304_v12 = vld [vmem:[#allocation2 + $0x210] sm:$0xff] }
  0x5c   :  { %6467 = vmatmul.mubr.msk.f32.gmra.mxu1 %vm61_vm1, %v7742_v36  ;;  %6757 = vmatprep.subr.mxu1 %v5402_v20 }
  0x5d   :  { %6469 = vmatprep.mubr.msk.f32.mxu1 %vm61_vm1, %v7750_v39  ;;  %6758 = vmatpush3.msra.mxu1 %v5402_v20  ;;  %v305_v20 = vld [vmem:[#allocation2 + $0x218] sm:$0xff] }
  0x5e   :  { %6306 = vmatmul.mubr.msk.f32.gmra.mxu0 %vm61_vm1, %v7796_v51  ;;  %6759 = vmatprep.subr.mxu1 %v5401_v24 }
  0x5f   :  { %6308 = vmatprep.mubr.msk.f32.mxu0 %vm61_vm1, %v7803_v53  ;;  %6760 = vmatpush3.msra.mxu1 %v5401_v24  ;;  %v306_v24 = vld [vmem:[#allocation2 + $0x220] sm:$0xff] }
  0x60   :  { %6470 = vmatmul.mubr.msk.f32.gmra.mxu1 %vm61_vm1, %v7762_v41 }
  0x61   :  { %6472 = vmatprep.mubr.msk.f32.mxu1 %vm61_vm1, %v7770_v44 }
  0x62   :  { %6309 = vmatmul.mubr.msk.f32.gmra.mxu0 %vm61_vm1, %v7814_v56 }
  0x63   :  { %6311 = vmatprep.mubr.msk.f32.mxu0 %vm61_vm1, %v7821_v59 }
  0x64   :  { %6473 = vmatmul.mubr.msk.f32.gmra.mxu1 %vm61_vm1, %v7782_v48 }
  0x65   :  { %6475 = vmatprep.mubr.msk.f32.mxu1 %vm61_vm1, %v7787_v49 }
  0x66   :  { %6312 = vmatmul.mubr.msk.f32.gmra.mxu0 %vm61_vm1, %v7832_v61 }
  0x67   :  { %6314 = vmatprep.mubr.msk.f32.mxu0 %vm61_vm1, %v7842_v0 }
  0x68   :  { %6476 = vmatmul.mubr.msk.f32.gmra.mxu1 %vm61_vm1, %v7796_v51 }
  0x69   :  { %6478 = vmatprep.mubr.msk.f32.mxu1 %vm61_vm1, %v7803_v53 }
  0x6a   :  { %6315 = vmatmul.mubr.msk.f32.gmra.mxu0 %vm61_vm1, %v7856_v6 }
  0x6b   :  { %6317 = vmatprep.mubr.msk.f32.mxu0 %vm61_vm1, %v7860_v8 }
  0x6c   :  { %6479 = vmatmul.mubr.msk.f32.gmra.mxu1 %vm61_vm1, %v7814_v56 }
  0x6d   :  { %6481 = vmatprep.mubr.msk.f32.mxu1 %vm61_vm1, %v7821_v59 }
  0x6e   :  { %6318 = vmatmul.mubr.msk.f32.gmra.mxu0 %vm61_vm1, %v7871_v10 }
  0x6f   :  { %6320 = vmatprep.mubr.msk.f32.mxu0 %vm61_vm1, %v7878_v16 }
  0x70   :  { %6482 = vmatmul.mubr.msk.f32.gmra.mxu1 %vm61_vm1, %v7832_v61 }
  0x71   :  { %6484 = vmatprep.mubr.msk.f32.mxu1 %vm61_vm1, %v7842_v0 }
  0x72   :  { %6321 = vmatmul.mubr.msk.f32.gmra.mxu0 %vm61_vm1, %v7889_v21 }
  0x73   :  { %6323 = vmatprep.mubr.msk.f32.mxu0 %vm61_vm1, %v7896_v25 }
  0x74   :  { %6485 = vmatmul.mubr.msk.f32.gmra.mxu1 %vm61_vm1, %v7856_v6 }
  0x75   :  { %6487 = vmatprep.mubr.msk.f32.mxu1 %vm61_vm1, %v7860_v8 }
  0x76   :  { %6324 = vmatmul.mubr.msk.f32.gmra.mxu0 %vm61_vm1, %v7904_v28 }
  0x77   :  { %6326 = vmatprep.mubr.msk.f32.mxu0 %vm61_vm1, %v7908_v30 }
  0x78   :  { %6488 = vmatmul.mubr.msk.f32.gmra.mxu1 %vm61_vm1, %v7871_v10 }
  0x79   :  { %6490 = vmatprep.mubr.msk.f32.mxu1 %vm61_vm1, %v7878_v16 }
  0x7a   :  { %6327 = vmatmul.mubr.msk.f32.gmra.mxu0 %vm61_vm1, %v7916_v32 }
  0x7b   :  { %6329 = vmatprep.mubr.msk.f32.mxu0 %vm61_vm1, %v7920_v34 }
  0x7c   :  { %6491 = vmatmul.mubr.msk.f32.gmra.mxu1 %vm61_vm1, %v7889_v21  ;;  %v7017_v21 = vld [vmem:[#allocation2 + $0x338] sm:$0xff] }
  0x7d   :  { %6493 = vmatprep.mubr.msk.f32.mxu1 %vm61_vm1, %v7896_v25 }
  0x7e   :  { %6330 = vmatmul.mubr.msk.f32.gmra.mxu0 %vm61_vm1, %v7928_v38 }
  0x7f   :  { %6332 = vmatprep.mubr.msk.f32.mxu0 %vm61_vm1, %v7932_v40 }
  0x80   :  { %6494 = vmatmul.mubr.msk.f32.gmra.mxu1 %vm61_vm1, %v7904_v28 }
  0x81   :  { %6496 = vmatprep.mubr.msk.f32.mxu1 %vm61_vm1, %v7908_v30  ;;  %v7011_v30 = vld [vmem:[#allocation2 + $0x320] sm:$0xff] }
  0x82   :  { %6333 = vmatmul.mubr.msk.f32.gmra.mxu0 %vm61_vm1, %v7940_v42 }
  0x83   :  { %6335 = vmatprep.mubr.msk.f32.mxu0 %vm61_vm1, %v7944_v46 }
  0x84   :  { %6497 = vmatmul.mubr.msk.f32.gmra.mxu1 %vm61_vm1, %v7916_v32  ;;  %v7010_v32 = vld [vmem:[#allocation2] sm:$0xff] }
  0x85   :  { %6499 = vmatprep.mubr.msk.f32.mxu1 %vm61_vm1, %v7920_v34  ;;  %v7009_v34 = vld [vmem:[#allocation2 + $0x318] sm:$0xff] }
  0x86   :  { %6336 = vmatmul.mubr.msk.f32.gmra.mxu0 %vm61_vm1, %v7952_v52 }
  0x87   :  { %6338 = vmatprep.mubr.msk.f32.mxu0 %vm61_vm1, %v7956_v54 }
  0x88   :  { %6500 = vmatmul.mubr.msk.f32.gmra.mxu1 %vm61_vm1, %v7928_v38 }
  0x89   :  { %6502 = vmatprep.mubr.msk.f32.mxu1 %vm61_vm1, %v7932_v40 }
  0x8a   :  { %6339 = vmatmul.mubr.msk.f32.gmra.mxu0 %vm61_vm1, %v7964_v57 }
  0x8b   :  { %6341 = vmatprep.mubr.msk.f32.mxu0 %vm61_vm1, %v7968_v60 }
  0x8c   :  { %6503 = vmatmul.mubr.msk.f32.gmra.mxu1 %vm61_vm1, %v7940_v42  ;;  %v7007_v42 = vld [vmem:[#allocation2 + $0x308] sm:$0xff] }
  0x8d   :  { %6505 = vmatprep.mubr.msk.f32.mxu1 %vm61_vm1, %v7944_v46 }
  0x8e   :  { %6342 = vmatmul.mubr.msk.f32.gmra.mxu0 %vm61_vm1, %v7976_v62 }
  0x8f   :  { %6344 = vmatprep.mubr.msk.f32.mxu0 %vm61_vm1, %v7980_v63 }
  0x90   :  { %6506 = vmatmul.mubr.msk.f32.gmra.mxu1 %vm61_vm1, %v7952_v52 }
  0x91   :  { %6508 = vmatprep.mubr.msk.f32.mxu1 %vm61_vm1, %v7956_v54  ;;  %v311_v54 = vld [vmem:[#allocation2 + $0x248] sm:$0xff] }
  0x92   :  { %6345 = vmatmul.mubr.msk.f32.gmra.mxu0 %vm61_vm1, %v7988_v1 }
  0x93   :  { %6347 = vmatprep.mubr.msk.f32.mxu0 %vm61_vm1, %v302_v2 }
  0x94   :  { %6509 = vmatmul.mubr.msk.f32.gmra.mxu1 %vm61_vm1, %v7964_v57  ;;  %v307_v57 = vld [vmem:[#allocation2 + $0x228] sm:$0xff] }
  0x95   :  { %6511 = vmatprep.mubr.msk.f32.mxu1 %vm61_vm1, %v7968_v60  ;;  %v308_v60 = vld [vmem:[#allocation2 + $0x230] sm:$0xff] }
  0x96   :  { %6348 = vmatmul.mubr.msk.f32.gmra.mxu0 %vm61_vm1, %v7997_v9 }
  0x97   :  { %6350 = vmatprep.mubr.msk.f32.mxu0 %vm61_vm1, %v304_v12 }
  0x98   :  { %6512 = vmatmul.mubr.msk.f32.gmra.mxu1 %vm61_vm1, %v7976_v62  ;;  %v309_v62 = vld [vmem:[#allocation2 + $0x238] sm:$0xff] }
  0x99   :  { %6514 = vmatprep.mubr.msk.f32.mxu1 %vm61_vm1, %v7980_v63  ;;  %v310_v63 = vld [vmem:[#allocation2 + $0x240] sm:$0xff] }
  0x9a   :  { %6351 = vmatmul.mubr.msk.f32.gmra.mxu0 %vm61_vm1, %v305_v20 }
  0x9b   :  { %6353 = vmatprep.mubr.msk.f32.mxu0 %vm61_vm1, %v306_v24 }
  0x9c   :  { %6515 = vmatmul.mubr.msk.f32.gmra.mxu1 %vm61_vm1, %v7988_v1  ;;  %v312_v1 = vld [vmem:[#allocation2 + $0x250] sm:$0xff] }
  0x9d   :  { %6517 = vmatprep.mubr.msk.f32.mxu1 %vm61_vm1, %v302_v2  ;;  %v313_v2 = vld [vmem:[#allocation2 + $0x258] sm:$0xff] }
  0x9e   :  { %6354 = vmatmul.mubr.msk.f32.gmra.mxu0 %vm61_vm1, %v307_v57 }
  0x9f   :  { %6356 = vmatprep.mubr.msk.f32.mxu0 %vm61_vm1, %v308_v60 }
  0xa0   :  { %6518 = vmatmul.mubr.msk.f32.gmra.mxu1 %vm61_vm1, %v7997_v9  ;;  %v314_v9 = vld [vmem:[#allocation2 + $0x260] sm:$0xff] }
  0xa1   :  { %6520 = vmatprep.mubr.msk.f32.mxu1 %vm61_vm1, %v304_v12  ;;  %v315_v12 = vld [vmem:[#allocation2 + $0x268] sm:$0xff] }
  0xa2   :  { %6357 = vmatmul.mubr.msk.f32.gmra.mxu0 %vm61_vm1, %v309_v62 }
  0xa3   :  { %6359 = vmatprep.mubr.msk.f32.mxu0 %vm61_vm1, %v310_v63 }
  0xa4   :  { %6521 = vmatmul.mubr.msk.f32.gmra.mxu1 %vm61_vm1, %v305_v20  ;;  %v316_v20 = vld [vmem:[#allocation2 + $0x270] sm:$0xff] }
  0xa5   :  { %6523 = vmatprep.mubr.msk.f32.mxu1 %vm61_vm1, %v306_v24  ;;  %v317_v24 = vld [vmem:[#allocation2 + $0x278] sm:$0xff] }
  0xa6   :  { %6360 = vmatmul.mubr.msk.f32.gmra.mxu0 %vm61_vm1, %v311_v54 }
  0xa7   :  { %6362 = vmatprep.mubr.msk.f32.mxu0 %vm61_vm1, %v312_v1 }
  0xa8   :  { %6524 = vmatmul.mubr.msk.f32.gmra.mxu1 %vm61_vm1, %v307_v57  ;;  %v318_v57 = vld [vmem:[#allocation2 + $0x280] sm:$0xff] }
  0xa9   :  { %6526 = vmatprep.mubr.msk.f32.mxu1 %vm61_vm1, %v308_v60  ;;  %v319_v60 = vld [vmem:[#allocation2 + $0x288] sm:$0xff] }
  0xaa   :  { %6363 = vmatmul.mubr.msk.f32.gmra.mxu0 %vm61_vm1, %v313_v2 }
  0xab   :  { %6365 = vmatprep.mubr.msk.f32.mxu0 %vm61_vm1, %v314_v9 }
  0xac   :  { %6527 = vmatmul.mubr.msk.f32.gmra.mxu1 %vm61_vm1, %v309_v62  ;;  %v320_v62 = vld [vmem:[#allocation2 + $0x290] sm:$0xff] }
  0xad   :  { %6529 = vmatprep.mubr.msk.f32.mxu1 %vm61_vm1, %v310_v63  ;;  %v321_v63 = vld [vmem:[#allocation2 + $0x298] sm:$0xff] }
  0xae   :  { %6366 = vmatmul.mubr.msk.f32.gmra.mxu0 %vm61_vm1, %v315_v12 }
  0xaf   :  { %6368 = vmatprep.mubr.msk.f32.mxu0 %vm61_vm1, %v316_v20 }
  0xb0   :  { %6530 = vmatmul.mubr.msk.f32.gmra.mxu1 %vm61_vm1, %v311_v54  ;;  %v322_v54 = vld [vmem:[#allocation2 + $0x2a0] sm:$0xff] }
  0xb1   :  { %6532 = vmatprep.mubr.msk.f32.mxu1 %vm61_vm1, %v312_v1  ;;  %v323_v1 = vld [vmem:[#allocation2 + $0x2a8] sm:$0xff] }
  0xb2   :  { %6369 = vmatmul.mubr.msk.f32.gmra.mxu0 %vm61_vm1, %v317_v24 }
  0xb3   :  { %6371 = vmatprep.mubr.msk.f32.mxu0 %vm61_vm1, %v318_v57 }
  0xb4   :  { %6533 = vmatmul.mubr.msk.f32.gmra.mxu1 %vm61_vm1, %v313_v2  ;;  %v324_v2 = vld [vmem:[#allocation2 + $0x2b0] sm:$0xff] }
  0xb5   :  { %6535 = vmatprep.mubr.msk.f32.mxu1 %vm61_vm1, %v314_v9  ;;  %v325_v9 = vld [vmem:[#allocation2 + $0x2b8] sm:$0xff] }
  0xb6   :  { %6372 = vmatmul.mubr.msk.f32.gmra.mxu0 %vm61_vm1, %v319_v60 }
  0xb7   :  { %6374 = vmatprep.mubr.msk.f32.mxu0 %vm61_vm1, %v320_v62 }
  0xb8   :  { %6536 = vmatmul.mubr.msk.f32.gmra.mxu1 %vm61_vm1, %v315_v12  ;;  %v326_v12 = vld [vmem:[#allocation2 + $0x2c0] sm:$0xff] }
  0xb9   :  { %6538 = vmatprep.mubr.msk.f32.mxu1 %vm61_vm1, %v316_v20  ;;  %v327_v20 = vld [vmem:[#allocation2 + $0x2c8] sm:$0xff] }
  0xba   :  { %6375 = vmatmul.mubr.msk.f32.gmra.mxu0 %vm61_vm1, %v321_v63 }
  0xbb   :  { %6377 = vmatprep.mubr.msk.f32.mxu0 %vm61_vm1, %v322_v54 }
  0xbc   :  { %6539 = vmatmul.mubr.msk.f32.gmra.mxu1 %vm61_vm1, %v317_v24  ;;  %v328_v24 = vld [vmem:[#allocation2 + $0x2d0] sm:$0xff] }
  0xbd   :  { %6541 = vmatprep.mubr.msk.f32.mxu1 %vm61_vm1, %v318_v57  ;;  %v329_v57 = vld [vmem:[#allocation2 + $0x2d8] sm:$0xff] }
  0xbe   :  { %6378 = vmatmul.mubr.msk.f32.gmra.mxu0 %vm61_vm1, %v323_v1 }
  0xbf   :  { %6380 = vmatprep.mubr.msk.f32.mxu0 %vm61_vm1, %v324_v2 }
  0xc0   :  { %6542 = vmatmul.mubr.msk.f32.gmra.mxu1 %vm61_vm1, %v319_v60  ;;  %v330_v60 = vld [vmem:[#allocation2 + $0x2e0] sm:$0xff] }
  0xc1   :  { %6544 = vmatprep.mubr.msk.f32.mxu1 %vm61_vm1, %v320_v62  ;;  %v331_v62 = vld [vmem:[#allocation2 + $0x2e8] sm:$0xff] }
  0xc2   :  { %6381 = vmatmul.mubr.msk.f32.gmra.mxu0 %vm61_vm1, %v325_v9 }
  0xc3   :  { %6383 = vmatprep.mubr.msk.f32.mxu0 %vm61_vm1, %v326_v12 }
  0xc4   :  { %6545 = vmatmul.mubr.msk.f32.gmra.mxu1 %vm61_vm1, %v321_v63  ;;  %v332_v63 = vld [vmem:[#allocation2 + $0x2f0] sm:$0xff] }
  0xc5   :  { %6547 = vmatprep.mubr.msk.f32.mxu1 %vm61_vm1, %v322_v54  ;;  %v333_v54 = vld [vmem:[#allocation2 + $0x2f8] sm:$0xff] }
  0xc6   :  { %6384 = vmatmul.mubr.msk.f32.gmra.mxu0 %vm61_vm1, %v327_v20 }
  0xc7   :  { %6386 = vmatprep.mubr.msk.f32.mxu0 %vm61_vm1, %v328_v24 }
  0xc8   :  { %6548 = vmatmul.mubr.msk.f32.gmra.mxu1 %vm61_vm1, %v323_v1 }
  0xc9   :  { %6550 = vmatprep.mubr.msk.f32.mxu1 %vm61_vm1, %v324_v2 }
  0xca   :  { %6387 = vmatmul.mubr.msk.f32.gmra.mxu0 %vm61_vm1, %v329_v57 }
  0xcb   :  { %6389 = vmatprep.mubr.msk.f32.mxu0 %vm61_vm1, %v330_v60 }
  0xcc   :  { %6551 = vmatmul.mubr.msk.f32.gmra.mxu1 %vm61_vm1, %v325_v9 }
  0xcd   :  { %6553 = vmatprep.mubr.msk.f32.mxu1 %vm61_vm1, %v326_v12 }
  0xce   :  { %6390 = vmatmul.mubr.msk.f32.gmra.mxu0 %vm61_vm1, %v331_v62 }
  0xcf   :  { %6392 = vmatprep.mubr.msk.f32.mxu0 %vm61_vm1, %v332_v63 }
  0xd0   :  { %v8066_v52 = vpop.f32.mrf.mxu1  ;;  %6554 = vmatmul.mubr.msk.f32.gmra.mxu1 %vm61_vm1, %v327_v20 }
  0xd1   :  { %10340 = vst [vmem:[#allocation21_spill] sm:$0xff] %v8066_v52  ;;  %6556 = vmatprep.mubr.msk.f32.mxu1 %vm61_vm1, %v328_v24 }
  0xd2   :  { %v8070_v1 = vpop.f32.mrf.mxu1  ;;  %6393 = vmatmul.mubr.msk.f32.gmra.mxu0 %vm61_vm1, %v333_v54 }
  0xd3   :  { %10341 = vst [vmem:[#allocation22_spill] sm:$0xff] %v8070_v1 }
  0xd4   :  { %v8073_v2 = vpop.f32.mrf.mxu1  ;;  %6557 = vmatmul.mubr.msk.f32.gmra.mxu1 %vm61_vm1, %v329_v57 }
  0xd5   :  { %10342 = vst [vmem:[#allocation23_spill] sm:$0xff] %v8073_v2  ;;  %6559 = vmatprep.mubr.msk.f32.mxu1 %vm61_vm1, %v330_v60  ;;  %v7006_v2 = vld [vmem:[#allocation2 + $0x300] sm:$0xff] }
  0xd6   :  { %v8077_v9 = vpop.f32.mrf.mxu1  ;;  %v6253_v12 = vpop.f32.mrf.mxu0 }
  0xd7   :  { %10343 = vst [vmem:[#allocation24_spill] sm:$0xff] %v8077_v9 }
  0xd8   :  { %v8079_v46 = vpop.f32.mrf.mxu1  ;;  %6560 = vmatmul.mubr.msk.f32.gmra.mxu1 %vm61_vm1, %v331_v62  ;;  %v731_v20 = vpop.f32.mrf.mxu0 }
  0xd9   :  { %10344 = vst [vmem:[#allocation25_spill] sm:$0xff] %v8079_v46  ;;  %6562 = vmatprep.mubr.msk.f32.mxu1 %vm61_vm1, %v332_v63  ;;  %v7008_v63 = vld [vmem:[#allocation2 + $0x310] sm:$0xff] }
  0xda   :  { %v8083_v24 = vpop.f32.mrf.mxu1  ;;  %v6256_v1 = vpop.f32.mrf.mxu0 }
  0xdb   :  { %10345 = vst [vmem:[#allocation26_spill] sm:$0xff] %v8083_v24 }
  0xdc   :  { %v8085_v52 = vpop.f32.mrf.mxu1  ;;  %6563 = vmatmul.mubr.msk.f32.gmra.mxu1 %vm61_vm1, %v333_v54  ;;  %v741_v57 = vpop.f32.mrf.mxu0 }
  0xdd   :  { %10346 = vst [vmem:[#allocation27_spill] sm:$0xff] %v8085_v52  ;;  %6565 = vmatprep.mubr.msk.f32.mxu1 %vm61_vm1, %v7006_v2 }
  0xde   :  { %v8089_v60 = vpop.f32.mrf.mxu1  ;;  %v6259_v9 = vpop.f32.mrf.mxu0 }
  0xdf   :  { %10347 = vst [vmem:[#allocation28_spill] sm:$0xff] %v8089_v60 }
  0xe0   :  { %v6423_v46 = vpop.f32.mrf.mxu1  ;;  %6566 = vmatmul.mubr.msk.f32.gmra.mxu1 %vm61_vm1, %v7007_v42  ;;  %v751_v62 = vpop.f32.mrf.mxu0  ;;  %v7012_v42 = vld [vmem:[#allocation2 + $0x8] sm:$0xff] }
  0xe1   :  { %6568 = vmatprep.mubr.msk.f32.mxu1 %vm61_vm1, %v7008_v63  ;;  %v1847_v24 = vmax.f32 %v6253_v12, %v6423_v46 }
  0xe2   :  { %v1327_v40 = vpop.f32.mrf.mxu1  ;;  %v6262_v52 = vpop.f32.mrf.mxu0 }
  0xe3   :  { %v1846_v38 = vmax.f32 %v731_v20, %v1327_v40  ;;  %v8097_v28 = vmax.f32 %v1847_v24, %v7012_v42  ;;  %v7013_v20 = vld [vmem:[#allocation2 + $0x328] sm:$0xff] }
  0xe4   :  { %v6426_v54 = vpop.f32.mrf.mxu1  ;;  %6569 = vmatmul.mubr.msk.f32.gmra.mxu1 %vm61_vm1, %v7009_v34  ;;  %v761_v2 = vpop.f32.mrf.mxu0  ;;  %v7014_v34 = vld [vmem:[#allocation2 + $0x10] sm:$0xff] }
  0xe5   :  { %v8094_v60 = vmax.f32 %v1846_v38, %v7010_v32  ;;  %6571 = vmatprep.mubr.msk.f32.mxu1 %vm61_vm1, %v7011_v30  ;;  %10349 = vst [vmem:[#allocation30_spill] sm:$0xff] %v8097_v28  ;;  %v1849_v25 = vmax.f32 %v6256_v1, %v6426_v54  ;;  %v7015_v38 = vld [vmem:[#allocation2 + $0x330] sm:$0xff]  ;;  %v7016_v1 = vld [vmem:[#allocation2 + $0x18] sm:$0xff] }
  0xe6   :  { %v1337_v63 = vpop.f32.mrf.mxu1  ;;  %v6265_v46 = vpop.f32.mrf.mxu0 }
  0xe7   :  { %10348 = vst [vmem:[#allocation29_spill] sm:$0xff] %v8094_v60  ;;  %v1848_v12 = vmax.f32 %v741_v57, %v1337_v63  ;;  %6591 = vmatprep.mubr.msk.f32.mxu0 %vm61_vm1, %v8094_v60  ;;  %v8107_v24 = vmax.f32 %v1849_v25, %v7016_v1 }
  0xe8   :  { %v6429_v40 = vpop.f32.mrf.mxu1  ;;  %6572 = vmatmul.mubr.msk.f32.gmra.mxu1 %vm61_vm1, %v7013_v20  ;;  %6592 = vmatmul.mubr.msk.f32.vlgmr.msra.gmra.mxu0 %vm61_vm1, %v8097_v28  ;;  %v771_v32 = vpop.f32.mrf.mxu0 }
  0xe9   :  { %v8104_v30 = vmax.f32 %v1848_v12, %v7014_v34  ;;  %6574 = vmatprep.mubr.msk.f32.mxu1 %vm61_vm1, %v7015_v38  ;;  %10351 = vst [vmem:[#allocation32_spill] sm:$0xff] %v8107_v24  ;;  %v1851_v57 = vmax.f32 %v6259_v9, %v6429_v40  ;;  %v7018_v34 = vld [vmem:[#allocation2 + $0x20] sm:$0xff] }
  0xea   :  { %v1347_v54 = vpop.f32.mrf.mxu1  ;;  %v6268_v42 = vpop.f32.mrf.mxu0 }
  0xeb   :  { %10350 = vst [vmem:[#allocation31_spill] sm:$0xff] %v8104_v30  ;;  %v1850_v63 = vmax.f32 %v751_v62, %v1347_v54  ;;  %6594 = vmatprep.mubr.msk.f32.mxu0 %vm61_vm1, %v8104_v30  ;;  %v8119_v25 = vmax.f32 %v1851_v57, %v7336_v3 }
  0xec   :  { %v6432_v20 = vpop.f32.mrf.mxu1  ;;  %6575 = vmatmul.mubr.msk.f32.gmra.mxu1 %vm61_vm1, %v7017_v21  ;;  %6595 = vmatmul.mubr.msk.f32.gmra.mxu0 %vm61_vm1, %v8107_v24  ;;  %v781_v12 = vpop.f32.mrf.mxu0 }
  0xed   :  { %v8114_v38 = vmax.f32 %v1850_v63, %v7018_v34  ;;  %6761 = vmatprep.mubr.msk.f32.mxu1 %vm61_vm1, %v8094_v60  ;;  %10353 = vst [vmem:[#allocation34_spill] sm:$0xff] %v8119_v25  ;;  %v1853_v9 = vmax.f32 %v6262_v52, %v6432_v20  ;;  %v8863_v60 = vld [vmem:[%s10184_s5] sm:$0xff] }
  0xee   :  { %v1357_v62 = vpop.f32.mrf.mxu1  ;;  %v6271_v40 = vpop.f32.mrf.mxu0  ;;  %10480 = vst [vmem:[#allocation109_spill] sm:$0xff] %v8863_v60 }
  0xef   :  { %10352 = vst [vmem:[#allocation33_spill] sm:$0xff] %v8114_v38  ;;  %v1852_v1 = vmax.f32 %v761_v2, %v1357_v62  ;;  %6597 = vmatprep.mubr.msk.f32.mxu0 %vm61_vm1, %v8114_v38  ;;  %v8133_v3 = vmax.f32 %v1853_v9, %v7372_v11 }
  0xf0   :  { %v6435_v21 = vpop.f32.mrf.mxu1  ;;  %6598 = vmatmul.mubr.msk.f32.gmra.mxu0 %vm61_vm1, %v8119_v25  ;;  %6762 = vmatmul.mubr.msk.f32.vlgmr.msra.gmra.mxu1 %vm61_vm1, %v8097_v28  ;;  %v791_v54 = vpop.f32.mrf.mxu0  ;;  %v8871_v28 = vld [vmem:[%s10184_s5 + $0x8] sm:$0xff] }
  0xf1   :  { %v8128_v63 = vmax.f32 %v1852_v1, %v7345_v5  ;;  %6764 = vmatprep.mubr.msk.f32.mxu1 %vm61_vm1, %v8104_v30  ;;  %10355 = vst [vmem:[#allocation36_spill] sm:$0xff] %v8133_v3  ;;  %v1855_v52 = vmax.f32 %v6265_v46, %v6435_v21  ;;  %10482 = vst [vmem:[#allocation111_spill] sm:$0xff] %v8871_v28 }
  0xf2   :  { %v1367_v2 = vpop.f32.mrf.mxu1  ;;  %v6274_v57 = vpop.f32.mrf.mxu0 }
  0xf3   :  { %10354 = vst [vmem:[#allocation35_spill] sm:$0xff] %v8128_v63  ;;  %v1854_v20 = vmax.f32 %v771_v32, %v1367_v2  ;;  %6600 = vmatprep.mubr.msk.f32.mxu0 %vm61_vm1, %v8128_v63  ;;  %v8147_v11 = vmax.f32 %v1855_v52, %v7394_v15 }
  0xf4   :  { %v6438_v34 = vpop.f32.mrf.mxu1  ;;  %6601 = vmatmul.mubr.msk.f32.gmra.mxu0 %vm61_vm1, %v8133_v3  ;;  %6765 = vmatmul.mubr.msk.f32.gmra.mxu1 %vm61_vm1, %v8107_v24  ;;  %v801_v5 = vpop.f32.mrf.mxu0 }
  0xf5   :  { %v8142_v62 = vmax.f32 %v1854_v20, %v7381_v13  ;;  %6767 = vmatprep.mubr.msk.f32.mxu1 %vm61_vm1, %v8114_v38  ;;  %v1857_v46 = vmax.f32 %v6268_v42, %v6438_v34 }
  0xf6   :  { %v1377_v32 = vpop.f32.mrf.mxu1  ;;  %v6277_v9 = vpop.f32.mrf.mxu0 }
  0xf7   :  { %10356 = vst [vmem:[#allocation37_spill] sm:$0xff] %v8142_v62  ;;  %v1856_v1 = vmax.f32 %v781_v12, %v1377_v32  ;;  %6603 = vmatprep.mubr.msk.f32.mxu0 %vm61_vm1, %v8142_v62  ;;  %v8161_v15 = vmax.f32 %v1857_v46, %v7429_v23 }
  0xf8   :  { %v6441_v21 = vpop.f32.mrf.mxu1  ;;  %6604 = vmatmul.mubr.msk.f32.gmra.mxu0 %vm61_vm1, %v8147_v11  ;;  %6768 = vmatmul.mubr.msk.f32.gmra.mxu1 %vm61_vm1, %v8119_v25  ;;  %v811_v13 = vpop.f32.mrf.mxu0 }
  0xf9   :  { %v8156_v2 = vmax.f32 %v1856_v1, %v7404_v18  ;;  %6770 = vmatprep.mubr.msk.f32.mxu1 %vm61_vm1, %v8128_v63  ;;  %v1859_v42 = vmax.f32 %v6271_v40, %v6441_v21 }
  0xfa   :  { %v1387_v12 = vpop.f32.mrf.mxu1  ;;  %v6280_v52 = vpop.f32.mrf.mxu0 }
  0xfb   :  { %v1858_v20 = vmax.f32 %v791_v54, %v1387_v12  ;;  %6606 = vmatprep.mubr.msk.f32.mxu0 %vm61_vm1, %v8156_v2  ;;  %v8175_v23 = vmax.f32 %v1859_v42, %v7479_v35 }
  0xfc   :  { %v6444_v34 = vpop.f32.mrf.mxu1  ;;  %6607 = vmatmul.mubr.msk.f32.gmra.mxu0 %vm61_vm1, %v8161_v15  ;;  %6771 = vmatmul.mubr.msk.f32.gmra.mxu1 %vm61_vm1, %v8133_v3  ;;  %v821_v18 = vpop.f32.mrf.mxu0 }
  0xfd   :  { %v8170_v32 = vmax.f32 %v1858_v20, %v7440_v26  ;;  %6773 = vmatprep.mubr.msk.f32.mxu1 %vm61_vm1, %v8142_v62  ;;  %v1861_v40 = vmax.f32 %v6274_v57, %v6444_v34 }
  0xfe   :  { %v1397_v54 = vpop.f32.mrf.mxu1  ;;  %v6283_v46 = vpop.f32.mrf.mxu0 }
  0xff   :  { %v1860_v1 = vmax.f32 %v801_v5, %v1397_v54  ;;  %6609 = vmatprep.mubr.msk.f32.mxu0 %vm61_vm1, %v8170_v32  ;;  %v8189_v35 = vmax.f32 %v1861_v40, %v7516_v43 }
 0x100   :  { %v6447_v21 = vpop.f32.mrf.mxu1  ;;  %6610 = vmatmul.mubr.msk.f32.gmra.mxu0 %vm61_vm1, %v8175_v23  ;;  %6774 = vmatmul.mubr.msk.f32.gmra.mxu1 %vm61_vm1, %v8147_v11  ;;  %v831_v26 = vpop.f32.mrf.mxu0 }
 0x101   :  { %v8184_v12 = vmax.f32 %v1860_v1, %v7489_v37  ;;  %6776 = vmatprep.mubr.msk.f32.mxu1 %vm61_vm1, %v8156_v2  ;;  %v1863_v57 = vmax.f32 %v6277_v9, %v6447_v21 }
 0x102   :  { %v1407_v5 = vpop.f32.mrf.mxu1  ;;  %v6286_v42 = vpop.f32.mrf.mxu0 }
 0x103   :  { %v1862_v20 = vmax.f32 %v811_v13, %v1407_v5  ;;  %6612 = vmatprep.mubr.msk.f32.mxu0 %vm61_vm1, %v8184_v12  ;;  %v8203_v43 = vmax.f32 %v1863_v57, %v7538_v47 }
 0x104   :  { %v6450_v34 = vpop.f32.mrf.mxu1  ;;  %6613 = vmatmul.mubr.msk.f32.gmra.mxu0 %vm61_vm1, %v8189_v35  ;;  %6777 = vmatmul.mubr.msk.f32.gmra.mxu1 %vm61_vm1, %v8161_v15  ;;  %v841_v37 = vpop.f32.mrf.mxu0 }
 0x105   :  { %v8198_v54 = vmax.f32 %v1862_v20, %v7525_v45  ;;  %6779 = vmatprep.mubr.msk.f32.mxu1 %vm61_vm1, %v8170_v32  ;;  %10358 = vst [vmem:[#allocation39_spill] sm:$0xff] %v8203_v43  ;;  %v1865_v9 = vmax.f32 %v6280_v52, %v6450_v34 }
 0x106   :  { %v1417_v13 = vpop.f32.mrf.mxu1  ;;  %v6289_v40 = vpop.f32.mrf.mxu0 }
 0x107   :  { %10357 = vst [vmem:[#allocation38_spill] sm:$0xff] %v8198_v54  ;;  %v1864_v1 = vmax.f32 %v821_v18, %v1417_v13  ;;  %6615 = vmatprep.mubr.msk.f32.mxu0 %vm61_vm1, %v8198_v54  ;;  %v8217_v47 = vmax.f32 %v1865_v9, %v7573_v55 }
 0x108   :  { %v6453_v21 = vpop.f32.mrf.mxu1  ;;  %6616 = vmatmul.mubr.msk.f32.gmra.mxu0 %vm61_vm1, %v8203_v43  ;;  %6780 = vmatmul.mubr.msk.f32.gmra.mxu1 %vm61_vm1, %v8175_v23  ;;  %v851_v45 = vpop.f32.mrf.mxu0 }
 0x109   :  { %v8212_v5 = vmax.f32 %v1864_v1, %v7548_v50  ;;  %6782 = vmatprep.mubr.msk.f32.mxu1 %vm61_vm1, %v8184_v12  ;;  %10360 = vst [vmem:[#allocation41_spill] sm:$0xff] %v8217_v47  ;;  %v1867_v52 = vmax.f32 %v6283_v46, %v6453_v21 }
 0x10a   :  { %v1427_v18 = vpop.f32.mrf.mxu1  ;;  %v6292_v57 = vpop.f32.mrf.mxu0 }
 0x10b   :  { %10359 = vst [vmem:[#allocation40_spill] sm:$0xff] %v8212_v5  ;;  %v1866_v20 = vmax.f32 %v831_v26, %v1427_v18  ;;  %6618 = vmatprep.mubr.msk.f32.mxu0 %vm61_vm1, %v8212_v5  ;;  %v8231_v55 = vmax.f32 %v1867_v52, %v7623_v4 }
 0x10c   :  { %v6456_v34 = vpop.f32.mrf.mxu1  ;;  %6619 = vmatmul.mubr.msk.f32.gmra.mxu0 %vm61_vm1, %v8217_v47  ;;  %6783 = vmatmul.mubr.msk.f32.gmra.mxu1 %vm61_vm1, %v8189_v35  ;;  %v861_v50 = vpop.f32.mrf.mxu0 }
 0x10d   :  { %v8226_v13 = vmax.f32 %v1866_v20, %v7584_v58  ;;  %6785 = vmatprep.mubr.msk.f32.mxu1 %vm61_vm1, %v8198_v54  ;;  %10362 = vst [vmem:[#allocation43_spill] sm:$0xff] %v8231_v55  ;;  %v1869_v46 = vmax.f32 %v6286_v42, %v6456_v34 }
 0x10e   :  { %v1437_v26 = vpop.f32.mrf.mxu1  ;;  %v6295_v9 = vpop.f32.mrf.mxu0 }
 0x10f   :  { %10361 = vst [vmem:[#allocation42_spill] sm:$0xff] %v8226_v13  ;;  %v1868_v1 = vmax.f32 %v841_v37, %v1437_v26  ;;  %6621 = vmatprep.mubr.msk.f32.mxu0 %vm61_vm1, %v8226_v13  ;;  %v8245_v4 = vmax.f32 %v1869_v46, %v7657_v14 }
 0x110   :  { %v6459_v21 = vpop.f32.mrf.mxu1  ;;  %6622 = vmatmul.mubr.msk.f32.gmra.mxu0 %vm61_vm1, %v8231_v55  ;;  %6786 = vmatmul.mubr.msk.f32.gmra.mxu1 %vm61_vm1, %v8203_v43  ;;  %v871_v58 = vpop.f32.mrf.mxu0 }
 0x111   :  { %v8240_v18 = vmax.f32 %v1868_v1, %v7633_v7  ;;  %6788 = vmatprep.mubr.msk.f32.mxu1 %vm61_vm1, %v8212_v5  ;;  %10364 = vst [vmem:[#allocation45_spill] sm:$0xff] %v8245_v4  ;;  %v1871_v42 = vmax.f32 %v6289_v40, %v6459_v21 }
 0x112   :  { %v1447_v37 = vpop.f32.mrf.mxu1  ;;  %v6298_v52 = vpop.f32.mrf.mxu0 }
 0x113   :  { %10363 = vst [vmem:[#allocation44_spill] sm:$0xff] %v8240_v18  ;;  %v1870_v20 = vmax.f32 %v851_v45, %v1447_v37  ;;  %6624 = vmatprep.mubr.msk.f32.mxu0 %vm61_vm1, %v8240_v18  ;;  %v8259_v14 = vmax.f32 %v1871_v42, %v7674_v19 }
 0x114   :  { %v6462_v34 = vpop.f32.mrf.mxu1  ;;  %6625 = vmatmul.mubr.msk.f32.gmra.mxu0 %vm61_vm1, %v8245_v4  ;;  %6789 = vmatmul.mubr.msk.f32.gmra.mxu1 %vm61_vm1, %v8217_v47  ;;  %v881_v7 = vpop.f32.mrf.mxu0 }
 0x115   :  { %v8254_v26 = vmax.f32 %v1870_v20, %v7665_v17  ;;  %6791 = vmatprep.mubr.msk.f32.mxu1 %vm61_vm1, %v8226_v13  ;;  %v1873_v40 = vmax.f32 %v6292_v57, %v6462_v34 }
 0x116   :  { %v1457_v45 = vpop.f32.mrf.mxu1  ;;  %v6301_v46 = vpop.f32.mrf.mxu0 }
 0x117   :  { %v1872_v1 = vmax.f32 %v861_v50, %v1457_v45  ;;  %6627 = vmatprep.mubr.msk.f32.mxu0 %vm61_vm1, %v8254_v26  ;;  %v8273_v19 = vmax.f32 %v1873_v40, %v7702_v27 }
 0x118   :  { %v6465_v21 = vpop.f32.mrf.mxu1  ;;  %6628 = vmatmul.mubr.msk.f32.gmra.mxu0 %vm61_vm1, %v8259_v14  ;;  %6792 = vmatmul.mubr.msk.f32.gmra.mxu1 %vm61_vm1, %v8231_v55  ;;  %v891_v17 = vpop.f32.mrf.mxu0 }
 0x119   :  { %v8268_v37 = vmax.f32 %v1872_v1, %v7684_v22  ;;  %6794 = vmatprep.mubr.msk.f32.mxu1 %vm61_vm1, %v8240_v18  ;;  %v1875_v57 = vmax.f32 %v6295_v9, %v6465_v21 }
 0x11a   :  { %v1467_v50 = vpop.f32.mrf.mxu1  ;;  %v6304_v42 = vpop.f32.mrf.mxu0 }
 0x11b   :  { %v1874_v20 = vmax.f32 %v871_v58, %v1467_v50  ;;  %6630 = vmatprep.mubr.msk.f32.mxu0 %vm61_vm1, %v8268_v37  ;;  %v8287_v27 = vmax.f32 %v1875_v57, %v7722_v31 }
 0x11c   :  { %v6468_v34 = vpop.f32.mrf.mxu1  ;;  %6631 = vmatmul.mubr.msk.f32.gmra.mxu0 %vm61_vm1, %v8273_v19  ;;  %6795 = vmatmul.mubr.msk.f32.gmra.mxu1 %vm61_vm1, %v8245_v4  ;;  %v901_v22 = vpop.f32.mrf.mxu0 }
 0x11d   :  { %v8282_v45 = vmax.f32 %v1874_v20, %v7710_v29  ;;  %6797 = vmatprep.mubr.msk.f32.mxu1 %vm61_vm1, %v8254_v26  ;;  %v1877_v9 = vmax.f32 %v6298_v52, %v6468_v34 }
 0x11e   :  { %v1477_v58 = vpop.f32.mrf.mxu1  ;;  %v6307_v40 = vpop.f32.mrf.mxu0 }
 0x11f   :  { %v1876_v1 = vmax.f32 %v881_v7, %v1477_v58  ;;  %6633 = vmatprep.mubr.msk.f32.mxu0 %vm61_vm1, %v8282_v45  ;;  %v8301_v31 = vmax.f32 %v1877_v9, %v7742_v36 }
 0x120   :  { %v6471_v21 = vpop.f32.mrf.mxu1  ;;  %6634 = vmatmul.mubr.msk.f32.gmra.mxu0 %vm61_vm1, %v8287_v27  ;;  %6798 = vmatmul.mubr.msk.f32.gmra.mxu1 %vm61_vm1, %v8259_v14  ;;  %v911_v29 = vpop.f32.mrf.mxu0 }
 0x121   :  { %v8296_v50 = vmax.f32 %v1876_v1, %v7730_v33  ;;  %6800 = vmatprep.mubr.msk.f32.mxu1 %vm61_vm1, %v8268_v37  ;;  %v1879_v52 = vmax.f32 %v6301_v46, %v6471_v21 }
 0x122   :  { %v1487_v7 = vpop.f32.mrf.mxu1  ;;  %v6310_v57 = vpop.f32.mrf.mxu0 }
 0x123   :  { %v1878_v20 = vmax.f32 %v891_v17, %v1487_v7  ;;  %6636 = vmatprep.mubr.msk.f32.mxu0 %vm61_vm1, %v8296_v50  ;;  %v8315_v36 = vmax.f32 %v1879_v52, %v7762_v41 }
 0x124   :  { %v6474_v34 = vpop.f32.mrf.mxu1  ;;  %6637 = vmatmul.mubr.msk.f32.gmra.mxu0 %vm61_vm1, %v8301_v31  ;;  %6801 = vmatmul.mubr.msk.f32.gmra.mxu1 %vm61_vm1, %v8273_v19  ;;  %v921_v33 = vpop.f32.mrf.mxu0 }
 0x125   :  { %v8310_v58 = vmax.f32 %v1878_v20, %v7750_v39  ;;  %6803 = vmatprep.mubr.msk.f32.mxu1 %vm61_vm1, %v8282_v45  ;;  %10366 = vst [vmem:[#allocation47_spill] sm:$0xff] %v8315_v36  ;;  %v1881_v46 = vmax.f32 %v6304_v42, %v6474_v34 }
 0x126   :  { %v1497_v17 = vpop.f32.mrf.mxu1  ;;  %v6313_v9 = vpop.f32.mrf.mxu0 }
 0x127   :  { %10365 = vst [vmem:[#allocation46_spill] sm:$0xff] %v8310_v58  ;;  %v1880_v1 = vmax.f32 %v901_v22, %v1497_v17  ;;  %6639 = vmatprep.mubr.msk.f32.mxu0 %vm61_vm1, %v8310_v58  ;;  %v8329_v41 = vmax.f32 %v1881_v46, %v7782_v48 }
 0x128   :  { %v6477_v21 = vpop.f32.mrf.mxu1  ;;  %6640 = vmatmul.mubr.msk.f32.gmra.mxu0 %vm61_vm1, %v8315_v36  ;;  %6804 = vmatmul.mubr.msk.f32.gmra.mxu1 %vm61_vm1, %v8287_v27  ;;  %v931_v39 = vpop.f32.mrf.mxu0 }
 0x129   :  { %v8324_v7 = vmax.f32 %v1880_v1, %v7770_v44  ;;  %6806 = vmatprep.mubr.msk.f32.mxu1 %vm61_vm1, %v8296_v50  ;;  %10368 = vst [vmem:[#allocation49_spill] sm:$0xff] %v8329_v41  ;;  %v1883_v42 = vmax.f32 %v6307_v40, %v6477_v21 }
 0x12a   :  { %v1507_v22 = vpop.f32.mrf.mxu1  ;;  %v6316_v52 = vpop.f32.mrf.mxu0 }
 0x12b   :  { %10367 = vst [vmem:[#allocation48_spill] sm:$0xff] %v8324_v7  ;;  %v1882_v20 = vmax.f32 %v911_v29, %v1507_v22  ;;  %6642 = vmatprep.mubr.msk.f32.mxu0 %vm61_vm1, %v8324_v7  ;;  %v8343_v48 = vmax.f32 %v1883_v42, %v7796_v51 }
 0x12c   :  { %v6480_v34 = vpop.f32.mrf.mxu1  ;;  %6643 = vmatmul.mubr.msk.f32.gmra.mxu0 %vm61_vm1, %v8329_v41  ;;  %6807 = vmatmul.mubr.msk.f32.gmra.mxu1 %vm61_vm1, %v8301_v31  ;;  %v941_v44 = vpop.f32.mrf.mxu0 }
 0x12d   :  { %v8338_v17 = vmax.f32 %v1882_v20, %v7787_v49  ;;  %6809 = vmatprep.mubr.msk.f32.mxu1 %vm61_vm1, %v8310_v58  ;;  %10370 = vst [vmem:[#allocation51_spill] sm:$0xff] %v8343_v48  ;;  %v1885_v40 = vmax.f32 %v6310_v57, %v6480_v34 }
 0x12e   :  { %v1517_v29 = vpop.f32.mrf.mxu1  ;;  %v6319_v46 = vpop.f32.mrf.mxu0 }
 0x12f   :  { %10369 = vst [vmem:[#allocation50_spill] sm:$0xff] %v8338_v17  ;;  %v1884_v1 = vmax.f32 %v921_v33, %v1517_v29  ;;  %6645 = vmatprep.mubr.msk.f32.mxu0 %vm61_vm1, %v8338_v17  ;;  %v8357_v51 = vmax.f32 %v1885_v40, %v7814_v56 }
 0x130   :  { %v6483_v21 = vpop.f32.mrf.mxu1  ;;  %6646 = vmatmul.mubr.msk.f32.gmra.mxu0 %vm61_vm1, %v8343_v48  ;;  %6810 = vmatmul.mubr.msk.f32.gmra.mxu1 %vm61_vm1, %v8315_v36  ;;  %v951_v49 = vpop.f32.mrf.mxu0 }
 0x131   :  { %v8352_v22 = vmax.f32 %v1884_v1, %v7803_v53  ;;  %6812 = vmatprep.mubr.msk.f32.mxu1 %vm61_vm1, %v8324_v7  ;;  %10372 = vst [vmem:[#allocation53_spill] sm:$0xff] %v8357_v51  ;;  %v1887_v57 = vmax.f32 %v6313_v9, %v6483_v21 }
 0x132   :  { %v1527_v33 = vpop.f32.mrf.mxu1  ;;  %v6322_v42 = vpop.f32.mrf.mxu0 }
 0x133   :  { %10371 = vst [vmem:[#allocation52_spill] sm:$0xff] %v8352_v22  ;;  %v1886_v20 = vmax.f32 %v931_v39, %v1527_v33  ;;  %6648 = vmatprep.mubr.msk.f32.mxu0 %vm61_vm1, %v8352_v22  ;;  %v8371_v56 = vmax.f32 %v1887_v57, %v7832_v61 }
 0x134   :  { %v6486_v34 = vpop.f32.mrf.mxu1  ;;  %6649 = vmatmul.mubr.msk.f32.gmra.mxu0 %vm61_vm1, %v8357_v51  ;;  %6813 = vmatmul.mubr.msk.f32.gmra.mxu1 %vm61_vm1, %v8329_v41  ;;  %v961_v53 = vpop.f32.mrf.mxu0 }
 0x135   :  { %v8366_v29 = vmax.f32 %v1886_v20, %v7821_v59  ;;  %6815 = vmatprep.mubr.msk.f32.mxu1 %vm61_vm1, %v8338_v17  ;;  %10374 = vst [vmem:[#allocation55_spill] sm:$0xff] %v8371_v56  ;;  %v1889_v9 = vmax.f32 %v6316_v52, %v6486_v34 }
 0x136   :  { %v1537_v39 = vpop.f32.mrf.mxu1  ;;  %v6325_v40 = vpop.f32.mrf.mxu0 }
 0x137   :  { %10373 = vst [vmem:[#allocation54_spill] sm:$0xff] %v8366_v29  ;;  %v1888_v1 = vmax.f32 %v941_v44, %v1537_v39  ;;  %6651 = vmatprep.mubr.msk.f32.mxu0 %vm61_vm1, %v8366_v29  ;;  %v8385_v61 = vmax.f32 %v1889_v9, %v7856_v6 }
 0x138   :  { %v6489_v21 = vpop.f32.mrf.mxu1  ;;  %6652 = vmatmul.mubr.msk.f32.gmra.mxu0 %vm61_vm1, %v8371_v56  ;;  %6816 = vmatmul.mubr.msk.f32.gmra.mxu1 %vm61_vm1, %v8343_v48  ;;  %v971_v59 = vpop.f32.mrf.mxu0 }
 0x139   :  { %v8380_v33 = vmax.f32 %v1888_v1, %v7842_v0  ;;  %6818 = vmatprep.mubr.msk.f32.mxu1 %vm61_vm1, %v8352_v22  ;;  %10376 = vst [vmem:[#allocation57_spill] sm:$0xff] %v8385_v61  ;;  %v1891_v52 = vmax.f32 %v6319_v46, %v6489_v21 }
 0x13a   :  { %v1547_v44 = vpop.f32.mrf.mxu1  ;;  %v6328_v57 = vpop.f32.mrf.mxu0 }
 0x13b   :  { %10375 = vst [vmem:[#allocation56_spill] sm:$0xff] %v8380_v33  ;;  %v1890_v20 = vmax.f32 %v951_v49, %v1547_v44  ;;  %6654 = vmatprep.mubr.msk.f32.mxu0 %vm61_vm1, %v8380_v33  ;;  %v8399_v6 = vmax.f32 %v1891_v52, %v7871_v10  ;;  %v10380_v10 = vld [vmem:[#allocation3_spill] sm:$0xff] }
 0x13c   :  { %v6492_v34 = vpop.f32.mrf.mxu1  ;;  %6655 = vmatmul.mubr.msk.f32.gmra.mxu0 %vm61_vm1, %v8385_v61  ;;  %6819 = vmatmul.mubr.msk.f32.gmra.mxu1 %vm61_vm1, %v8357_v51  ;;  %v981_v0 = vpop.f32.mrf.mxu0 }
 0x13d   :  { %v8394_v39 = vmax.f32 %v1890_v20, %v7860_v8  ;;  %6821 = vmatprep.mubr.msk.f32.mxu1 %vm61_vm1, %v8366_v29  ;;  %10378 = vst [vmem:[#allocation59_spill] sm:$0xff] %v8399_v6  ;;  %v1893_v46 = vmax.f32 %v6322_v42, %v6492_v34 }
 0x13e   :  { %v1557_v49 = vpop.f32.mrf.mxu1  ;;  %v6331_v9 = vpop.f32.mrf.mxu0 }
 0x13f   :  { %10377 = vst [vmem:[#allocation58_spill] sm:$0xff] %v8394_v39  ;;  %v1892_v1 = vmax.f32 %v961_v53, %v1557_v49  ;;  %6657 = vmatprep.mubr.msk.f32.mxu0 %vm61_vm1, %v8394_v39  ;;  %v8413_v42 = vmax.f32 %v1893_v46, %v10380_v10 }
 0x140   :  { %v6495_v21 = vpop.f32.mrf.mxu1  ;;  %6658 = vmatmul.mubr.msk.f32.gmra.mxu0 %vm61_vm1, %v8399_v6  ;;  %6822 = vmatmul.mubr.msk.f32.gmra.mxu1 %vm61_vm1, %v8371_v56  ;;  %v991_v8 = vpop.f32.mrf.mxu0 }
 0x141   :  { %v8408_v44 = vmax.f32 %v1892_v1, %v7878_v16  ;;  %6824 = vmatprep.mubr.msk.f32.mxu1 %vm61_vm1, %v8380_v33  ;;  %10381 = vst [vmem:[#allocation3_spill] sm:$0xff] %v8413_v42  ;;  %v1895_v53 = vmax.f32 %v6325_v40, %v6495_v21  ;;  %v10382_v1 = vld [vmem:[#allocation4_spill] sm:$0xff]  ;;  %v10384_v40 = vld [vmem:[#allocation5_spill] sm:$0xff] }
 0x142   :  { %v1567_v52 = vpop.f32.mrf.mxu1  ;;  %v6334_v20 = vpop.f32.mrf.mxu0 }
 0x143   :  { %10379 = vst [vmem:[#allocation60_spill] sm:$0xff] %v8408_v44  ;;  %v1894_v34 = vmax.f32 %v971_v59, %v1567_v52  ;;  %6660 = vmatprep.mubr.msk.f32.mxu0 %vm61_vm1, %v8408_v44  ;;  %v8427_v46 = vmax.f32 %v1895_v53, %v10384_v40 }
 0x144   :  { %v6498_v49 = vpop.f32.mrf.mxu1  ;;  %6661 = vmatmul.mubr.msk.f32.gmra.mxu0 %vm61_vm1, %v8413_v42  ;;  %6825 = vmatmul.mubr.msk.f32.gmra.mxu1 %vm61_vm1, %v8385_v61  ;;  %v1001_v16 = vpop.f32.mrf.mxu0 }
 0x145   :  { %v8422_v58 = vmax.f32 %v1894_v34, %v10382_v1  ;;  %6827 = vmatprep.mubr.msk.f32.mxu1 %vm61_vm1, %v8394_v39  ;;  %10385 = vst [vmem:[#allocation5_spill] sm:$0xff] %v8427_v46  ;;  %v1897_v59 = vmax.f32 %v6328_v57, %v6498_v49  ;;  %v10386_v1 = vld [vmem:[#allocation6_spill] sm:$0xff]  ;;  %v10388_v57 = vld [vmem:[#allocation7_spill] sm:$0xff] }
 0x146   :  { %v1577_v21 = vpop.f32.mrf.mxu1  ;;  %v6337_v10 = vpop.f32.mrf.mxu0 }
 0x147   :  { %10383 = vst [vmem:[#allocation4_spill] sm:$0xff] %v8422_v58  ;;  %v1896_v52 = vmax.f32 %v981_v0, %v1577_v21  ;;  %6663 = vmatprep.mubr.msk.f32.mxu0 %vm61_vm1, %v8422_v58  ;;  %v8441_v53 = vmax.f32 %v1897_v59, %v10388_v57 }
 0x148   :  { %v6501_v36 = vpop.f32.mrf.mxu1  ;;  %6664 = vmatmul.mubr.msk.f32.gmra.mxu0 %vm61_vm1, %v8427_v46  ;;  %6828 = vmatmul.mubr.msk.f32.gmra.mxu1 %vm61_vm1, %v8399_v6  ;;  %v1011_v34 = vpop.f32.mrf.mxu0 }
 0x149   :  { %v8436_v7 = vmax.f32 %v1896_v52, %v10386_v1  ;;  %6830 = vmatprep.mubr.msk.f32.mxu1 %vm61_vm1, %v8408_v44  ;;  %10389 = vst [vmem:[#allocation7_spill] sm:$0xff] %v8441_v53  ;;  %v1899_v0 = vmax.f32 %v6331_v9, %v6501_v36  ;;  %v10390_v1 = vld [vmem:[#allocation8_spill] sm:$0xff]  ;;  %v10392_v36 = vld [vmem:[#allocation9_spill] sm:$0xff] }
 0x14a   :  { %v1587_v49 = vpop.f32.mrf.mxu1  ;;  %v6340_v40 = vpop.f32.mrf.mxu0 }
 0x14b   :  { %10387 = vst [vmem:[#allocation6_spill] sm:$0xff] %v8436_v7  ;;  %v1898_v21 = vmax.f32 %v991_v8, %v1587_v49  ;;  %6666 = vmatprep.mubr.msk.f32.mxu0 %vm61_vm1, %v8436_v7  ;;  %v8455_v9 = vmax.f32 %v1899_v0, %v10392_v36 }
 0x14c   :  { %v6504_v41 = vpop.f32.mrf.mxu1  ;;  %6667 = vmatmul.mubr.msk.f32.gmra.mxu0 %vm61_vm1, %v8441_v53  ;;  %6831 = vmatmul.mubr.msk.f32.gmra.mxu1 %vm61_vm1, %v8413_v42  ;;  %v1021_v52 = vpop.f32.mrf.mxu0 }
 0x14d   :  { %v8450_v17 = vmax.f32 %v1898_v21, %v10390_v1  ;;  %6833 = vmatprep.mubr.msk.f32.mxu1 %vm61_vm1, %v8422_v58  ;;  %10393 = vst [vmem:[#allocation9_spill] sm:$0xff] %v8455_v9  ;;  %v1901_v8 = vmax.f32 %v6334_v20, %v6504_v41  ;;  %v10394_v1 = vld [vmem:[#allocation10_spill] sm:$0xff]  ;;  %v10396_v41 = vld [vmem:[#allocation11_spill] sm:$0xff] }
 0x14e   :  { %v1597_v59 = vpop.f32.mrf.mxu1  ;;  %v6343_v57 = vpop.f32.mrf.mxu0 }
 0x14f   :  { %10391 = vst [vmem:[#allocation8_spill] sm:$0xff] %v8450_v17  ;;  %v1900_v49 = vmax.f32 %v1001_v16, %v1597_v59  ;;  %6669 = vmatprep.mubr.msk.f32.mxu0 %vm61_vm1, %v8450_v17  ;;  %v8469_v20 = vmax.f32 %v1901_v8, %v10396_v41 }
 0x150   :  { %v6507_v48 = vpop.f32.mrf.mxu1  ;;  %6670 = vmatmul.mubr.msk.f32.gmra.mxu0 %vm61_vm1, %v8455_v9  ;;  %6834 = vmatmul.mubr.msk.f32.gmra.mxu1 %vm61_vm1, %v8427_v46  ;;  %v1031_v21 = vpop.f32.mrf.mxu0 }
 0x151   :  { %v8464_v58 = vmax.f32 %v1900_v49, %v10394_v1  ;;  %6836 = vmatprep.mubr.msk.f32.mxu1 %vm61_vm1, %v8436_v7  ;;  %10397 = vst [vmem:[#allocation11_spill] sm:$0xff] %v8469_v20  ;;  %v1903_v16 = vmax.f32 %v6337_v10, %v6507_v48  ;;  %v10398_v1 = vld [vmem:[#allocation12_spill] sm:$0xff]  ;;  %v10400_v48 = vld [vmem:[#allocation13_spill] sm:$0xff] }
 0x152   :  { %v1607_v0 = vpop.f32.mrf.mxu1  ;;  %v6346_v36 = vpop.f32.mrf.mxu0 }
 0x153   :  { %10395 = vst [vmem:[#allocation10_spill] sm:$0xff] %v8464_v58  ;;  %v1902_v59 = vmax.f32 %v1011_v34, %v1607_v0  ;;  %6672 = vmatprep.mubr.msk.f32.mxu0 %vm61_vm1, %v8464_v58  ;;  %v8483_v10 = vmax.f32 %v1903_v16, %v10400_v48 }
 0x154   :  { %v6510_v22 = vpop.f32.mrf.mxu1  ;;  %6673 = vmatmul.mubr.msk.f32.gmra.mxu0 %vm61_vm1, %v8469_v20  ;;  %6837 = vmatmul.mubr.msk.f32.gmra.mxu1 %vm61_vm1, %v8441_v53  ;;  %v1041_v49 = vpop.f32.mrf.mxu0 }
 0x155   :  { %v8478_v46 = vmax.f32 %v1902_v59, %v10398_v1  ;;  %6839 = vmatprep.mubr.msk.f32.mxu1 %vm61_vm1, %v8450_v17  ;;  %10401 = vst [vmem:[#allocation13_spill] sm:$0xff] %v8483_v10  ;;  %v1905_v34 = vmax.f32 %v6340_v40, %v6510_v22  ;;  %v10402_v1 = vld [vmem:[#allocation14_spill] sm:$0xff]  ;;  %v10404_v22 = vld [vmem:[#allocation15_spill] sm:$0xff] }
 0x156   :  { %v1617_v8 = vpop.f32.mrf.mxu1  ;;  %v6349_v41 = vpop.f32.mrf.mxu0 }
 0x157   :  { %10399 = vst [vmem:[#allocation12_spill] sm:$0xff] %v8478_v46  ;;  %v1904_v0 = vmax.f32 %v1021_v52, %v1617_v8  ;;  %6675 = vmatprep.mubr.msk.f32.mxu0 %vm61_vm1, %v8478_v46  ;;  %v8497_v40 = vmax.f32 %v1905_v34, %v10404_v22 }
 0x158   :  { %v6513_v7 = vpop.f32.mrf.mxu1  ;;  %6676 = vmatmul.mubr.msk.f32.gmra.mxu0 %vm61_vm1, %v8483_v10  ;;  %6840 = vmatmul.mubr.msk.f32.gmra.mxu1 %vm61_vm1, %v8455_v9  ;;  %v1051_v59 = vpop.f32.mrf.mxu0 }
 0x159   :  { %v8492_v53 = vmax.f32 %v1904_v0, %v10402_v1  ;;  %6842 = vmatprep.mubr.msk.f32.mxu1 %vm61_vm1, %v8464_v58  ;;  %10405 = vst [vmem:[#allocation15_spill] sm:$0xff] %v8497_v40  ;;  %v1907_v52 = vmax.f32 %v6343_v57, %v6513_v7  ;;  %v10406_v1 = vld [vmem:[#allocation16_spill] sm:$0xff]  ;;  %v10408_v7 = vld [vmem:[#allocation17_spill] sm:$0xff] }
 0x15a   :  { %v1627_v16 = vpop.f32.mrf.mxu1  ;;  %v6352_v48 = vpop.f32.mrf.mxu0 }
 0x15b   :  { %10403 = vst [vmem:[#allocation14_spill] sm:$0xff] %v8492_v53  ;;  %v1906_v8 = vmax.f32 %v1031_v21, %v1627_v16  ;;  %6678 = vmatprep.mubr.msk.f32.mxu0 %vm61_vm1, %v8492_v53  ;;  %v8511_v57 = vmax.f32 %v1907_v52, %v10408_v7 }
 0x15c   :  { %v6516_v17 = vpop.f32.mrf.mxu1  ;;  %6679 = vmatmul.mubr.msk.f32.gmra.mxu0 %vm61_vm1, %v8497_v40  ;;  %6843 = vmatmul.mubr.msk.f32.gmra.mxu1 %vm61_vm1, %v8469_v20  ;;  %v1061_v0 = vpop.f32.mrf.mxu0 }
 0x15d   :  { %v8506_v9 = vmax.f32 %v1906_v8, %v10406_v1  ;;  %6845 = vmatprep.mubr.msk.f32.mxu1 %vm61_vm1, %v8478_v46  ;;  %10409 = vst [vmem:[#allocation17_spill] sm:$0xff] %v8511_v57  ;;  %v1909_v21 = vmax.f32 %v6346_v36, %v6516_v17  ;;  %v10410_v1 = vld [vmem:[#allocation18_spill] sm:$0xff]  ;;  %v10412_v17 = vld [vmem:[#allocation19_spill] sm:$0xff] }
 0x15e   :  { %v1637_v34 = vpop.f32.mrf.mxu1  ;;  %v6355_v22 = vpop.f32.mrf.mxu0 }
 0x15f   :  { %10407 = vst [vmem:[#allocation16_spill] sm:$0xff] %v8506_v9  ;;  %v1908_v16 = vmax.f32 %v1041_v49, %v1637_v34  ;;  %6681 = vmatprep.mubr.msk.f32.mxu0 %vm61_vm1, %v8506_v9  ;;  %v8525_v36 = vmax.f32 %v1909_v21, %v10412_v17 }
 0x160   :  { %v6519_v58 = vpop.f32.mrf.mxu1  ;;  %6682 = vmatmul.mubr.msk.f32.gmra.mxu0 %vm61_vm1, %v8511_v57  ;;  %6846 = vmatmul.mubr.msk.f32.gmra.mxu1 %vm61_vm1, %v8483_v10  ;;  %v1071_v8 = vpop.f32.mrf.mxu0 }
 0x161   :  { %v8520_v51 = vmax.f32 %v1908_v16, %v10410_v1  ;;  %6848 = vmatprep.mubr.msk.f32.mxu1 %vm61_vm1, %v8492_v53  ;;  %10413 = vst [vmem:[#allocation19_spill] sm:$0xff] %v8525_v36  ;;  %v1911_v49 = vmax.f32 %v6349_v41, %v6519_v58  ;;  %v7019_v1 = vld [vmem:[#allocation2 + $0x200] sm:$0xff]  ;;  %v10415_v58 = vld [vmem:[#allocation20_spill] sm:$0xff] }
 0x162   :  { %v1647_v52 = vpop.f32.mrf.mxu1  ;;  %v6358_v7 = vpop.f32.mrf.mxu0 }
 0x163   :  { %10411 = vst [vmem:[#allocation18_spill] sm:$0xff] %v8520_v51  ;;  %v1910_v34 = vmax.f32 %v1051_v59, %v1647_v52  ;;  %6684 = vmatprep.mubr.msk.f32.mxu0 %vm61_vm1, %v8520_v51  ;;  %v8538_v41 = vmax.f32 %v1911_v49, %v10415_v58 }
 0x164   :  { %v6522_v20 = vpop.f32.mrf.mxu1  ;;  %6685 = vmatmul.mubr.msk.f32.gmra.mxu0 %vm61_vm1, %v8525_v36  ;;  %6849 = vmatmul.mubr.msk.f32.gmra.mxu1 %vm61_vm1, %v8497_v40  ;;  %v1081_v16 = vpop.f32.mrf.mxu0 }
 0x165   :  { %v8533_v29 = vmax.f32 %v1910_v34, %v7019_v1  ;;  %6851 = vmatprep.mubr.msk.f32.mxu1 %vm61_vm1, %v8506_v9  ;;  %10416 = vst [vmem:[#allocation20_spill] sm:$0xff] %v8538_v41  ;;  %v1913_v59 = vmax.f32 %v6352_v48, %v6522_v20  ;;  %v7020_v1 = vld [vmem:[#allocation2 + $0x210] sm:$0xff]  ;;  %v7021_v20 = vld [vmem:[#allocation2 + $0x218] sm:$0xff] }
 0x166   :  { %v1657_v21 = vpop.f32.mrf.mxu1  ;;  %v6361_v17 = vpop.f32.mrf.mxu0 }
 0x167   :  { %10414 = vst [vmem:[#allocation61_spill] sm:$0xff] %v8533_v29  ;;  %v1912_v52 = vmax.f32 %v1061_v0, %v1657_v21  ;;  %6687 = vmatprep.mubr.msk.f32.mxu0 %vm61_vm1, %v8533_v29  ;;  %v8550_v48 = vmax.f32 %v1913_v59, %v7021_v20 }
 0x168   :  { %v6525_v46 = vpop.f32.mrf.mxu1  ;;  %6688 = vmatmul.mubr.msk.f32.gmra.mxu0 %vm61_vm1, %v8538_v41  ;;  %6852 = vmatmul.mubr.msk.f32.gmra.mxu1 %vm61_vm1, %v8511_v57  ;;  %v1091_v34 = vpop.f32.mrf.mxu0 }
 0x169   :  { %v8546_v56 = vmax.f32 %v1912_v52, %v7020_v1  ;;  %6854 = vmatprep.mubr.msk.f32.mxu1 %vm61_vm1, %v8520_v51  ;;  %10418 = vst [vmem:[#allocation63_spill] sm:$0xff] %v8550_v48  ;;  %v1915_v0 = vmax.f32 %v6355_v22, %v6525_v46  ;;  %v7022_v1 = vld [vmem:[#allocation2 + $0x220] sm:$0xff]  ;;  %v7023_v46 = vld [vmem:[#allocation2 + $0x228] sm:$0xff] }
 0x16a   :  { %v1667_v49 = vpop.f32.mrf.mxu1  ;;  %v6364_v58 = vpop.f32.mrf.mxu0 }
 0x16b   :  { %10417 = vst [vmem:[#allocation62_spill] sm:$0xff] %v8546_v56  ;;  %v1914_v21 = vmax.f32 %v1071_v8, %v1667_v49  ;;  %6690 = vmatprep.mubr.msk.f32.mxu0 %vm61_vm1, %v8546_v56  ;;  %v8562_v22 = vmax.f32 %v1915_v0, %v7023_v46 }
 0x16c   :  { %v6528_v10 = vpop.f32.mrf.mxu1  ;;  %6691 = vmatmul.mubr.msk.f32.gmra.mxu0 %vm61_vm1, %v8550_v48  ;;  %6855 = vmatmul.mubr.msk.f32.gmra.mxu1 %vm61_vm1, %v8525_v36  ;;  %v1101_v52 = vpop.f32.mrf.mxu0 }
 0x16d   :  { %v8558_v33 = vmax.f32 %v1914_v21, %v7022_v1  ;;  %6857 = vmatprep.mubr.msk.f32.mxu1 %vm61_vm1, %v8533_v29  ;;  %10420 = vst [vmem:[#allocation65_spill] sm:$0xff] %v8562_v22  ;;  %v1917_v8 = vmax.f32 %v6358_v7, %v6528_v10  ;;  %v7024_v1 = vld [vmem:[#allocation2 + $0x230] sm:$0xff]  ;;  %v7025_v10 = vld [vmem:[#allocation2 + $0x238] sm:$0xff] }
 0x16e   :  { %v1677_v59 = vpop.f32.mrf.mxu1  ;;  %v6367_v20 = vpop.f32.mrf.mxu0 }
 0x16f   :  { %10419 = vst [vmem:[#allocation64_spill] sm:$0xff] %v8558_v33  ;;  %v1916_v49 = vmax.f32 %v1081_v16, %v1677_v59  ;;  %6693 = vmatprep.mubr.msk.f32.mxu0 %vm61_vm1, %v8558_v33  ;;  %v8574_v7 = vmax.f32 %v1917_v8, %v7025_v10 }
 0x170   :  { %v6531_v53 = vpop.f32.mrf.mxu1  ;;  %6694 = vmatmul.mubr.msk.f32.gmra.mxu0 %vm61_vm1, %v8562_v22  ;;  %6858 = vmatmul.mubr.msk.f32.gmra.mxu1 %vm61_vm1, %v8538_v41  ;;  %v1111_v21 = vpop.f32.mrf.mxu0 }
 0x171   :  { %v8570_v29 = vmax.f32 %v1916_v49, %v7024_v1  ;;  %6860 = vmatprep.mubr.msk.f32.mxu1 %vm61_vm1, %v8546_v56  ;;  %10422 = vst [vmem:[#allocation67_spill] sm:$0xff] %v8574_v7  ;;  %v1919_v16 = vmax.f32 %v6361_v17, %v6531_v53  ;;  %v7026_v1 = vld [vmem:[#allocation2 + $0x240] sm:$0xff]  ;;  %v7027_v53 = vld [vmem:[#allocation2 + $0x248] sm:$0xff] }
 0x172   :  { %v1687_v0 = vpop.f32.mrf.mxu1  ;;  %v6370_v46 = vpop.f32.mrf.mxu0 }
 0x173   :  { %10421 = vst [vmem:[#allocation66_spill] sm:$0xff] %v8570_v29  ;;  %v1918_v59 = vmax.f32 %v1091_v34, %v1687_v0  ;;  %6696 = vmatprep.mubr.msk.f32.mxu0 %vm61_vm1, %v8570_v29  ;;  %v8586_v17 = vmax.f32 %v1919_v16, %v7027_v53 }
 0x174   :  { %v6534_v61 = vpop.f32.mrf.mxu1  ;;  %6697 = vmatmul.mubr.msk.f32.gmra.mxu0 %vm61_vm1, %v8574_v7  ;;  %6861 = vmatmul.mubr.msk.f32.gmra.mxu1 %vm61_vm1, %v8550_v48  ;;  %v1121_v49 = vpop.f32.mrf.mxu0 }
 0x175   :  { %v8582_v41 = vmax.f32 %v1918_v59, %v7026_v1  ;;  %6863 = vmatprep.mubr.msk.f32.mxu1 %vm61_vm1, %v8558_v33  ;;  %10424 = vst [vmem:[#allocation69_spill] sm:$0xff] %v8586_v17  ;;  %v1921_v34 = vmax.f32 %v6364_v58, %v6534_v61  ;;  %v7028_v1 = vld [vmem:[#allocation2 + $0x250] sm:$0xff]  ;;  %v7029_v61 = vld [vmem:[#allocation2 + $0x258] sm:$0xff] }
 0x176   :  { %v1697_v8 = vpop.f32.mrf.mxu1  ;;  %v6373_v10 = vpop.f32.mrf.mxu0 }
 0x177   :  { %10423 = vst [vmem:[#allocation68_spill] sm:$0xff] %v8582_v41  ;;  %v1920_v0 = vmax.f32 %v1101_v52, %v1697_v8  ;;  %6699 = vmatprep.mubr.msk.f32.mxu0 %vm61_vm1, %v8582_v41  ;;  %v8598_v58 = vmax.f32 %v1921_v34, %v7029_v61 }
 0x178   :  { %v6537_v56 = vpop.f32.mrf.mxu1  ;;  %6700 = vmatmul.mubr.msk.f32.gmra.mxu0 %vm61_vm1, %v8586_v17  ;;  %6864 = vmatmul.mubr.msk.f32.gmra.mxu1 %vm61_vm1, %v8562_v22  ;;  %v1131_v59 = vpop.f32.mrf.mxu0 }
 0x179   :  { %v8594_v48 = vmax.f32 %v1920_v0, %v7028_v1  ;;  %6866 = vmatprep.mubr.msk.f32.mxu1 %vm61_vm1, %v8570_v29  ;;  %10426 = vst [vmem:[#allocation71_spill] sm:$0xff] %v8598_v58  ;;  %v1923_v52 = vmax.f32 %v6367_v20, %v6537_v56  ;;  %v7030_v1 = vld [vmem:[#allocation2 + $0x260] sm:$0xff]  ;;  %v7031_v56 = vld [vmem:[#allocation2 + $0x268] sm:$0xff] }
 0x17a   :  { %v1707_v16 = vpop.f32.mrf.mxu1  ;;  %v6376_v53 = vpop.f32.mrf.mxu0 }
 0x17b   :  { %10425 = vst [vmem:[#allocation70_spill] sm:$0xff] %v8594_v48  ;;  %v1922_v8 = vmax.f32 %v1111_v21, %v1707_v16  ;;  %6702 = vmatprep.mubr.msk.f32.mxu0 %vm61_vm1, %v8594_v48  ;;  %v8610_v20 = vmax.f32 %v1923_v52, %v7031_v56 }
 0x17c   :  { %v6540_v33 = vpop.f32.mrf.mxu1  ;;  %6703 = vmatmul.mubr.msk.f32.gmra.mxu0 %vm61_vm1, %v8598_v58  ;;  %6867 = vmatmul.mubr.msk.f32.gmra.mxu1 %vm61_vm1, %v8574_v7  ;;  %v1141_v0 = vpop.f32.mrf.mxu0 }
 0x17d   :  { %v8606_v22 = vmax.f32 %v1922_v8, %v7030_v1  ;;  %6869 = vmatprep.mubr.msk.f32.mxu1 %vm61_vm1, %v8582_v41  ;;  %10428 = vst [vmem:[#allocation73_spill] sm:$0xff] %v8610_v20  ;;  %v1925_v21 = vmax.f32 %v6370_v46, %v6540_v33  ;;  %v7032_v1 = vld [vmem:[#allocation2 + $0x270] sm:$0xff]  ;;  %v7033_v33 = vld [vmem:[#allocation2 + $0x278] sm:$0xff] }
 0x17e   :  { %v1717_v34 = vpop.f32.mrf.mxu1  ;;  %v6379_v61 = vpop.f32.mrf.mxu0 }
 0x17f   :  { %10427 = vst [vmem:[#allocation72_spill] sm:$0xff] %v8606_v22  ;;  %v1924_v16 = vmax.f32 %v1121_v49, %v1717_v34  ;;  %6705 = vmatprep.mubr.msk.f32.mxu0 %vm61_vm1, %v8606_v22  ;;  %v8622_v46 = vmax.f32 %v1925_v21, %v7033_v33 }
 0x180   :  { %v6543_v29 = vpop.f32.mrf.mxu1  ;;  %6706 = vmatmul.mubr.msk.f32.gmra.mxu0 %vm61_vm1, %v8610_v20  ;;  %6870 = vmatmul.mubr.msk.f32.gmra.mxu1 %vm61_vm1, %v8586_v17  ;;  %v1151_v8 = vpop.f32.mrf.mxu0 }
 0x181   :  { %v8618_v7 = vmax.f32 %v1924_v16, %v7032_v1  ;;  %6872 = vmatprep.mubr.msk.f32.mxu1 %vm61_vm1, %v8594_v48  ;;  %10430 = vst [vmem:[#allocation75_spill] sm:$0xff] %v8622_v46  ;;  %v1927_v49 = vmax.f32 %v6373_v10, %v6543_v29  ;;  %v7034_v1 = vld [vmem:[#allocation2 + $0x280] sm:$0xff]  ;;  %v7035_v29 = vld [vmem:[#allocation2 + $0x288] sm:$0xff] }
 0x182   :  { %v1727_v52 = vpop.f32.mrf.mxu1  ;;  %v6382_v56 = vpop.f32.mrf.mxu0 }
 0x183   :  { %10429 = vst [vmem:[#allocation74_spill] sm:$0xff] %v8618_v7  ;;  %v1926_v34 = vmax.f32 %v1131_v59, %v1727_v52  ;;  %6708 = vmatprep.mubr.msk.f32.mxu0 %vm61_vm1, %v8618_v7  ;;  %v8634_v10 = vmax.f32 %v1927_v49, %v7035_v29 }
 0x184   :  { %v6546_v41 = vpop.f32.mrf.mxu1  ;;  %6709 = vmatmul.mubr.msk.f32.gmra.mxu0 %vm61_vm1, %v8622_v46  ;;  %6873 = vmatmul.mubr.msk.f32.gmra.mxu1 %vm61_vm1, %v8598_v58  ;;  %v1161_v16 = vpop.f32.mrf.mxu0 }
 0x185   :  { %v8630_v17 = vmax.f32 %v1926_v34, %v7034_v1  ;;  %6875 = vmatprep.mubr.msk.f32.mxu1 %vm61_vm1, %v8606_v22  ;;  %10432 = vst [vmem:[#allocation77_spill] sm:$0xff] %v8634_v10  ;;  %v1929_v59 = vmax.f32 %v6376_v53, %v6546_v41  ;;  %v7036_v1 = vld [vmem:[#allocation2 + $0x290] sm:$0xff]  ;;  %v7037_v41 = vld [vmem:[#allocation2 + $0x298] sm:$0xff] }
 0x186   :  { %v1737_v21 = vpop.f32.mrf.mxu1  ;;  %v6385_v33 = vpop.f32.mrf.mxu0 }
 0x187   :  { %10431 = vst [vmem:[#allocation76_spill] sm:$0xff] %v8630_v17  ;;  %v1928_v52 = vmax.f32 %v1141_v0, %v1737_v21  ;;  %6711 = vmatprep.mubr.msk.f32.mxu0 %vm61_vm1, %v8630_v17  ;;  %v8646_v53 = vmax.f32 %v1929_v59, %v7037_v41 }
 0x188   :  { %v6549_v48 = vpop.f32.mrf.mxu1  ;;  %6712 = vmatmul.mubr.msk.f32.gmra.mxu0 %vm61_vm1, %v8634_v10  ;;  %6876 = vmatmul.mubr.msk.f32.gmra.mxu1 %vm61_vm1, %v8610_v20  ;;  %v1171_v34 = vpop.f32.mrf.mxu0 }
 0x189   :  { %v8642_v58 = vmax.f32 %v1928_v52, %v7036_v1  ;;  %6878 = vmatprep.mubr.msk.f32.mxu1 %vm61_vm1, %v8618_v7  ;;  %10434 = vst [vmem:[#allocation79_spill] sm:$0xff] %v8646_v53  ;;  %v1931_v0 = vmax.f32 %v6379_v61, %v6549_v48  ;;  %v7038_v1 = vld [vmem:[#allocation2 + $0x2a0] sm:$0xff]  ;;  %v7039_v48 = vld [vmem:[#allocation2 + $0x2a8] sm:$0xff] }
 0x18a   :  { %v1747_v49 = vpop.f32.mrf.mxu1  ;;  %v6388_v29 = vpop.f32.mrf.mxu0 }
 0x18b   :  { %10433 = vst [vmem:[#allocation78_spill] sm:$0xff] %v8642_v58  ;;  %v1930_v21 = vmax.f32 %v1151_v8, %v1747_v49  ;;  %6714 = vmatprep.mubr.msk.f32.mxu0 %vm61_vm1, %v8642_v58  ;;  %v8658_v61 = vmax.f32 %v1931_v0, %v7039_v48 }
 0x18c   :  { %v6552_v22 = vpop.f32.mrf.mxu1  ;;  %6715 = vmatmul.mubr.msk.f32.gmra.mxu0 %vm61_vm1, %v8646_v53  ;;  %6879 = vmatmul.mubr.msk.f32.gmra.mxu1 %vm61_vm1, %v8622_v46  ;;  %v1181_v52 = vpop.f32.mrf.mxu0 }
 0x18d   :  { %v8654_v20 = vmax.f32 %v1930_v21, %v7038_v1  ;;  %6881 = vmatprep.mubr.msk.f32.mxu1 %vm61_vm1, %v8630_v17  ;;  %10436 = vst [vmem:[#allocation81_spill] sm:$0xff] %v8658_v61  ;;  %v1933_v8 = vmax.f32 %v6382_v56, %v6552_v22  ;;  %v7040_v1 = vld [vmem:[#allocation2 + $0x2b0] sm:$0xff]  ;;  %v7041_v22 = vld [vmem:[#allocation2 + $0x2b8] sm:$0xff] }
 0x18e   :  { %v1757_v59 = vpop.f32.mrf.mxu1  ;;  %v6391_v21 = vpop.f32.mrf.mxu0 }
 0x18f   :  { %10435 = vst [vmem:[#allocation80_spill] sm:$0xff] %v8654_v20  ;;  %v1932_v41 = vmax.f32 %v1161_v16, %v1757_v59  ;;  %6717 = vmatprep.mubr.msk.f32.mxu0 %vm61_vm1, %v8654_v20  ;;  %v8670_v56 = vmax.f32 %v1933_v8, %v7041_v22 }
 0x190   :  { %v6555_v49 = vpop.f32.mrf.mxu1  ;;  %6718 = vmatmul.mubr.msk.f32.gmra.mxu0 %vm61_vm1, %v8658_v61  ;;  %6882 = vmatmul.mubr.msk.f32.gmra.mxu1 %vm61_vm1, %v8634_v10 }
 0x191   :  { %v8666_v7 = vmax.f32 %v1932_v41, %v7040_v1  ;;  %6884 = vmatprep.mubr.msk.f32.mxu1 %vm61_vm1, %v8642_v58  ;;  %10438 = vst [vmem:[#allocation83_spill] sm:$0xff] %v8670_v56  ;;  %v1935_v16 = vmax.f32 %v6385_v33, %v6555_v49  ;;  %v1191_v41 = vpop.f32.mrf.mxu0  ;;  %v7042_v1 = vld [vmem:[#allocation2 + $0x2c0] sm:$0xff]  ;;  %v7043_v33 = vld [vmem:[#allocation2 + $0x2c8] sm:$0xff] }
 0x192   :  { %v1767_v0 = vpop.f32.mrf.mxu1 }
 0x193   :  { %10437 = vst [vmem:[#allocation82_spill] sm:$0xff] %v8666_v7  ;;  %v1934_v48 = vmax.f32 %v1171_v34, %v1767_v0  ;;  %6720 = vmatprep.mubr.msk.f32.mxu0 %vm61_vm1, %v8666_v7  ;;  %v8682_v8 = vmax.f32 %v1935_v16, %v7043_v33 }
 0x194   :  { %v6558_v59 = vpop.f32.mrf.mxu1  ;;  %6721 = vmatmul.mubr.msk.f32.gmra.mxu0 %vm61_vm1, %v8670_v56  ;;  %6885 = vmatmul.mubr.msk.f32.gmra.mxu1 %vm61_vm1, %v8646_v53 }
 0x195   :  { %v8678_v17 = vmax.f32 %v1934_v48, %v7042_v1  ;;  %6887 = vmatprep.mubr.msk.f32.mxu1 %vm61_vm1, %v8654_v20  ;;  %10440 = vst [vmem:[#allocation85_spill] sm:$0xff] %v8682_v8  ;;  %v1937_v34 = vmax.f32 %v6388_v29, %v6558_v59  ;;  %v6394_v48 = vpop.f32.mrf.mxu0  ;;  %v7044_v1 = vld [vmem:[#allocation2 + $0x2d0] sm:$0xff]  ;;  %v7045_v29 = vld [vmem:[#allocation2 + $0x2d8] sm:$0xff] }
 0x196   :  { %v1777_v49 = vpop.f32.mrf.mxu1 }
 0x197   :  { %10439 = vst [vmem:[#allocation84_spill] sm:$0xff] %v8678_v17  ;;  %v1936_v22 = vmax.f32 %v1181_v52, %v1777_v49  ;;  %6723 = vmatprep.mubr.msk.f32.mxu0 %vm61_vm1, %v8678_v17  ;;  %v8694_v16 = vmax.f32 %v1937_v34, %v7045_v29 }
 0x198   :  { %v6561_v0 = vpop.f32.mrf.mxu1  ;;  %6724 = vmatmul.mubr.msk.f32.gmra.mxu0 %vm61_vm1, %v8682_v8  ;;  %6888 = vmatmul.mubr.msk.f32.gmra.mxu1 %vm61_vm1, %v8658_v61 }
 0x199   :  { %v8690_v10 = vmax.f32 %v1936_v22, %v7044_v1  ;;  %6890 = vmatprep.mubr.msk.f32.mxu1 %vm61_vm1, %v8666_v7  ;;  %10442 = vst [vmem:[#allocation87_spill] sm:$0xff] %v8694_v16  ;;  %v1939_v52 = vmax.f32 %v6391_v21, %v6561_v0  ;;  %v1201_v22 = vpop.f32.mrf.mxu0  ;;  %v7046_v1 = vld [vmem:[#allocation2 + $0x2e0] sm:$0xff]  ;;  %v7047_v21 = vld [vmem:[#allocation2 + $0x2e8] sm:$0xff] }
 0x19a   :  { %v1787_v59 = vpop.f32.mrf.mxu1 }
 0x19b   :  { %10441 = vst [vmem:[#allocation86_spill] sm:$0xff] %v8690_v10  ;;  %v1938_v33 = vmax.f32 %v1191_v41, %v1787_v59  ;;  %6726 = vmatprep.mubr.msk.f32.mxu0 %vm61_vm1, %v8690_v10  ;;  %v8706_v34 = vmax.f32 %v1939_v52, %v7047_v21  ;;  %v7049_v52 = vld [vmem:[#allocation2 + $0x2f8] sm:$0xff] }
 0x19c   :  { %v6564_v49 = vpop.f32.mrf.mxu1  ;;  %6727 = vmatmul.mubr.msk.f32.gmra.mxu0 %vm61_vm1, %v8694_v16  ;;  %6891 = vmatmul.mubr.msk.f32.gmra.mxu1 %vm61_vm1, %v8670_v56 }
 0x19d   :  { %v8702_v58 = vmax.f32 %v1938_v33, %v7046_v1  ;;  %6893 = vmatprep.mubr.msk.f32.mxu1 %vm61_vm1, %v8678_v17  ;;  %10444 = vst [vmem:[#allocation89_spill] sm:$0xff] %v8706_v34  ;;  %v1941_v41 = vmax.f32 %v6394_v48, %v6564_v49  ;;  %v7048_v33 = vld [vmem:[#allocation2 + $0x2f0] sm:$0xff]  ;;  %v10458_v17 = vld [vmem:[#allocation26_spill] sm:$0xff] }
 0x19e   :  { %v1797_v0 = vpop.f32.mrf.mxu1  ;;  %v10447_v49 = vld [vmem:[#allocation21_spill] sm:$0xff] }
 0x19f   :  { %10443 = vst [vmem:[#allocation88_spill] sm:$0xff] %v8702_v58  ;;  %v1940_v29 = vmax.f32 %v1201_v22, %v1797_v0  ;;  %6729 = vmatprep.mubr.msk.f32.mxu0 %vm61_vm1, %v8702_v58  ;;  %v8718_v48 = vmax.f32 %v1941_v41, %v7049_v52  ;;  %v10448_v0 = vld [vmem:[#allocation22_spill] sm:$0xff]  ;;  %v7051_v41 = vld [vmem:[#allocation2 + $0x308] sm:$0xff]  ;;  %v10451_v52 = vld [vmem:[#allocation23_spill] sm:$0xff] }
 0x1a0   :  { %v6567_v59 = vpop.f32.mrf.mxu1  ;;  %6730 = vmatmul.mubr.msk.f32.gmra.mxu0 %vm61_vm1, %v8706_v34  ;;  %6894 = vmatmul.mubr.msk.f32.gmra.mxu1 %vm61_vm1, %v8682_v8 }
 0x1a1   :  { %v8714_v1 = vmax.f32 %v1940_v29, %v7048_v33  ;;  %6896 = vmatprep.mubr.msk.f32.mxu1 %vm61_vm1, %v8690_v10  ;;  %10446 = vst [vmem:[#allocation91_spill] sm:$0xff] %v8718_v48  ;;  %v1943_v22 = vmax.f32 %v10447_v49, %v6567_v59  ;;  %v7050_v29 = vld [vmem:[#allocation2 + $0x300] sm:$0xff] }
 0x1a2   :  { %v1807_v21 = vpop.f32.mrf.mxu1 }
 0x1a3   :  { %10445 = vst [vmem:[#allocation90_spill] sm:$0xff] %v8714_v1  ;;  %v1942_v53 = vmax.f32 %v10448_v0, %v1807_v21  ;;  %6732 = vmatprep.mubr.msk.f32.mxu0 %vm61_vm1, %v8714_v1  ;;  %v8732_v59 = vmax.f32 %v1943_v22, %v7051_v41  ;;  %v10452_v0 = vld [vmem:[#allocation24_spill] sm:$0xff]  ;;  %v10456_v41 = vld [vmem:[#allocation25_spill] sm:$0xff] }
 0x1a4   :  { %v6570_v20 = vpop.f32.mrf.mxu1  ;;  %6733 = vmatmul.mubr.msk.f32.gmra.mxu0 %vm61_vm1, %v8718_v48  ;;  %6897 = vmatmul.mubr.msk.f32.gmra.mxu1 %vm61_vm1, %v8694_v16 }
 0x1a5   :  { %v8728_v33 = vmax.f32 %v1942_v53, %v7050_v29  ;;  %6899 = vmatprep.mubr.msk.f32.mxu1 %vm61_vm1, %v8702_v58  ;;  %10450 = vst [vmem:[#allocation22_spill] sm:$0xff] %v8732_v59  ;;  %v1945_v49 = vmax.f32 %v10451_v52, %v6570_v20  ;;  %v7052_v53 = vld [vmem:[#allocation2 + $0x310] sm:$0xff]  ;;  %v7053_v20 = vld [vmem:[#allocation2 + $0x318] sm:$0xff]  ;;  %v10464_v58 = vld [vmem:[#allocation28_spill] sm:$0xff] }
 0x1a6   :  { %v1817_v21 = vpop.f32.mrf.mxu1 }
 0x1a7   :  { %10449 = vst [vmem:[#allocation21_spill] sm:$0xff] %v8728_v33  ;;  %v1944_v61 = vmax.f32 %v10452_v0, %v1817_v21  ;;  %6735 = vmatprep.mubr.msk.f32.mxu0 %vm61_vm1, %v8728_v33  ;;  %v8748_v29 = vmax.f32 %v1945_v49, %v7053_v20 }
 0x1a8   :  { %v6573_v7 = vpop.f32.mrf.mxu1  ;;  %v8738_v56 = vpop.f32.mrf.mxu0  ;;  %6736 = vmatmul.mubr.msk.f32.gmra.mxu0 %vm61_vm1, %v8732_v59  ;;  %6900 = vmatmul.mubr.msk.f32.gmra.mxu1 %vm61_vm1, %v8706_v34 }
 0x1a9   :  { %10453 = vst [vmem:[#allocation23_spill] sm:$0xff] %v8738_v56  ;;  %v8744_v22 = vmax.f32 %v1944_v61, %v7052_v53  ;;  %6902 = vmatprep.mubr.msk.f32.mxu1 %vm61_vm1, %v8714_v1  ;;  %10455 = vst [vmem:[#allocation92_spill] sm:$0xff] %v8748_v29  ;;  %v1947_v52 = vmax.f32 %v10456_v41, %v6573_v7  ;;  %v7054_v61 = vld [vmem:[#allocation2 + $0x320] sm:$0xff]  ;;  %v7055_v7 = vld [vmem:[#allocation2 + $0x328] sm:$0xff]  ;;  %v3831_v56 = vunpack.c.h.bf16 %v8863_v60 }
 0x1aa   :  { %v1827_v21 = vpop.f32.mrf.mxu1  ;;  %v8751_v0 = vpop.f32.mrf.mxu0  ;;  %v10462_v53 = vld [vmem:[#allocation27_spill] sm:$0xff] }
 0x1ab   :  { %10454 = vst [vmem:[#allocation24_spill] sm:$0xff] %v8744_v22  ;;  %10457 = vst [vmem:[#allocation25_spill] sm:$0xff] %v8751_v0  ;;  %v1946_v8 = vmax.f32 %v10458_v17, %v1827_v21  ;;  %6738 = vmatprep.mubr.msk.f32.mxu0 %vm61_vm1, %v8744_v22  ;;  %v8766_v17 = vmax.f32 %v1947_v52, %v7055_v7  ;;  %v7056_v52 = vld [vmem:[#allocation2 + $0x330] sm:$0xff]  ;;  %v3833_v0 = vunpack.c.h.bf16 %v8871_v28 }
 0x1ac   :  { %v6576_v10 = vpop.f32.mrf.mxu1  ;;  %v8756_v16 = vpop.f32.mrf.mxu0  ;;  %6739 = vmatmul.mubr.msk.f32.gmra.mxu0 %vm61_vm1, %v8748_v29  ;;  %6903 = vmatmul.mubr.msk.f32.gmra.mxu1 %vm61_vm1, %v8718_v48 }
 0x1ad   :  { %10459 = vst [vmem:[#allocation26_spill] sm:$0xff] %v8756_v16  ;;  %v8762_v49 = vmax.f32 %v1946_v8, %v7054_v61  ;;  %6905 = vmatprep.mubr.msk.f32.mxu1 %vm61_vm1, %v8728_v33  ;;  %10461 = vst [vmem:[#allocation94_spill] sm:$0xff] %v8766_v17  ;;  %v1949_v20 = vmax.f32 %v10462_v53, %v6576_v10 }
 0x1ae   :  { %v1837_v41 = vpop.f32.mrf.mxu1  ;;  %v8769_v21 = vpop.f32.mrf.mxu0 }
 0x1af   :  { %10460 = vst [vmem:[#allocation93_spill] sm:$0xff] %v8762_v49  ;;  %10463 = vst [vmem:[#allocation27_spill] sm:$0xff] %v8769_v21  ;;  %v1948_v34 = vmax.f32 %v10464_v58, %v1837_v41  ;;  %6741 = vmatprep.mubr.msk.f32.mxu0 %vm61_vm1, %v8762_v49  ;;  %v7057_v58 = vld [vmem:[#allocation2 + $0x338] sm:$0xff] }
 0x1b0   :  { %v8774_v1 = vpop.f32.mrf.mxu0  ;;  %6742 = vmatmul.mubr.msk.f32.gmra.mxu0 %vm61_vm1, %v8766_v17  ;;  %v8778_v8 = vpop.f32.mrf.mxu1  ;;  %6906 = vmatmul.mubr.msk.f32.gmra.mxu1 %vm61_vm1, %v8732_v59  ;;  %v8788_v7 = vmax.f32 %v1949_v20, %v7057_v58 }
 0x1b1   :  { %10465 = vst [vmem:[#allocation28_spill] sm:$0xff] %v8774_v1  ;;  %10466 = vst [vmem:[#allocation95_spill] sm:$0xff] %v8778_v8  ;;  %v8782_v10 = vmax.f32 %v1948_v34, %v7056_v52  ;;  %6908 = vmatprep.mubr.msk.f32.mxu1 %vm61_vm1, %v8744_v22 }
 0x1b2   :  { %10468 = vst [vmem:[#allocation97_spill] sm:$0xff] %v8788_v7  ;;  %v8790_v53 = vpop.f32.mrf.mxu0  ;;  %v8792_v41 = vpop.f32.mrf.mxu1 }
 0x1b3   :  { %10467 = vst [vmem:[#allocation96_spill] sm:$0xff] %v8782_v10  ;;  %10469 = vst [vmem:[#allocation98_spill] sm:$0xff] %v8790_v53  ;;  %6744 = vmatprep.mubr.msk.f32.mxu0 %vm61_vm1, %v8782_v10 }
 0x1b4   :  { %10470 = vst [vmem:[#allocation99_spill] sm:$0xff] %v8792_v41  ;;  %v8796_v33 = vpop.f32.mrf.mxu0  ;;  %6745 = vmatmul.mubr.msk.f32.gmra.mxu0 %vm61_vm1, %v8788_v7  ;;  %v8800_v34 = vpop.f32.mrf.mxu1  ;;  %6909 = vmatmul.mubr.msk.f32.gmra.mxu1 %vm61_vm1, %v8748_v29 }
 0x1b5   :  { %10471 = vst [vmem:[#allocation100_spill] sm:$0xff] %v8796_v33  ;;  %10472 = vst [vmem:[#allocation101_spill] sm:$0xff] %v8800_v34  ;;  %6911 = vmatprep.mubr.msk.f32.mxu1 %vm61_vm1, %v8762_v49  ;;  %4055 = vmatprep.mubr.f32.mxu0 %v3831_v56 }
 0x1b6   :  { %v8808_v52 = vpop.f32.mrf.mxu0  ;;  %v8810_v58 = vpop.f32.mrf.mxu1 }
 0x1b7   :  { %10473 = vst [vmem:[#allocation102_spill] sm:$0xff] %v8808_v52  ;;  %10474 = vst [vmem:[#allocation103_spill] sm:$0xff] %v8810_v58 }
 0x1b8   :  { %v8812_v61 = vpop.f32.mrf.mxu0  ;;  %v8814_v59 = vpop.f32.mrf.mxu1  ;;  %6912 = vmatmul.mubr.msk.f32.gmra.mxu1 %vm61_vm1, %v8766_v17 }
 0x1b9   :  { %10475 = vst [vmem:[#allocation104_spill] sm:$0xff] %v8814_v59  ;;  %6914 = vmatprep.mubr.msk.f32.mxu1 %vm61_vm1, %v8782_v10 }
 0x1ba   :  { %v8822_v20 = vpop.f32.mrf.mxu0  ;;  %v8824_v29 = vpop.f32.mrf.mxu1 }
 0x1bb   :  { %10476 = vst [vmem:[#allocation105_spill] sm:$0xff] %v8824_v29 }
 0x1bc   :  { %v8826_v49 = vpop.f32.mrf.mxu0  ;;  %v8828_v46 = vpop.f32.mrf.mxu1  ;;  %6915 = vmatmul.mubr.msk.f32.gmra.mxu1 %vm61_vm1, %v8788_v7 }
 0x1bd   :  { %10477 = vst [vmem:[#allocation106_spill] sm:$0xff] %v8828_v46  ;;  %4200 = vmatprep.mubr.f32.mxu1 %v3833_v0 }
 0x1be   :  { %v8834_v48 = vpop.f32.mrf.mxu0  ;;  %v8836_v22 = vpop.f32.mrf.mxu1 }
 0x1c0   :  { %v8838_v40 = vpop.f32.mrf.mxu0  ;;  %v8840_v10 = vpop.f32.mrf.mxu1 }
 0x1c2   :  { %v8842_v39 = vpop.f32.mrf.mxu0  ;;  %v8844_v9 = vpop.f32.mrf.mxu1 }
 0x1c4   :  { %v6614_v6 = vpop.f32.mrf.mxu0  ;;  %v8846_v57 = vpop.f32.mrf.mxu1 }
 0x1c6   :  { %v8848_v44 = vpop.f32.mrf.mxu0  ;;  %v8850_v7 = vpop.f32.mrf.mxu1 }
 0x1c8   :  { %v8852_v17 = vpop.f32.mrf.mxu0  ;;  %v8854_v51 = vpop.f32.mrf.mxu1 }
 0x1c9   :  { %10478 = vst [vmem:[#allocation107_spill] sm:$0xff] %v8852_v17  ;;  %v3571_v62 = vmax.f32 %v8838_v40, %v8854_v51 }
 0x1ca   :  { %v8856_v42 = vpop.f32.mrf.mxu0  ;;  %v8858_v36 = vpop.f32.mrf.mxu1 }
 0x1cb   :  { %10479 = vst [vmem:[#allocation108_spill] sm:$0xff] %v8856_v42 }
 0x1cc   :  { %v8865_v54 = vpop.f32.mrf.mxu0  ;;  %v6784_v8 = vpop.f32.mrf.mxu1 }
 0x1cd   :  { %10481 = vst [vmem:[#allocation110_spill] sm:$0xff] %v8865_v54  ;;  %v3573_v29 = vmax.f32 %v6614_v6, %v6784_v8 }
 0x1ce   :  { %v8873_v43 = vpop.f32.mrf.mxu0  ;;  %v3109_v30 = vpop.f32.mrf.mxu1 }
 0x1cf   :  { %10483 = vst [vmem:[#allocation112_spill] sm:$0xff] %v8873_v43  ;;  %v3572_v46 = vmax.f32 %v8848_v44, %v3109_v30 }
 0x1d0   :  { %v8876_v41 = vpop.f32.mrf.mxu0  ;;  %v8878_v5 = vpop.f32.mrf.mxu1 }
 0x1d1   :  { %10484 = vst [vmem:[#allocation113_spill] sm:$0xff] %v8876_v41  ;;  %10485 = vst [vmem:[#allocation114_spill] sm:$0xff] %v8878_v5 }
 0x1d2   :  { %v8880_v42 = vpop.f32.mrf.mxu0  ;;  %v8882_v34 = vpop.f32.mrf.mxu1 }
 0x1d3   :  { %10486 = vst [vmem:[#allocation115_spill] sm:$0xff] %v8880_v42  ;;  %10487 = vst [vmem:[#allocation116_spill] sm:$0xff] %v8882_v34 }
 0x1d4   :  { %v8884_v60 = vpop.f32.mrf.mxu0  ;;  %v8886_v16 = vpop.f32.mrf.mxu1 }
 0x1d5   :  { %10488 = vst [vmem:[#allocation117_spill] sm:$0xff] %v8886_v16 }
 0x1d6   :  { %v8888_v24 = vpop.f32.mrf.mxu0  ;;  %v8890_v47 = vpop.f32.mrf.mxu1 }
 0x1d7   :  { %10489 = vst [vmem:[#allocation118_spill] sm:$0xff] %v8890_v47 }
 0x1d8   :  { %v8892_v56 = vpop.f32.mrf.mxu0  ;;  %v8894_v28 = vpop.f32.mrf.mxu1 }
 0x1d9   :  { %10490 = vst [vmem:[#allocation119_spill] sm:$0xff] %v8894_v28 }
 0x1da   :  { %v8896_v17 = vpop.f32.mrf.mxu0  ;;  %v8898_v5 = vpop.f32.mrf.mxu1 }
 0x1db   :  { %10491 = vst [vmem:[#allocation120_spill] sm:$0xff] %v8898_v5 }
 0x1dc   :  { %v6632_v0 = vpop.f32.mrf.mxu0  ;;  %v8900_v38 = vpop.f32.mrf.mxu1 }
 0x1de   :  { %v8902_v34 = vpop.f32.mrf.mxu0  ;;  %v8904_v21 = vpop.f32.mrf.mxu1 }
 0x1e0   :  { %v6635_v58 = vpop.f32.mrf.mxu0  ;;  %v8906_v13 = vpop.f32.mrf.mxu1 }
 0x1e2   :  { %v2583_v43 = vpop.f32.mrf.mxu0  ;;  %v8908_v47 = vpop.f32.mrf.mxu1 }
 0x1e4   :  { %v6638_v59 = vpop.f32.mrf.mxu0  ;;  %v6802_v1 = vpop.f32.mrf.mxu1 }
 0x1e6   :  { %v2593_v25 = vpop.f32.mrf.mxu0  ;;  %v3169_v55 = vpop.f32.mrf.mxu1 }
 0x1e8   :  { %v8910_v54 = vpop.f32.mrf.mxu0  ;;  %v6805_v16 = vpop.f32.mrf.mxu1 }
 0x1e9   :  { %10492 = vst [vmem:[#allocation121_spill] sm:$0xff] %v8910_v54  ;;  %v3587_v4 = vmax.f32 %v6635_v58, %v6805_v16 }
 0x1ea   :  { %v8912_v63 = vpop.f32.mrf.mxu0  ;;  %v3179_v53 = vpop.f32.mrf.mxu1 }
 0x1eb   :  { %10493 = vst [vmem:[#allocation122_spill] sm:$0xff] %v8912_v63  ;;  %v3677_v63 = vmax.f32 %v3573_v29, %v8189_v35  ;;  %v3586_v8 = vmax.f32 %v2583_v43, %v3179_v53  ;;  %v3585_v35 = vmax.f32 %v6632_v0, %v6802_v1  ;;  %v3691_v51 = vmax.f32 %v3587_v4, %v8287_v27  ;;  %v10505_v53 = vld [vmem:[#allocation113_spill] sm:$0xff] }
 0x1ec   :  { %v8914_v18 = vpop.f32.mrf.mxu0  ;;  %v6808_v42 = vpop.f32.mrf.mxu1  ;;  %v3675_v43 = vmax.f32 %v3571_v62, %v8175_v23  ;;  %v3568_v4 = vmax.f32 %v8834_v48, %v8850_v7  ;;  %v3583_v23 = vmax.f32 %v8892_v56, %v8906_v13  ;;  %v10504_v7 = vld [vmem:[#allocation119_spill] sm:$0xff] }
 0x1ed   :  { %10494 = vst [vmem:[#allocation123_spill] sm:$0xff] %v8914_v18  ;;  %v3589_v5 = vmax.f32 %v6638_v59, %v6808_v42  ;;  %v3581_v59 = vmax.f32 %v8884_v60, %v8900_v38  ;;  %v10502_v60 = vld [vmem:[#allocation102_spill] sm:$0xff] }
 0x1ee   :  { %v8917_v33 = vpop.f32.mrf.mxu0  ;;  %v3189_v3 = vpop.f32.mrf.mxu1  ;;  %v3672_v1 = vmax.f32 %v3568_v4, %v8156_v2  ;;  %v3580_v2 = vmax.f32 %v8888_v24, %v8904_v21  ;;  %v3564_v38 = vmax.f32 %v10502_v60, %v8836_v22  ;;  %v10506_v24 = vld [vmem:[#allocation45_spill] sm:$0xff]  ;;  %v10525_v60 = vld [vmem:[#allocation112_spill] sm:$0xff] }
 0x1ef   :  { %10495 = vst [vmem:[#allocation124_spill] sm:$0xff] %v8917_v33  ;;  %v3693_v41 = vmax.f32 %v3589_v5, %v8301_v31  ;;  %v3588_v28 = vmax.f32 %v2593_v25, %v3189_v3  ;;  %v3570_v5 = vmax.f32 %v8842_v39, %v8858_v36  ;;  %v3676_v25 = vmax.f32 %v3572_v46, %v8184_v12 }
 0x1f0   :  { %v8923_v52 = vpop.f32.mrf.mxu0  ;;  %v8925_v6 = vpop.f32.mrf.mxu1  ;;  %v3584_v12 = vmax.f32 %v8902_v34, %v3169_v55  ;;  %v3690_v39 = vmax.f32 %v3586_v8, %v8282_v45  ;;  %v3689_v55 = vmax.f32 %v3585_v35, %v8273_v19  ;;  %v3567_v45 = vmax.f32 %v8812_v61, %v8840_v10  ;;  %v10508_v34 = vld [vmem:[#allocation100_spill] sm:$0xff] }
 0x1f1   :  { %10496 = vst [vmem:[#allocation125_spill] sm:$0xff] %v8923_v52  ;;  %10497 = vst [vmem:[#allocation126_spill] sm:$0xff] %v8925_v6  ;;  %v3692_v42 = vmax.f32 %v3588_v28, %v8296_v50  ;;  %5973 = vmatprep.subr.mxu0 %v3693_v41  ;;  %v3569_v28 = vmax.f32 %v8826_v49, %v8846_v57  ;;  %v3674_v27 = vmax.f32 %v3570_v5, %v8170_v32  ;;  %v10511_v8 = vld [vmem:[#allocation120_spill] sm:$0xff] }
 0x1f2   :  { %v8933_v3 = vpop.f32.mrf.mxu0  ;;  %v8935_v31 = vpop.f32.mrf.mxu1  ;;  %5974 = vmatpush3.msra.mxu0 %v3677_v63  ;;  %v3582_v32 = vmax.f32 %v8896_v17, %v8908_v47  ;;  %v3688_v16 = vmax.f32 %v3584_v12, %v8268_v37  ;;  %v3566_v19 = vmax.f32 %v8822_v20, %v8844_v9  ;;  %v3687_v47 = vmax.f32 %v3583_v23, %v8259_v14  ;;  %v10503_v14 = vld [vmem:[#allocation37_spill] sm:$0xff]  ;;  %v10509_v20 = vld [vmem:[#allocation106_spill] sm:$0xff]  ;;  %v10516_v12 = vld [vmem:[#allocation35_spill] sm:$0xff] }
 0x1f3   :  { %10498 = vst [vmem:[#allocation127_spill] sm:$0xff] %v8935_v31  ;;  %5975 = vmatprep.subr.mxu0 %v3692_v42  ;;  %v3673_v57 = vmax.f32 %v3569_v28, %v8161_v15  ;;  %v3671_v37 = vmax.f32 %v3567_v45, %v8147_v11  ;;  %v3579_v41 = vmax.f32 %v10505_v53, %v10504_v7  ;;  %v10512_v42 = vld [vmem:[#allocation115_spill] sm:$0xff]  ;;  %v10515_v28 = vld [vmem:[#allocation98_spill] sm:$0xff]  ;;  %v10517_v23 = vld [vmem:[#allocation117_spill] sm:$0xff] }
 0x1f4   :  { %v8941_v50 = vpop.f32.mrf.mxu0  ;;  %v8943_v44 = vpop.f32.mrf.mxu1  ;;  %5976 = vmatpush3.msra.mxu0 %v3676_v25  ;;  %v3686_v9 = vmax.f32 %v3582_v32, %v8254_v26  ;;  %v3670_v10 = vmax.f32 %v3566_v19, %v10503_v14  ;;  %v3685_v21 = vmax.f32 %v3581_v59, %v10506_v24  ;;  %v10507_v26 = vld [vmem:[#allocation36_spill] sm:$0xff]  ;;  %v10510_v58 = vmax.f32 %v10508_v34, %v10509_v20  ;;  %v10526_v14 = vld [vmem:[#allocation42_spill] sm:$0xff]  ;;  %v10527_v7 = vld [vmem:[#allocation103_spill] sm:$0xff] }
 0x1f5   :  { %10499 = vst [vmem:[#allocation128_spill] sm:$0xff] %v8943_v44  ;;  %5977 = vmatprep.subr.mxu0 %v3691_v51  ;;  %v3578_v5 = vmax.f32 %v10512_v42, %v10511_v8  ;;  %v10513_v25 = vld [vmem:[#allocation44_spill] sm:$0xff]  ;;  %v10514_v51 = vld [vmem:[#allocation105_spill] sm:$0xff]  ;;  %v10528_v53 = vld [vmem:[#allocation27_spill] sm:$0xff] }
 0x1f6   :  { %v8952_v40 = vpop.f32.mrf.mxu0  ;;  %v8954_v62 = vpop.f32.mrf.mxu1  ;;  %5978 = vmatpush3.msra.mxu0 %v3675_v43  ;;  %v3669_v56 = vmax.f32 %v10510_v58, %v10507_v26  ;;  %v3684_v35 = vmax.f32 %v3580_v2, %v10513_v25  ;;  %v3562_v43 = vmax.f32 %v10515_v28, %v10514_v51  ;;  %v10521_v19 = vld [vmem:[#allocation28_spill] sm:$0xff]  ;;  %v10529_v24 = vld [vmem:[#allocation33_spill] sm:$0xff]  ;;  %v10530_v20 = vld [vmem:[#allocation114_spill] sm:$0xff] }
 0x1f7   :  { %10500 = vst [vmem:[#allocation129_spill] sm:$0xff] %v8954_v62  ;;  %5979 = vmatprep.subr.mxu0 %v3690_v39  ;;  %v3668_v39 = vmax.f32 %v3564_v38, %v10516_v12  ;;  %v10531_v58 = vld [vmem:[#allocation107_spill] sm:$0xff]  ;;  %v10532_v8 = vld [vmem:[#allocation41_spill] sm:$0xff]  ;;  %v10533_v25 = vld [vmem:[#allocation32_spill] sm:$0xff] }
 0x1f8   :  { %v8962_v36 = vpop.f32.mrf.mxu0  ;;  %v8964_v46 = vpop.f32.mrf.mxu1  ;;  %5980 = vmatpush3.msra.mxu0 %v3674_v27 }
 0x1f9   :  { %10501 = vst [vmem:[#allocation130_spill] sm:$0xff] %v8964_v46  ;;  %5981 = vmatprep.subr.mxu0 %v3689_v55  ;;  %v10518_v55 = vld [vmem:[#allocation110_spill] sm:$0xff]  ;;  %v10562_v46 = vld [vmem:[#allocation19_spill] sm:$0xff] }
 0x1fa   :  { %v8974_v15 = vpop.f32.mrf.mxu0  ;;  %v8976_v48 = vpop.f32.mrf.mxu1  ;;  %5982 = vmatpush3.msra.mxu0 %v3673_v57  ;;  %v3577_v45 = vmax.f32 %v10518_v55, %v10517_v23  ;;  %v10519_v57 = vld [vmem:[#allocation43_spill] sm:$0xff]  ;;  %v10539_v23 = vld [vmem:[#allocation108_spill] sm:$0xff] }
 0x1fb   :  { %5983 = vmatprep.subr.mxu0 %v3688_v16  ;;  %v3683_v32 = vmax.f32 %v3579_v41, %v10519_v57  ;;  %v10520_v16 = vld [vmem:[#allocation34_spill] sm:$0xff]  ;;  %v3560_v41 = vmax.f32 %v10528_v53, %v10527_v7  ;;  %v10540_v57 = vld [vmem:[#allocation40_spill] sm:$0xff]  ;;  %v10548_v53 = vld [vmem:[#allocation95_spill] sm:$0xff] }
 0x1fc   :  { %v8982_v29 = vpop.f32.mrf.mxu0  ;;  %v8984_v49 = vpop.f32.mrf.mxu1  ;;  %5984 = vmatpush3.msra.mxu0 %v3672_v1  ;;  %v10522_v1 = vld [vmem:[#allocation104_spill] sm:$0xff]  ;;  %v3681_v42 = vmax.f32 %v3577_v45, %v10532_v8  ;;  %v10546_v7 = vld [vmem:[#allocation30_spill] sm:$0xff] }
 0x1fd   :  { %5985 = vmatprep.subr.mxu0 %v3687_v47  ;;  %v10523_v59 = vmax.f32 %v10521_v19, %v10522_v1  ;;  %v10542_v19 = vld [vmem:[#allocation25_spill] sm:$0xff]  ;;  %v10543_v1 = vld [vmem:[#allocation31_spill] sm:$0xff] }
 0x1fe   :  { %v8994_v11 = vpop.f32.mrf.mxu0  ;;  %v8996_v61 = vpop.f32.mrf.mxu1  ;;  %5986 = vmatpush3.msra.mxu0 %v3671_v37 }
 0x1ff   :  { %5987 = vmatprep.subr.mxu0 %v3686_v9  ;;  %v3667_v47 = vmax.f32 %v10523_v59, %v10520_v16  ;;  %v10524_v9 = vld [vmem:[#allocation118_spill] sm:$0xff]  ;;  %v10541_v16 = vld [vmem:[#allocation99_spill] sm:$0xff]  ;;  %v3664_v59 = vmax.f32 %v3560_v41, %v10543_v1 }
 0x200   :  { %v9005_v0 = vpop.f32.mrf.mxu0  ;;  %v9007_v22 = vpop.f32.mrf.mxu1  ;;  %5988 = vmatpush3.msra.mxu0 %v3670_v10  ;;  %v3576_v38 = vmax.f32 %v10525_v60, %v10524_v9  ;;  %v3682_v10 = vmax.f32 %v3578_v5, %v10526_v14  ;;  %v10535_v5 = vld [vmem:[#allocation101_spill] sm:$0xff]  ;;  %v3558_v45 = vmax.f32 %v10542_v19, %v10541_v16  ;;  %v10545_v60 = vld [vmem:[#allocation39_spill] sm:$0xff] }
 0x201   :  { %5989 = vmatprep.subr.mxu0 %v3685_v21  ;;  %v3666_v21 = vmax.f32 %v3562_v43, %v10529_v24  ;;  %v10538_v43 = vld [vmem:[#allocation116_spill] sm:$0xff] }
 0x202   :  { %v9015_v4 = vpop.f32.mrf.mxu0  ;;  %v9017_v27 = vpop.f32.mrf.mxu1  ;;  %5990 = vmatpush3.msra.mxu0 %v3669_v56  ;;  %v3575_v56 = vmax.f32 %v10531_v58, %v10530_v20  ;;  %v3574_v55 = vmax.f32 %v10539_v23, %v10538_v43  ;;  %v10551_v58 = vld [vmem:[#allocation38_spill] sm:$0xff] }
 0x203   :  { %5991 = vmatprep.subr.mxu0 %v3684_v35  ;;  %v10534_v35 = vld [vmem:[#allocation26_spill] sm:$0xff] }
 0x204   :  { %v9026_v37 = vpop.f32.mrf.mxu0  ;;  %v9028_v2 = vpop.f32.mrf.mxu1  ;;  %5992 = vmatpush3.msra.mxu0 %v3668_v39  ;;  %v10536_v51 = vmax.f32 %v10534_v35, %v10535_v5  ;;  %v3679_v14 = vmax.f32 %v3575_v56, %v10545_v60  ;;  %v3678_v8 = vmax.f32 %v3574_v55, %v10551_v58  ;;  %v3774_v43 = vld [vmem:[%s10184_s5 + $0x38] sm:$0xff] }
 0x205   :  { %5993 = vmatprep.subr.mxu0 %v3683_v32  ;;  %v3680_v32 = vmax.f32 %v3576_v38, %v10540_v57  ;;  %v10547_v38 = vld [vmem:[#allocation23_spill] sm:$0xff]  ;;  %v3845_v19 = vunpack.c.h.bf16 %v3774_v43  ;;  %v3844_v60 = vunpack.c.l.bf16 %v3774_v43 }
 0x206   :  { %v9036_v26 = vpop.f32.mrf.mxu0  ;;  %v9038_v34 = vpop.f32.mrf.mxu1  ;;  %5994 = vmatpush3.msra.mxu0 %v3667_v47  ;;  %v3665_v28 = vmax.f32 %v10536_v51, %v10533_v25  ;;  %v10549_v24 = vmax.f32 %v10547_v38, %v10548_v53  ;;  %v10553_v25 = vld [vmem:[#allocation29_spill] sm:$0xff] }
 0x207   :  { %5995 = vmatprep.subr.mxu0 %v3682_v10  ;;  %v3770_v10 = vld [vmem:[%s10184_s5 + $0x1c] sm:$0xff]  ;;  %v3662_v35 = vmax.f32 %v3558_v45, %v10553_v25  ;;  %v3778_v45 = vld [vmem:[%s10184_s5 + $0x54] sm:$0xff] }
 0x208   :  { %v9047_v12 = vpop.f32.mrf.mxu0  ;;  %v9049_v39 = vpop.f32.mrf.mxu1  ;;  %5996 = vmatpush3.msra.mxu0 %v3666_v21  ;;  %v3663_v21 = vmax.f32 %v10549_v24, %v10546_v7  ;;  %v3837_v55 = vunpack.c.l.bf16 %v3770_v10  ;;  %v3782_v38 = vld [vmem:[%s10184_s5 + $0x70] sm:$0xff] }
 0x209   :  { %10537 = vst [vmem:[#allocation102_spill] sm:$0xff] %v9047_v12  ;;  %5997 = vmatprep.subr.mxu0 %v3681_v42  ;;  %v10552_v42 = vld [vmem:[#allocation109_spill] sm:$0xff] }
 0x20a   :  { %v9057_v47 = vpop.f32.mrf.mxu0  ;;  %v9059_v9 = vpop.f32.mrf.mxu1  ;;  %5998 = vmatpush3.msra.mxu0 %v3665_v28  ;;  %v3830_v56 = vunpack.c.l.bf16 %v10552_v42  ;;  %v3838_v28 = vunpack.c.h.bf16 %v3770_v10  ;;  %v3852_v10 = vunpack.c.h.bf16 %v3778_v45  ;;  %v3859_v42 = vunpack.c.h.bf16 %v3782_v38 }
 0x20b   :  { %10544 = vst [vmem:[#allocation37_spill] sm:$0xff] %v9057_v47  ;;  %5999 = vmatprep.subr.mxu0 %v3680_v32 }
 0x20c   :  { %v9069_v20 = vpop.f32.mrf.mxu0  ;;  %v9071_v41 = vpop.f32.mrf.mxu1  ;;  %6000 = vmatpush3.msra.mxu0 %v3664_v59 }
 0x20d   :  { %10550 = vst [vmem:[#allocation119_spill] sm:$0xff] %v9069_v20  ;;  %6001 = vmatprep.subr.mxu0 %v3679_v14 }
 0x20e   :  { %v9076_v5 = vpop.f32.mrf.mxu0  ;;  %v9078_v51 = vpop.f32.mrf.mxu1  ;;  %6002 = vmatpush3.msra.mxu0 %v3663_v21  ;;  %v3851_v21 = vunpack.c.l.bf16 %v3778_v45  ;;  %v3790_v45 = vld [vmem:[%s10184_s5 + $0xa8] sm:$0xff] }
 0x20f   :  { %10554 = vst [vmem:[#allocation113_spill] sm:$0xff] %v9076_v5  ;;  %6003 = vmatprep.subr.mxu0 %v3678_v8  ;;  %v3872_v6 = vunpack.c.l.bf16 %v3790_v45 }
 0x210   :  { %v9083_v23 = vpop.f32.mrf.mxu0  ;;  %v9085_v57 = vpop.f32.mrf.mxu1  ;;  %6004 = vmatpush3.msra.mxu0 %v3662_v35 }
 0x211   :  { %10555 = vst [vmem:[#allocation45_spill] sm:$0xff] %v9085_v57  ;;  %4056 = vmatmul.mubr.f32.vlgmr.msra.gmra.mxu0 %v3830_v56  ;;  %v3786_v56 = vld [vmem:[%s10184_s5 + $0x8c] sm:$0xff] }
 0x212   :  { %v9087_v32 = vpop.f32.mrf.mxu0  ;;  %v9089_v16 = vpop.f32.mrf.mxu1  ;;  %4060 = vmatprep.mubr.f32.mxu0 %v3838_v28  ;;  %v3858_v28 = vunpack.c.l.bf16 %v3782_v38  ;;  %v3865_v30 = vunpack.c.l.bf16 %v3786_v56  ;;  %v3873_v38 = vunpack.c.h.bf16 %v3790_v45  ;;  %v3802_v45 = vld [vmem:[%s10184_s5 + $0xfc] sm:$0xff] }
 0x213   :  { %10556 = vst [vmem:[#allocation36_spill] sm:$0xff] %v9089_v16  ;;  %v3894_v5 = vunpack.c.h.bf16 %v3802_v45 }
 0x214   :  { %v9094_v1 = vpop.f32.mrf.mxu0  ;;  %v9096_v59 = vpop.f32.mrf.mxu1 }
 0x215   :  { %4061 = vmatmul.mubr.f32.gmra.mxu0 %v3837_v55 }
 0x216   :  { %v9098_v14 = vpop.f32.mrf.mxu0  ;;  %v9100_v7 = vpop.f32.mrf.mxu1  ;;  %4065 = vmatprep.mubr.f32.mxu0 %v3845_v19  ;;  %v3866_v19 = vunpack.c.h.bf16 %v3786_v56 }
 0x217   :  { %10557 = vst [vmem:[#allocation100_spill] sm:$0xff] %v9100_v7 }
 0x218   :  { %v9105_v53 = vpop.f32.mrf.mxu0  ;;  %v9107_v24 = vpop.f32.mrf.mxu1 }
 0x219   :  { %4066 = vmatmul.mubr.f32.gmra.mxu0 %v3844_v60 }
 0x21a   :  { %v9109_v58 = vpop.f32.mrf.mxu0  ;;  %v9111_v8 = vpop.f32.mrf.mxu1  ;;  %4070 = vmatprep.mubr.f32.mxu0 %v3852_v10 }
 0x21c   :  { %v9116_v25 = vpop.f32.mrf.mxu0  ;;  %v9118_v35 = vpop.f32.mrf.mxu1 }
 0x21d   :  { %4071 = vmatmul.mubr.f32.gmra.mxu0 %v3851_v21  ;;  %v3794_v21 = vld [vmem:[%s10184_s5 + $0xc4] sm:$0xff] }
 0x21e   :  { %v9120_v43 = vpop.f32.mrf.mxu0  ;;  %v9122_v55 = vpop.f32.mrf.mxu1  ;;  %4075 = vmatprep.mubr.f32.mxu0 %v3859_v42  ;;  %v3880_v56 = vunpack.c.h.bf16 %v3794_v21  ;;  %v3879_v16 = vunpack.c.l.bf16 %v3794_v21 }
 0x220   :  { %v6683_v60 = vpop.f32.mrf.mxu0  ;;  %v9127_v10 = vpop.f32.mrf.mxu1 }
 0x221   :  { %4076 = vmatmul.mubr.f32.gmra.mxu0 %v3858_v28  ;;  %v3798_v28 = vld [vmem:[%s10184_s5 + $0xe0] sm:$0xff] }
 0x222   :  { %v9129_v63 = vpop.f32.mrf.mxu0  ;;  %v9131_v13 = vpop.f32.mrf.mxu1  ;;  %4080 = vmatprep.mubr.f32.mxu0 %v3866_v19  ;;  %v3886_v62 = vunpack.c.l.bf16 %v3798_v28 }
 0x224   :  { %v6686_v42 = vpop.f32.mrf.mxu0  ;;  %v9136_v17 = vpop.f32.mrf.mxu1 }
 0x225   :  { %4081 = vmatmul.mubr.f32.gmra.mxu0 %v3865_v30  ;;  %v3887_v30 = vunpack.c.h.bf16 %v3798_v28  ;;  %v10565_v28 = vld [vmem:[#allocation18_spill] sm:$0xff] }
 0x226   :  { %v2753_v54 = vpop.f32.mrf.mxu0  ;;  %v9138_v31 = vpop.f32.mrf.mxu1  ;;  %4085 = vmatprep.mubr.f32.mxu0 %v3873_v38  ;;  %v3605_v38 = vmax.f32 %v9026_v37, %v9071_v41  ;;  %v3806_v37 = vld [vmem:[%s10184_s5 + $0x118] sm:$0xff]  ;;  %v3603_v41 = vmax.f32 %v9005_v0, %v9049_v39  ;;  %v10566_v0 = vld [vmem:[#allocation60_spill] sm:$0xff] }
 0x228   :  { %v9143_v19 = vpop.f32.mrf.mxu0  ;;  %v6853_v47 = vpop.f32.mrf.mxu1 }
 0x229   :  { %10558 = vst [vmem:[#allocation106_spill] sm:$0xff] %v9143_v19  ;;  %4086 = vmatmul.mubr.f32.gmra.mxu0 %v3872_v6  ;;  %v3604_v6 = vmax.f32 %v9036_v26, %v9078_v51  ;;  %v3619_v7 = vmax.f32 %v6683_v60, %v6853_v47 }
 0x22a   :  { %v9145_v44 = vpop.f32.mrf.mxu0  ;;  %v3339_v18 = vpop.f32.mrf.mxu1  ;;  %4090 = vmatprep.mubr.f32.mxu0 %v3880_v56 }
 0x22b   :  { %10559 = vst [vmem:[#allocation120_spill] sm:$0xff] %v9145_v44  ;;  %v3618_v51 = vmax.f32 %v9129_v63, %v3339_v18  ;;  %v3708_v39 = vmax.f32 %v3604_v6, %v10566_v0  ;;  %v3901_v18 = vunpack.c.h.bf16 %v3806_v37  ;;  %v3617_v63 = vmax.f32 %v9116_v25, %v9136_v17 }
 0x22c   :  { %v9152_v12 = vpop.f32.mrf.mxu0  ;;  %v6856_v57 = vpop.f32.mrf.mxu1  ;;  %v3616_v17 = vmax.f32 %v9120_v43, %v9138_v31  ;;  %v3615_v43 = vmax.f32 %v9105_v53, %v9127_v10  ;;  %v3614_v53 = vmax.f32 %v9109_v58, %v9131_v13  ;;  %v10577_v10 = vld [vmem:[#allocation14_spill] sm:$0xff]  ;;  %v3613_v58 = vmax.f32 %v9094_v1, %v9118_v35  ;;  %v10582_v35 = vld [vmem:[#allocation12_spill] sm:$0xff] }
 0x22d   :  { %10560 = vst [vmem:[#allocation115_spill] sm:$0xff] %v9152_v12  ;;  %v3621_v33 = vmax.f32 %v6686_v42, %v6856_v57  ;;  %4091 = vmatmul.mubr.f32.gmra.mxu0 %v3879_v16  ;;  %v10563_v57 = vld [vmem:[#allocation3_spill] sm:$0xff]  ;;  %v3612_v1 = vmax.f32 %v9098_v14, %v9122_v55  ;;  %v3611_v55 = vmax.f32 %v9083_v23, %v9107_v24  ;;  %v10587_v24 = vld [vmem:[#allocation10_spill] sm:$0xff] }
 0x22e   :  { %v9156_v21 = vpop.f32.mrf.mxu0  ;;  %v3349_v56 = vpop.f32.mrf.mxu1  ;;  %4095 = vmatprep.mubr.f32.mxu0 %v3887_v30  ;;  %v3709_v16 = vmax.f32 %v3605_v38, %v10563_v57  ;;  %v3900_v57 = vunpack.c.l.bf16 %v3806_v37  ;;  %v3610_v23 = vmax.f32 %v9087_v32, %v9111_v8  ;;  %v10590_v8 = vld [vmem:[#allocation9_spill] sm:$0xff] }
 0x22f   :  { %10561 = vst [vmem:[#allocation44_spill] sm:$0xff] %v9156_v21  ;;  %v3725_v52 = vmax.f32 %v3621_v33, %v10562_v46  ;;  %v3620_v20 = vmax.f32 %v2753_v54, %v3349_v56  ;;  %v3893_v33 = vunpack.c.l.bf16 %v3802_v45  ;;  %v3602_v46 = vmax.f32 %v9015_v4, %v9059_v9  ;;  %v10570_v9 = vld [vmem:[#allocation59_spill] sm:$0xff] }
 0x230   :  { %v9165_v42 = vpop.f32.mrf.mxu0  ;;  %v9167_v26 = vpop.f32.mrf.mxu1  ;;  %v3601_v4 = vmax.f32 %v8982_v29, %v9028_v2  ;;  %v3707_v45 = vmax.f32 %v3603_v41, %v10570_v9  ;;  %v3600_v29 = vmax.f32 %v8994_v11, %v9038_v34  ;;  %v10573_v2 = vld [vmem:[#allocation58_spill] sm:$0xff]  ;;  %v3814_v11 = vld [vmem:[%s10184_s5 + $0x150] sm:$0xff]  ;;  %v3599_v34 = vmax.f32 %v8962_v36, %v9007_v22  ;;  %v10578_v22 = vld [vmem:[#allocation56_spill] sm:$0xff] }
 0x231   :  { %10564 = vst [vmem:[#allocation105_spill] sm:$0xff] %v9167_v26  ;;  %v3724_v47 = vmax.f32 %v3620_v20, %v10565_v28  ;;  %6053 = vmatprep.subr.mxu1 %v3725_v52  ;;  %4096 = vmatmul.mubr.f32.gmra.mxu0 %v3886_v62  ;;  %v10569_v20 = vld [vmem:[#allocation17_spill] sm:$0xff]  ;;  %v3706_v41 = vmax.f32 %v3602_v46, %v10573_v2  ;;  %v3915_v13 = vunpack.c.h.bf16 %v3814_v11 }
 0x232   :  { %v9176_v60 = vpop.f32.mrf.mxu0  ;;  %v9178_v30 = vpop.f32.mrf.mxu1  ;;  %6054 = vmatpush3.msra.mxu1 %v3709_v16  ;;  %4100 = vmatprep.mubr.f32.mxu0 %v3894_v5  ;;  %v3723_v38 = vmax.f32 %v3619_v7, %v10569_v20  ;;  %v3810_v62 = vld [vmem:[%s10184_s5 + $0x134] sm:$0xff]  ;;  %v10572_v7 = vld [vmem:[#allocation16_spill] sm:$0xff]  ;;  %v3598_v36 = vmax.f32 %v8974_v15, %v9017_v27  ;;  %v10581_v27 = vld [vmem:[#allocation55_spill] sm:$0xff] }
 0x233   :  { %10567 = vst [vmem:[#allocation98_spill] sm:$0xff] %v9176_v60  ;;  %10568 = vst [vmem:[#allocation35_spill] sm:$0xff] %v9178_v30  ;;  %6055 = vmatprep.subr.mxu1 %v3724_v47  ;;  %v3722_v25 = vmax.f32 %v3618_v51, %v10572_v7  ;;  %v3908_v31 = vunpack.c.h.bf16 %v3810_v62  ;;  %v10575_v51 = vld [vmem:[#allocation15_spill] sm:$0xff]  ;;  %v3907_v20 = vunpack.c.l.bf16 %v3810_v62  ;;  %v3818_v15 = vld [vmem:[%s10184_s5 + $0x16c] sm:$0xff]  ;;  %v3703_v7 = vmax.f32 %v3599_v34, %v10581_v27 }
 0x234   :  { %v9191_v5 = vpop.f32.mrf.mxu0  ;;  %v9193_v6 = vpop.f32.mrf.mxu1  ;;  %6056 = vmatpush3.msra.mxu1 %v3708_v39  ;;  %v3721_v47 = vmax.f32 %v3617_v63, %v10575_v51  ;;  %v3922_v14 = vunpack.c.h.bf16 %v3818_v15  ;;  %v3715_v27 = vmax.f32 %v3611_v55, %v10590_v8 }
 0x235   :  { %10571 = vst [vmem:[#allocation117_spill] sm:$0xff] %v9193_v6  ;;  %6057 = vmatprep.subr.mxu1 %v3723_v38  ;;  %4101 = vmatmul.mubr.f32.gmra.mxu0 %v3893_v33  ;;  %v10576_v33 = vld [vmem:[#allocation57_spill] sm:$0xff]  ;;  %v3704_v38 = vmax.f32 %v3600_v29, %v10578_v22  ;;  %v3718_v29 = vmax.f32 %v3614_v53, %v10582_v35  ;;  %v3921_v22 = vunpack.c.l.bf16 %v3818_v15  ;;  %v3826_v15 = vld [vmem:[%s10184_s5 + $0x1a4] sm:$0xff] }
 0x236   :  { %v9203_v16 = vpop.f32.mrf.mxu0  ;;  %v9205_v28 = vpop.f32.mrf.mxu1  ;;  %6058 = vmatpush3.msra.mxu1 %v3707_v45  ;;  %4105 = vmatprep.mubr.f32.mxu0 %v3901_v18  ;;  %v3705_v46 = vmax.f32 %v3601_v4, %v10576_v33  ;;  %v3720_v18 = vmax.f32 %v3616_v17, %v10577_v10  ;;  %v10580_v45 = vld [vmem:[#allocation13_spill] sm:$0xff]  ;;  %v10584_v33 = vld [vmem:[#allocation11_spill] sm:$0xff]  ;;  %v10586_v53 = vmax.f32 %v8941_v50, %v8984_v49 }
 0x237   :  { %10574 = vst [vmem:[#allocation110_spill] sm:$0xff] %v9205_v28  ;;  %6059 = vmatprep.subr.mxu1 %v3722_v25  ;;  %v3719_v17 = vmax.f32 %v3615_v43, %v10580_v45  ;;  %v10583_v43 = vld [vmem:[#allocation54_spill] sm:$0xff] }
 0x238   :  { %v9218_v0 = vpop.f32.mrf.mxu0  ;;  %v9220_v39 = vpop.f32.mrf.mxu1  ;;  %6060 = vmatpush3.msra.mxu1 %v3706_v41  ;;  %v3914_v41 = vunpack.c.l.bf16 %v3814_v11  ;;  %v3702_v51 = vmax.f32 %v3598_v36, %v10583_v43  ;;  %v3716_v36 = vmax.f32 %v3612_v1, %v10587_v24  ;;  %v10596_v43 = vld [vmem:[#allocation113_spill] sm:$0xff] }
 0x239   :  { %6061 = vmatprep.subr.mxu1 %v3721_v47  ;;  %4106 = vmatmul.mubr.f32.gmra.mxu0 %v3900_v57 }
 0x23a   :  { %v9230_v4 = vpop.f32.mrf.mxu0  ;;  %v9232_v9 = vpop.f32.mrf.mxu1  ;;  %6062 = vmatpush3.msra.mxu1 %v3705_v46  ;;  %4110 = vmatprep.mubr.f32.mxu0 %v3908_v31  ;;  %v3596_v31 = vmax.f32 %v8952_v40, %v8996_v61  ;;  %v3717_v46 = vmax.f32 %v3613_v58, %v10584_v33  ;;  %v3822_v40 = vld [vmem:[%s10184_s5 + $0x188] sm:$0xff]  ;;  %v10585_v61 = vld [vmem:[#allocation53_spill] sm:$0xff] }
 0x23b   :  { %10579 = vst [vmem:[#allocation43_spill] sm:$0xff] %v9232_v9  ;;  %6063 = vmatprep.subr.mxu1 %v3720_v18  ;;  %v3701_v10 = vmax.f32 %v10586_v53, %v10585_v61  ;;  %v3929_v45 = vunpack.c.h.bf16 %v3822_v40  ;;  %v3928_v55 = vunpack.c.l.bf16 %v3822_v40  ;;  %v10598_v33 = vld [vmem:[#allocation129_spill] sm:$0xff]  ;;  %v10600_v53 = vld [vmem:[#allocation50_spill] sm:$0xff]  ;;  %v10630_v9 = vld [vmem:[#allocation91_spill] sm:$0xff] }
 0x23c   :  { %v9243_v25 = vpop.f32.mrf.mxu0  ;;  %v9245_v57 = vpop.f32.mrf.mxu1  ;;  %6064 = vmatpush3.msra.mxu1 %v3704_v38  ;;  %v3594_v38 = vmax.f32 %v8933_v3, %v8976_v48  ;;  %v10591_v3 = vld [vmem:[#allocation51_spill] sm:$0xff]  ;;  %v10592_v48 = vld [vmem:[#allocation125_spill] sm:$0xff] }
 0x23d   :  { %6065 = vmatprep.subr.mxu1 %v3719_v17  ;;  %4111 = vmatmul.mubr.f32.gmra.mxu0 %v3907_v20  ;;  %v10589_v17 = vld [vmem:[#allocation119_spill] sm:$0xff]  ;;  %v9315_v40 = vld [vmem:[%s10184_s5 + $0x10] sm:$0xff] }
 0x23e   :  { %v9255_v47 = vpop.f32.mrf.mxu0  ;;  %v9257_v34 = vpop.f32.mrf.mxu1  ;;  %6066 = vmatpush3.msra.mxu1 %v3703_v7  ;;  %4115 = vmatprep.mubr.f32.mxu0 %v3915_v13  ;;  %v10588_v13 = vld [vmem:[#allocation52_spill] sm:$0xff]  ;;  %v3609_v32 = vmax.f32 %v10589_v17, %v9096_v59  ;;  %v10593_v7 = vld [vmem:[#allocation130_spill] sm:$0xff]  ;;  %10604 = vst [vmem:[#allocation34_spill] sm:$0xff] %v9315_v40 }
 0x23f   :  { %6067 = vmatprep.subr.mxu1 %v3718_v29  ;;  %v3700_v58 = vmax.f32 %v3596_v31, %v10588_v13  ;;  %v10594_v1 = vmax.f32 %v10592_v48, %v10593_v7  ;;  %v10595_v31 = vld [vmem:[#allocation100_spill] sm:$0xff]  ;;  %v3936_v13 = vunpack.c.h.bf16 %v3826_v15  ;;  %v10602_v17 = vld [vmem:[#allocation102_spill] sm:$0xff] }
 0x240   :  { %v9271_v18 = vpop.f32.mrf.mxu0  ;;  %v9273_v20 = vpop.f32.mrf.mxu1  ;;  %6068 = vmatpush3.msra.mxu1 %v3702_v51  ;;  %v3608_v59 = vmax.f32 %v10596_v43, %v10595_v31  ;;  %v10597_v51 = vld [vmem:[#allocation8_spill] sm:$0xff]  ;;  %v10611_v31 = vld [vmem:[#allocation37_spill] sm:$0xff] }
 0x241   :  { %6069 = vmatprep.subr.mxu1 %v3717_v46  ;;  %4116 = vmatmul.mubr.f32.gmra.mxu0 %v3914_v41  ;;  %v3699_v35 = vmax.f32 %v10594_v1, %v10591_v3  ;;  %v10599_v46 = vld [vmem:[#allocation124_spill] sm:$0xff]  ;;  %v10603_v3 = vld [vmem:[#allocation7_spill] sm:$0xff] }
 0x242   :  { %v9281_v50 = vpop.f32.mrf.mxu0  ;;  %v9283_v49 = vpop.f32.mrf.mxu1  ;;  %6070 = vmatpush3.msra.mxu1 %v3701_v10  ;;  %4120 = vmatprep.mubr.f32.mxu0 %v3922_v14  ;;  %v3714_v14 = vmax.f32 %v3610_v23, %v10597_v51  ;;  %v3592_v61 = vmax.f32 %v10599_v46, %v10598_v33  ;;  %v3698_v10 = vmax.f32 %v3594_v38, %v10600_v53  ;;  %v10606_v38 = vld [vmem:[#allocation123_spill] sm:$0xff]  ;;  %v10614_v46 = vld [vmem:[#allocation122_spill] sm:$0xff] }
 0x243   :  { %6071 = vmatprep.subr.mxu1 %v3716_v36  ;;  %v3713_v23 = vmax.f32 %v3609_v32, %v10603_v3  ;;  %v10612_v32 = vld [vmem:[#allocation6_spill] sm:$0xff]  ;;  %v10613_v33 = vld [vmem:[#allocation127_spill] sm:$0xff] }
 0x244   :  { %v9295_v29 = vpop.f32.mrf.mxu0  ;;  %v9297_v41 = vpop.f32.mrf.mxu1  ;;  %6072 = vmatpush3.msra.mxu1 %v3700_v58  ;;  %v10601_v58 = vld [vmem:[#allocation45_spill] sm:$0xff]  ;;  %v3712_v51 = vmax.f32 %v3608_v59, %v10612_v32  ;;  %v3590_v53 = vmax.f32 %v10614_v46, %v10613_v33  ;;  %v10618_v59 = vld [vmem:[#allocation47_spill] sm:$0xff] }
 0x245   :  { %6073 = vmatprep.subr.mxu1 %v3715_v27  ;;  %4121 = vmatmul.mubr.f32.gmra.mxu0 %v3921_v22  ;;  %v3607_v8 = vmax.f32 %v10602_v17, %v10601_v58  ;;  %v10605_v22 = vld [vmem:[#allocation49_spill] sm:$0xff]  ;;  %v10607_v27 = vld [vmem:[#allocation128_spill] sm:$0xff]  ;;  %v10623_v32 = vld [vmem:[#allocation111_spill] sm:$0xff] }
 0x246   :  { %v9305_v24 = vpop.f32.mrf.mxu0  ;;  %v9307_v36 = vpop.f32.mrf.mxu1  ;;  %6074 = vmatpush3.msra.mxu1 %v3699_v35  ;;  %4125 = vmatprep.mubr.f32.mxu0 %v3929_v45  ;;  %v10608_v48 = vmax.f32 %v10606_v38, %v10607_v27  ;;  %v10610_v35 = vld [vmem:[#allocation36_spill] sm:$0xff]  ;;  %v10617_v38 = vld [vmem:[#allocation5_spill] sm:$0xff] }
 0x247   :  { %6075 = vmatprep.subr.mxu1 %v3714_v14  ;;  %v3606_v43 = vmax.f32 %v10611_v31, %v10610_v35  ;;  %v3935_v14 = vunpack.c.l.bf16 %v3826_v15  ;;  %v10615_v58 = vld [vmem:[#allocation48_spill] sm:$0xff]  ;;  %v3711_v27 = vmax.f32 %v3607_v8, %v10617_v38  ;;  %v3832_v8 = vunpack.c.l.bf16 %v10623_v32  ;;  %v3783_v32 = vld [vmem:[%s10184_s5 + $0x78] sm:$0xff] }
 0x248   :  { %v3697_v7 = vmax.f32 %v10608_v48, %v10605_v22  ;;  %v9321_v1 = vpop.f32.mrf.mxu0  ;;  %v9323_v45 = vpop.f32.mrf.mxu1  ;;  %6076 = vmatpush3.msra.mxu1 %v3698_v10  ;;  %v3696_v17 = vmax.f32 %v3592_v61, %v10615_v58  ;;  %v3835_v10 = vunpack.c.h.bf16 %v9315_v40  ;;  %v3771_v15 = vld [vmem:[%s10184_s5 + $0x24] sm:$0xff]  ;;  %v3860_v37 = vunpack.c.l.bf16 %v3783_v32 }
 0x249   :  { %10609 = vst [vmem:[#allocation28_spill] sm:$0xff] %v9321_v1  ;;  %6077 = vmatprep.subr.mxu1 %v3713_v23  ;;  %4126 = vmatmul.mubr.f32.gmra.mxu0 %v3928_v55  ;;  %v10619_v55 = vld [vmem:[#allocation121_spill] sm:$0xff]  ;;  %v10620_v23 = vld [vmem:[#allocation126_spill] sm:$0xff]  ;;  %v3840_v38 = vunpack.c.h.bf16 %v3771_v15 }
 0x24a   :  { %v9331_v3 = vpop.f32.mrf.mxu0  ;;  %v9333_v22 = vpop.f32.mrf.mxu1  ;;  %6078 = vmatpush3.msra.mxu1 %v3697_v7  ;;  %4130 = vmatprep.mubr.f32.mxu0 %v3936_v13  ;;  %v10621_v48 = vmax.f32 %v10619_v55, %v10620_v23  ;;  %v10622_v13 = vld [vmem:[#allocation4_spill] sm:$0xff] }
 0x24b   :  { %10616 = vst [vmem:[#allocation104_spill] sm:$0xff] %v9331_v3  ;;  %6079 = vmatprep.subr.mxu1 %v3712_v51  ;;  %v3710_v7 = vmax.f32 %v3606_v43, %v10622_v13  ;;  %v10624_v51 = vld [vmem:[#allocation46_spill] sm:$0xff] }
 0x24c   :  { %v3695_v61 = vmax.f32 %v10621_v48, %v10618_v59  ;;  %v9344_v35 = vpop.f32.mrf.mxu0  ;;  %v9346_v31 = vpop.f32.mrf.mxu1  ;;  %6080 = vmatpush3.msra.mxu1 %v3696_v17  ;;  %v3694_v33 = vmax.f32 %v3590_v53, %v10624_v51  ;;  %v3775_v17 = vld [vmem:[%s10184_s5 + $0x40] sm:$0xff] }
 0x24d   :  { %6081 = vmatprep.subr.mxu1 %v3711_v27  ;;  %4131 = vmatmul.mubr.f32.gmra.mxu0 %v3935_v14  ;;  %v3839_v14 = vunpack.c.l.bf16 %v3771_v15  ;;  %v3847_v55 = vunpack.c.h.bf16 %v3775_v17 }
 0x24e   :  { %v9351_v46 = vpop.f32.mrf.mxu0  ;;  %v9353_v58 = vpop.f32.mrf.mxu1  ;;  %6082 = vmatpush3.msra.mxu1 %v3695_v61  ;;  %4345 = vmatprep.mubr.f32.mxu0 %v3835_v10  ;;  %v3779_v10 = vld [vmem:[%s10184_s5 + $0x5c] sm:$0xff]  ;;  %v3846_v61 = vunpack.c.l.bf16 %v3775_v17  ;;  %v3861_v17 = vunpack.c.h.bf16 %v3783_v32 }
 0x24f   :  { %10625 = vst [vmem:[#allocation118_spill] sm:$0xff] %v9351_v46  ;;  %6083 = vmatprep.subr.mxu1 %v3710_v7  ;;  %v3854_v15 = vunpack.c.h.bf16 %v3779_v10 }
 0x250   :  { %v9358_v59 = vpop.f32.mrf.mxu0  ;;  %v9360_v43 = vpop.f32.mrf.mxu1  ;;  %6084 = vmatpush3.msra.mxu1 %v3694_v33  ;;  %v3853_v33 = vunpack.c.l.bf16 %v3779_v10 }
 0x251   :  { %10626 = vst [vmem:[#allocation112_spill] sm:$0xff] %v9360_v43  ;;  %4201 = vmatmul.mubr.f32.vlgmr.msra.gmra.mxu1 %v3832_v8 }
 0x252   :  { %v9362_v53 = vpop.f32.mrf.mxu0  ;;  %v9364_v27 = vpop.f32.mrf.mxu1  ;;  %4205 = vmatprep.mubr.f32.mxu1 %v3840_v38 }
 0x253   :  { %10627 = vst [vmem:[#allocation42_spill] sm:$0xff] %v9364_v27 }
 0x254   :  { %v9369_v23 = vpop.f32.mrf.mxu0  ;;  %v9371_v48 = vpop.f32.mrf.mxu1 }
 0x255   :  { %4206 = vmatmul.mubr.f32.gmra.mxu1 %v3839_v14 }
 0x256   :  { %v9373_v13 = vpop.f32.mrf.mxu0  ;;  %v9375_v7 = vpop.f32.mrf.mxu1  ;;  %4210 = vmatprep.mubr.f32.mxu1 %v3847_v55  ;;  %v3787_v55 = vld [vmem:[%s10184_s5 + $0x94] sm:$0xff] }
 0x257   :  { %v3868_v10 = vunpack.c.h.bf16 %v3787_v55  ;;  %v3867_v11 = vunpack.c.l.bf16 %v3787_v55  ;;  %v3799_v55 = vld [vmem:[%s10184_s5 + $0xe8] sm:$0xff] }
 0x258   :  { %v9380_v8 = vpop.f32.mrf.mxu0  ;;  %v9382_v51 = vpop.f32.mrf.mxu1 }
 0x259   :  { %4211 = vmatmul.mubr.f32.gmra.mxu1 %v3846_v61 }
 0x25a   :  { %v9384_v38 = vpop.f32.mrf.mxu0  ;;  %v9386_v14 = vpop.f32.mrf.mxu1  ;;  %4215 = vmatprep.mubr.f32.mxu1 %v3854_v15  ;;  %v3791_v15 = vld [vmem:[%s10184_s5 + $0xb0] sm:$0xff] }
 0x25b   :  { %v3875_v32 = vunpack.c.h.bf16 %v3791_v15  ;;  %v3874_v40 = vunpack.c.l.bf16 %v3791_v15  ;;  %v3803_v15 = vld [vmem:[%s10184_s5 + $0x104] sm:$0xff] }
 0x25c   :  { %v9391_v52 = vpop.f32.mrf.mxu0  ;;  %v9393_v54 = vpop.f32.mrf.mxu1 }
 0x25d   :  { %4216 = vmatmul.mubr.f32.gmra.mxu1 %v3853_v33  ;;  %v3795_v33 = vld [vmem:[%s10184_s5 + $0xcc] sm:$0xff] }
 0x25e   :  { %v9395_v56 = vpop.f32.mrf.mxu0  ;;  %v9397_v61 = vpop.f32.mrf.mxu1  ;;  %4220 = vmatprep.mubr.f32.mxu1 %v3861_v17  ;;  %v3881_v21 = vunpack.c.l.bf16 %v3795_v33 }
 0x260   :  { %v6731_v62 = vpop.f32.mrf.mxu0  ;;  %v9402_v63 = vpop.f32.mrf.mxu1 }
 0x261   :  { %4221 = vmatmul.mubr.f32.gmra.mxu1 %v3860_v37  ;;  %v3882_v37 = vunpack.c.h.bf16 %v3795_v33 }
 0x262   :  { %v9404_v2 = vpop.f32.mrf.mxu0  ;;  %v9406_v30 = vpop.f32.mrf.mxu1  ;;  %4225 = vmatprep.mubr.f32.mxu1 %v3868_v10 }
 0x264   :  { %v6734_v17 = vpop.f32.mrf.mxu0  ;;  %v9411_v44 = vpop.f32.mrf.mxu1 }
 0x265   :  { %4226 = vmatmul.mubr.f32.gmra.mxu1 %v3867_v11  ;;  %v3889_v11 = vunpack.c.h.bf16 %v3799_v55 }
 0x266   :  { %v2913_v26 = vpop.f32.mrf.mxu0  ;;  %v9413_v19 = vpop.f32.mrf.mxu1  ;;  %4230 = vmatprep.mubr.f32.mxu1 %v3875_v32  ;;  %v3637_v32 = vmax.f32 %v9295_v29, %v9346_v31  ;;  %v3807_v29 = vld [vmem:[%s10184_s5 + $0x120] sm:$0xff] }
 0x267   :  { %v10631_v31 = vld [vmem:[#allocation75_spill] sm:$0xff] }
 0x268   :  { %v9418_v10 = vpop.f32.mrf.mxu0  ;;  %v6901_v28 = vpop.f32.mrf.mxu1 }
 0x269   :  { %10628 = vst [vmem:[#allocation103_spill] sm:$0xff] %v9418_v10  ;;  %4231 = vmatmul.mubr.f32.gmra.mxu1 %v3874_v40  ;;  %v3888_v10 = vunpack.c.l.bf16 %v3799_v55  ;;  %v3636_v40 = vmax.f32 %v9305_v24, %v9353_v58  ;;  %v3651_v12 = vmax.f32 %v6731_v62, %v6901_v28  ;;  %v10632_v58 = vld [vmem:[#allocation90_spill] sm:$0xff]  ;;  %v3895_v28 = vunpack.c.l.bf16 %v3803_v15 }
 0x26a   :  { %v9420_v3 = vpop.f32.mrf.mxu0  ;;  %v3499_v27 = vpop.f32.mrf.mxu1  ;;  %4235 = vmatprep.mubr.f32.mxu1 %v3882_v37 }
 0x26b   :  { %10629 = vst [vmem:[#allocation27_spill] sm:$0xff] %v9420_v3  ;;  %v3896_v3 = vunpack.c.h.bf16 %v3803_v15  ;;  %v3650_v24 = vmax.f32 %v9404_v2, %v3499_v27  ;;  %v3649_v2 = vmax.f32 %v9391_v52, %v9411_v44  ;;  %v10636_v15 = vld [vmem:[#allocation88_spill] sm:$0xff]  ;;  %v3632_v52 = vmax.f32 %v9255_v47, %v9307_v36  ;;  %v10639_v36 = vld [vmem:[#allocation71_spill] sm:$0xff] }
 0x26c   :  { %v9427_v1 = vpop.f32.mrf.mxu0  ;;  %v6904_v43 = vpop.f32.mrf.mxu1  ;;  %v3631_v47 = vmax.f32 %v9218_v0, %v9273_v20  ;;  %v3645_v20 = vmax.f32 %v9369_v23, %v9393_v54  ;;  %v3643_v54 = vmax.f32 %v9358_v59, %v9382_v51  ;;  %v10646_v23 = vld [vmem:[#allocation83_spill] sm:$0xff]  ;;  %v10651_v59 = vld [vmem:[#allocation96_spill] sm:$0xff] }
 0x26d   :  { %v3653_v6 = vmax.f32 %v6734_v17, %v6904_v43  ;;  %4236 = vmatmul.mubr.f32.gmra.mxu1 %v3881_v21  ;;  %v3635_v21 = vmax.f32 %v9271_v18, %v9323_v45  ;;  %v3741_v43 = vmax.f32 %v3637_v32, %v10631_v31  ;;  %v3903_v18 = vunpack.c.h.bf16 %v3807_v29  ;;  %v10634_v45 = vld [vmem:[#allocation89_spill] sm:$0xff]  ;;  %v10637_v32 = vld [vmem:[#allocation72_spill] sm:$0xff] }
 0x26e   :  { %v9431_v33 = vpop.f32.mrf.mxu0  ;;  %v3509_v37 = vpop.f32.mrf.mxu1  ;;  %4240 = vmatprep.mubr.f32.mxu1 %v3889_v11  ;;  %v3754_v44 = vmax.f32 %v3650_v24, %v10636_v15  ;;  %v3646_v24 = vmax.f32 %v9384_v38, %v9406_v30  ;;  %v10642_v30 = vld [vmem:[#allocation85_spill] sm:$0xff]  ;;  %v3749_v15 = vmax.f32 %v3645_v20, %v10646_v23  ;;  %v10676_v23 = vld [vmem:[#allocation104_spill] sm:$0xff] }
 0x26f   :  { %v3757_v60 = vmax.f32 %v3653_v6, %v10630_v9  ;;  %v3652_v46 = vmax.f32 %v2913_v26, %v3509_v37  ;;  %v3634_v26 = vmax.f32 %v9281_v50, %v9333_v22  ;;  %v10633_v6 = vld [vmem:[#allocation74_spill] sm:$0xff]  ;;  %v3633_v50 = vmax.f32 %v9243_v25, %v9297_v41  ;;  %v10635_v22 = vld [vmem:[#allocation73_spill] sm:$0xff] }
 0x270   :  { %v9440_v17 = vpop.f32.mrf.mxu1  ;;  %v3740_v9 = vmax.f32 %v3636_v40, %v10633_v6  ;;  %v9447_v62 = vpop.f32.mrf.mxu0  ;;  %v3739_v27 = vmax.f32 %v3635_v21, %v10635_v22 }
 0x271   :  { %v3756_v55 = vmax.f32 %v3652_v46, %v10632_v58  ;;  %6133 = vmatprep.subr.mxu0 %v3757_v60  ;;  %4241 = vmatmul.mubr.f32.gmra.mxu1 %v3888_v10  ;;  %v3755_v46 = vmax.f32 %v3651_v12, %v10634_v45  ;;  %v3811_v60 = vld [vmem:[%s10184_s5 + $0x13c] sm:$0xff]  ;;  %v3902_v12 = vunpack.c.l.bf16 %v3807_v29  ;;  %v3738_v40 = vmax.f32 %v3634_v26, %v10637_v32 }
 0x272   :  { %v9449_v11 = vpop.f32.mrf.mxu1  ;;  %6134 = vmatpush3.msra.mxu0 %v3741_v43  ;;  %4245 = vmatprep.mubr.f32.mxu1 %v3896_v3  ;;  %v3648_v3 = vmax.f32 %v9395_v56, %v9413_v19  ;;  %v9468_v37 = vpop.f32.mrf.mxu0  ;;  %v3910_v41 = vunpack.c.h.bf16 %v3811_v60  ;;  %v3647_v19 = vmax.f32 %v9380_v8, %v9402_v63  ;;  %v10638_v56 = vld [vmem:[#allocation87_spill] sm:$0xff]  ;;  %v9478_v29 = vld [vmem:[%s10184_s5 + $0x158] sm:$0xff]  ;;  %v3737_v31 = vmax.f32 %v3633_v50, %v10639_v36  ;;  %v10645_v50 = vld [vmem:[#allocation68_spill] sm:$0xff] }
 0x273   :  { %6135 = vmatprep.subr.mxu0 %v3756_v55  ;;  %v3753_v21 = vmax.f32 %v3649_v2, %v10638_v56  ;;  %v10640_v58 = vld [vmem:[#allocation86_spill] sm:$0xff]  ;;  %v3909_v8 = vunpack.c.l.bf16 %v3811_v60  ;;  %v3630_v55 = vmax.f32 %v9230_v4, %v9283_v49  ;;  %v3917_v0 = vunpack.c.h.bf16 %v9478_v29  ;;  %v10644_v49 = vld [vmem:[#allocation84_spill] sm:$0xff] }
 0x274   :  { %v9460_v10 = vpop.f32.mrf.mxu1  ;;  %6136 = vmatpush3.msra.mxu0 %v3740_v9  ;;  %v3752_v63 = vmax.f32 %v3648_v3, %v10640_v58  ;;  %v6746_v6 = vpop.f32.mrf.mxu0  ;;  %v3751_v38 = vmax.f32 %v3647_v19, %v10642_v30  ;;  %v3644_v4 = vmax.f32 %v9373_v13, %v9397_v61  ;;  %v10648_v13 = vld [vmem:[#allocation67_spill] sm:$0xff]  ;;  %v10649_v61 = vmax.f32 %v9191_v5, %v9245_v57  ;;  %v10650_v19 = vld [vmem:[#allocation82_spill] sm:$0xff] }
 0x275   :  { %6137 = vmatprep.subr.mxu0 %v3755_v46  ;;  %4246 = vmatmul.mubr.f32.gmra.mxu1 %v3895_v28  ;;  %v10641_v28 = vld [vmem:[#allocation70_spill] sm:$0xff]  ;;  %v3750_v46 = vmax.f32 %v3646_v24, %v10644_v49  ;;  %v3734_v22 = vmax.f32 %v3630_v55, %v10645_v50  ;;  %v10653_v57 = vmax.f32 %v9203_v16, %v9257_v34  ;;  %v10658_v34 = vld [vmem:[#allocation80_spill] sm:$0xff]  ;;  %v10666_v30 = vld [vmem:[#allocation63_spill] sm:$0xff] }
 0x276   :  { %v9470_v25 = vpop.f32.mrf.mxu1  ;;  %6138 = vmatpush3.msra.mxu0 %v3739_v27  ;;  %4250 = vmatprep.mubr.f32.mxu1 %v3903_v18  ;;  %v3736_v26 = vmax.f32 %v3632_v52, %v10641_v28  ;;  %v10643_v18 = vld [vmem:[#allocation69_spill] sm:$0xff]  ;;  %v2953_v27 = vpop.f32.mrf.mxu0  ;;  %v3733_v32 = vmax.f32 %v10649_v61, %v10648_v13  ;;  %v3748_v56 = vmax.f32 %v3644_v4, %v10650_v19  ;;  %v10652_v5 = vld [vmem:[#allocation66_spill] sm:$0xff]  ;;  %v10670_v4 = vld [vmem:[#allocation112_spill] sm:$0xff] }
 0x277   :  { %6139 = vmatprep.subr.mxu0 %v3754_v44  ;;  %v3735_v2 = vmax.f32 %v3631_v47, %v10643_v18  ;;  %v10647_v44 = vld [vmem:[#allocation97_spill] sm:$0xff]  ;;  %v3641_v24 = vmax.f32 %v9344_v35, %v9371_v48  ;;  %v10657_v58 = vld [vmem:[#allocation94_spill] sm:$0xff]  ;;  %v10671_v49 = vld [vmem:[#allocation28_spill] sm:$0xff] }
 0x278   :  { %v6913_v43 = vpop.f32.mrf.mxu1  ;;  %6140 = vmatpush3.msra.mxu0 %v3738_v40  ;;  %v3819_v47 = vld [vmem:[%s10184_s5 + $0x174] sm:$0xff]  ;;  %v3827_v13 = vld [vmem:[%s10184_s5 + $0x1ac] sm:$0xff] }
 0x279   :  { %6141 = vmatprep.subr.mxu0 %v3753_v21  ;;  %4251 = vmatmul.mubr.f32.gmra.mxu1 %v3902_v12  ;;  %v3659_v40 = vmax.f32 %v9447_v62, %v6913_v43  ;;  %v3916_v21 = vunpack.c.l.bf16 %v9478_v29  ;;  %v3732_v62 = vmax.f32 %v10653_v57, %v10652_v5  ;;  %v10656_v29 = vmax.f32 %v9165_v42, %v9220_v39  ;;  %v10659_v55 = vld [vmem:[#allocation118_spill] sm:$0xff]  ;;  %v10660_v42 = vld [vmem:[#allocation93_spill] sm:$0xff] }
 0x27a   :  { %v3539_v9 = vpop.f32.mrf.mxu1  ;;  %6142 = vmatpush3.msra.mxu0 %v3737_v31  ;;  %4255 = vmatprep.mubr.f32.mxu1 %v3910_v41  ;;  %v3642_v41 = vmax.f32 %v9362_v53, %v9386_v14  ;;  %v10654_v53 = vld [vmem:[#allocation81_spill] sm:$0xff]  ;;  %v3924_v16 = vunpack.c.h.bf16 %v3819_v47  ;;  %v3640_v28 = vmax.f32 %v10659_v55, %v9375_v7  ;;  %v3923_v35 = vunpack.c.l.bf16 %v3819_v47  ;;  %v10665_v7 = vld [vmem:[#allocation79_spill] sm:$0xff]  ;;  %v10678_v61 = vld [vmem:[#allocation62_spill] sm:$0xff] }
 0x27b   :  { %6143 = vmatprep.subr.mxu0 %v3752_v63  ;;  %v3658_v36 = vmax.f32 %v9468_v37, %v3539_v9  ;;  %v3747_v14 = vmax.f32 %v3643_v54, %v10654_v53  ;;  %v10655_v31 = vld [vmem:[#allocation65_spill] sm:$0xff]  ;;  %v3763_v63 = vmax.f32 %v3659_v40, %v10657_v58  ;;  %v10663_v9 = vld [vmem:[#allocation43_spill] sm:$0xff]  ;;  %v10675_v54 = vld [vmem:[#allocation42_spill] sm:$0xff] }
 0x27c   :  { %v6916_v45 = vpop.f32.mrf.mxu1  ;;  %6144 = vmatpush3.msra.mxu0 %v3736_v26  ;;  %v3731_v43 = vmax.f32 %v10656_v29, %v10655_v31  ;;  %v3746_v37 = vmax.f32 %v3642_v41, %v10658_v34  ;;  %v3823_v48 = vld [vmem:[%s10184_s5 + $0x190] sm:$0xff]  ;;  %v10661_v26 = vld [vmem:[#allocation64_spill] sm:$0xff]  ;;  %v10680_v40 = vld [vmem:[#allocation110_spill] sm:$0xff] }
 0x27d   :  { %v3661_v60 = vmax.f32 %v6746_v6, %v6916_v45  ;;  %6145 = vmatprep.subr.mxu0 %v3751_v38  ;;  %4256 = vmatmul.mubr.f32.gmra.mxu1 %v3909_v8  ;;  %v3657_v8 = vmax.f32 %v9427_v1, %v9460_v10  ;;  %v3762_v39 = vmax.f32 %v3658_v36, %v10660_v42  ;;  %v10662_v6 = vld [vmem:[#allocation98_spill] sm:$0xff]  ;;  %v10667_v38 = vld [vmem:[#allocation115_spill] sm:$0xff]  ;;  %v10668_v18 = vld [vmem:[#allocation117_spill] sm:$0xff] }
 0x27e   :  { %v3549_v3 = vpop.f32.mrf.mxu1  ;;  %6146 = vmatpush3.msra.mxu0 %v3735_v2  ;;  %4260 = vmatprep.mubr.f32.mxu1 %v3917_v0  ;;  %v10664_v0 = vmax.f32 %v10662_v6, %v10663_v9  ;;  %v3656_v1 = vmax.f32 %v9431_v33, %v9470_v25  ;;  %v3745_v10 = vmax.f32 %v3641_v24, %v10665_v7  ;;  %v10673_v33 = vld [vmem:[#allocation78_spill] sm:$0xff]  ;;  %v10686_v5 = vld [vmem:[#allocation105_spill] sm:$0xff]  ;;  %v10689_v29 = vld [vmem:[#allocation76_spill] sm:$0xff] }
 0x27f   :  { %v3765_v12 = vmax.f32 %v3661_v60, %v10647_v44  ;;  %v3660_v52 = vmax.f32 %v2953_v27, %v3549_v3  ;;  %6147 = vmatprep.subr.mxu0 %v3750_v46  ;;  %v10669_v2 = vmax.f32 %v10667_v38, %v10668_v18  ;;  %v3639_v46 = vmax.f32 %v10671_v49, %v10670_v4  ;;  %v10672_v60 = vld [vmem:[#allocation92_spill] sm:$0xff]  ;;  %v10674_v27 = vld [vmem:[#allocation103_spill] sm:$0xff]  ;;  %v10685_v47 = vld [vmem:[#allocation106_spill] sm:$0xff] }
 0x280   :  { %6148 = vmatpush3.msra.mxu0 %v3734_v22  ;;  %v3730_v20 = vmax.f32 %v10664_v0, %v10661_v26  ;;  %v3761_v50 = vmax.f32 %v3657_v8, %v10672_v60  ;;  %v3931_v22 = vunpack.c.h.bf16 %v3823_v48  ;;  %v3744_v25 = vmax.f32 %v3640_v28, %v10673_v33  ;;  %v10677_v44 = vld [vmem:[#allocation24_spill] sm:$0xff]  ;;  %v10688_v36 = vld [vmem:[#allocation22_spill] sm:$0xff]  ;;  %v10690_v24 = vld [vmem:[#allocation21_spill] sm:$0xff] }
 0x281   :  { %v3764_v51 = vmax.f32 %v3660_v52, %v10651_v59  ;;  %6149 = vmatprep.subr.mxu0 %v3749_v15  ;;  %6917 = vmatprep.subr.mxu1 %v3765_v12  ;;  %v3729_v45 = vmax.f32 %v10669_v2, %v10666_v30  ;;  %v3655_v3 = vmax.f32 %v10674_v27, %v9440_v17  ;;  %v3930_v52 = vunpack.c.l.bf16 %v3823_v48  ;;  %v10682_v17 = vld [vmem:[#allocation27_spill] sm:$0xff]  ;;  %v10683_v59 = vld [vmem:[#allocation77_spill] sm:$0xff]  ;;  %v10693_v8 = vld [vmem:[#allocation120_spill] sm:$0xff] }
 0x282   :  { %6150 = vmatpush3.msra.mxu0 %v3733_v32  ;;  %6918 = vmatpush3.msra.mxu1 %v3765_v12  ;;  %v3638_v15 = vmax.f32 %v10676_v23, %v10675_v54  ;;  %v3760_v12 = vmax.f32 %v3656_v1, %v10677_v44  ;;  %v10679_v32 = vld [vmem:[#allocation44_spill] sm:$0xff]  ;;  %v10687_v57 = vmax.f32 %v10685_v47, %v10686_v5  ;;  %v3769_v31 = vld [vmem:[%s10184_s5 + $0x18] ss:$28 sps:$4 sm:$0xff]   ;;  %v10694_v55 = vld [vmem:[#allocation35_spill] sm:$0xff] }
 0x283   :  { %6151 = vmatprep.subr.mxu0 %v3748_v56  ;;  %6919 = vmatprep.subr.mxu1 %v3764_v51  ;;  %v10681_v41 = vmax.f32 %v10679_v32, %v10680_v40  ;;  %v3654_v56 = vmax.f32 %v10682_v17, %v9449_v11  ;;  %v3759_v53 = vmax.f32 %v3655_v3, %v10688_v36  ;;  %v3772_v11 = vld [vmem:[%s10184_s5 + $0x2c] sm:$0xff]  ;;  %v3843_v9 = vunpack.c.h.bf16 %v3769_v31  ;;  %v3780_v1 = vld [vmem:[%s10184_s5 + $0x64] sm:$0xff]  ;;  %v3792_v54 = vld [vmem:[%s10184_s5 + $0xb8] sm:$0xff] }
 0x284   :  { %6152 = vmatpush3.msra.mxu0 %v3732_v62  ;;  %6920 = vmatpush3.msra.mxu1 %v3764_v51  ;;  %v3743_v51 = vmax.f32 %v3639_v46, %v10683_v59  ;;  %v10695_v28 = vmax.f32 %v10693_v8, %v10694_v55  ;;  %v3776_v48 = vld [vmem:[%s10184_s5 + $0x48] sm:$0xff]  ;;  %v3841_v6 = vunpack.c.l.bf16 %v3772_v11  ;;  %v3856_v38 = vunpack.c.h.bf16 %v3780_v1  ;;  %v3784_v2 = vld [vmem:[%s10184_s5 + $0x80] sm:$0xff]  ;;  %v3800_v17 = vld [vmem:[%s10184_s5 + $0xf0] sm:$0xff] }
 0x285   :  { %4261 = vmatmul.mubr.f32.gmra.mxu1 %v3916_v21  ;;  %6153 = vmatprep.subr.mxu0 %v3747_v14  ;;  %v3728_v19 = vmax.f32 %v10681_v41, %v10678_v61  ;;  %v10684_v21 = vld [vmem:[#allocation20_spill] sm:$0xff]  ;;  %v3938_v14 = vunpack.c.h.bf16 %v3827_v13  ;;  %v3758_v58 = vmax.f32 %v3654_v56, %v10690_v24  ;;  %v3849_v0 = vunpack.c.h.bf16 %v3776_v48  ;;  %v3825_v56 = vld [vmem:[%s10184_s5 + $0x1a0] ss:$28 sps:$4 sm:$0xff]  }
 0x286   :  { %6921 = vmatprep.subr.mxu1 %v3763_v63  ;;  %6154 = vmatpush3.msra.mxu0 %v3731_v43  ;;  %v3727_v62 = vmax.f32 %v10687_v57, %v10684_v21  ;;  %v3742_v43 = vmax.f32 %v3638_v15, %v10689_v29  ;;  %v3777_v26 = vld [vmem:[%s10184_s5 + $0x50] ss:$28 sps:$4 sm:$0xff]   ;;  %v3785_v7 = vld [vmem:[%s10184_s5 + $0x88] ss:$28 sps:$4 sm:$0xff]   ;;  %v3855_v4 = vunpack.c.l.bf16 %v3780_v1  ;;  %v3863_v46 = vunpack.c.h.bf16 %v3784_v2  ;;  %v3824_v8 = vld [vmem:[%s10184_s5 + $0x198] sm:$0xff] }
 0x287   :  { %6922 = vmatpush3.msra.mxu1 %v3763_v63  ;;  %6155 = vmatprep.subr.mxu0 %v3746_v37  ;;  %v3937_v63 = vunpack.c.l.bf16 %v3827_v13  ;;  %v10692_v37 = vld [vmem:[#allocation61_spill] sm:$0xff]  ;;  %v3857_v30 = vunpack.c.h.bf16 %v3777_v26  ;;  %v3864_v18 = vunpack.c.l.bf16 %v3785_v7  ;;  %v3871_v49 = vunpack.c.h.bf16 %v3785_v7  ;;  %v3817_v61 = vld [vmem:[%s10184_s5 + $0x168] ss:$28 sps:$4 sm:$0xff]  }
 0x288   :  { %6923 = vmatprep.subr.mxu1 %v3762_v39  ;;  %4265 = vmatprep.mubr.f32.mxu1 %v3924_v16  ;;  %v10691_v16 = vld [vmem:[#allocation34_spill] sm:$0xff]  ;;  %v3726_v42 = vmax.f32 %v10695_v28, %v10692_v37  ;;  %v3862_v33 = vunpack.c.l.bf16 %v3784_v2  ;;  %v3809_v23 = vld [vmem:[%s10184_s5 + $0x130] ss:$28 sps:$4 sm:$0xff]   ;;  %v3876_v32 = vunpack.c.l.bf16 %v3792_v54  ;;  %v3891_v21 = vunpack.c.h.bf16 %v3800_v17  ;;  %v3816_v24 = vld [vmem:[%s10184_s5 + $0x160] sm:$0xff] }
 0x289   :  { %6156 = vmatpush3.msra.mxu0 %v3730_v20  ;;  %6924 = vmatpush3.msra.mxu1 %v3762_v39  ;;  %v3834_v34 = vunpack.c.l.bf16 %v10691_v16  ;;  %v3842_v39 = vunpack.c.h.bf16 %v3772_v11  ;;  %v3850_v20 = vunpack.c.l.bf16 %v3777_v26  ;;  %v3796_v13 = vld [vmem:[%s10184_s5 + $0xd4] sm:$0xff]  ;;  %v3913_v40 = vunpack.c.h.bf16 %v3809_v23  ;;  %v3804_v5 = vld [vmem:[%s10184_s5 + $0x10c] sm:$0xff]  ;;  %v3820_v16 = vld [vmem:[%s10184_s5 + $0x17c] sm:$0xff] }
 0x28a   :  { %4266 = vmatmul.mubr.f32.gmra.mxu1 %v3923_v35  ;;  %6157 = vmatprep.subr.mxu0 %v3745_v10  ;;  %v3836_v35 = vunpack.c.l.bf16 %v3769_v31  ;;  %v3848_v10 = vunpack.c.l.bf16 %v3776_v48  ;;  %v3884_v41 = vunpack.c.h.bf16 %v3796_v13  ;;  %v3883_v59 = vunpack.c.l.bf16 %v3796_v13  ;;  %v3812_v31 = vld [vmem:[%s10184_s5 + $0x144] sm:$0xff] }
 0x28b   :  { %6925 = vmatprep.subr.mxu1 %v3761_v50  ;;  %6158 = vmatpush3.msra.mxu0 %v3729_v45  ;;  %v3793_v45 = vld [vmem:[%s10184_s5 + $0xc0] ss:$28 sps:$4 sm:$0xff]   ;;  %v3934_v47 = vunpack.c.l.bf16 %v3825_v56  ;;  %v3890_v57 = vunpack.c.l.bf16 %v3800_v17  ;;  %v3898_v36 = vunpack.c.h.bf16 %v3804_v5  ;;  %v3926_v37 = vunpack.c.h.bf16 %v3820_v16 }
 0x28c   :  { %6926 = vmatpush3.msra.mxu1 %v3761_v50  ;;  %6159 = vmatprep.subr.mxu0 %v3744_v25  ;;  %v3878_v60 = vunpack.c.l.bf16 %v3793_v45  ;;  %v3788_v50 = vld [vmem:[%s10184_s5 + $0x9c] sm:$0xff]  ;;  %v3885_v25 = vunpack.c.h.bf16 %v3793_v45  ;;  %v3925_v55 = vunpack.c.l.bf16 %v3820_v16  ;;  %v3933_v28 = vunpack.c.h.bf16 %v3824_v8 }
 0x28d   :  { %6927 = vmatprep.subr.mxu1 %v3760_v12  ;;  %4270 = vmatprep.mubr.f32.mxu1 %v3931_v22  ;;  %v3801_v22 = vld [vmem:[%s10184_s5 + $0xf8] ss:$28 sps:$4 sm:$0xff]   ;;  %v3870_v27 = vunpack.c.h.bf16 %v3788_v50  ;;  %v3869_v15 = vunpack.c.l.bf16 %v3788_v50 }
 0x28e   :  { %6160 = vmatpush3.msra.mxu0 %v3728_v19  ;;  %6928 = vmatpush3.msra.mxu1 %v3760_v12  ;;  %v3892_v3 = vunpack.c.l.bf16 %v3801_v22  ;;  %v3899_v44 = vunpack.c.h.bf16 %v3801_v22  ;;  %v3877_v12 = vunpack.c.h.bf16 %v3792_v54  ;;  %v3920_v19 = vunpack.c.l.bf16 %v3817_v61 }
 0x28f   :  { %4271 = vmatmul.mubr.f32.gmra.mxu1 %v3930_v52  ;;  %6161 = vmatprep.subr.mxu0 %v3743_v51  ;;  %v3906_v52 = vunpack.c.l.bf16 %v3809_v23  ;;  %v3927_v51 = vunpack.c.h.bf16 %v3817_v61 }
 0x290   :  { %6929 = vmatprep.subr.mxu1 %v3759_v53  ;;  %6162 = vmatpush3.msra.mxu0 %v3727_v62  ;;  %v3941_v62 = vunpack.c.h.bf16 %v3825_v56 }
 0x291   :  { %6930 = vmatpush3.msra.mxu1 %v3759_v53  ;;  %6163 = vmatprep.subr.mxu0 %v3742_v43  ;;  %v3808_v53 = vld [vmem:[%s10184_s5 + $0x128] sm:$0xff]  ;;  %v3912_v43 = vunpack.c.h.bf16 %v3812_v31 }
 0x292   :  { %6931 = vmatprep.subr.mxu1 %v3758_v58  ;;  %4275 = vmatprep.mubr.f32.mxu1 %v3938_v14  ;;  %v3897_v14 = vunpack.c.l.bf16 %v3804_v5  ;;  %v3905_v11 = vunpack.c.h.bf16 %v3808_v53  ;;  %v3904_v29 = vunpack.c.l.bf16 %v3808_v53  ;;  %v7058_v5 = vmov 0  }
 0x293   :  { %6164 = vmatpush3.msra.mxu0 %v3726_v42  ;;  %6932 = vmatpush3.msra.mxu1 %v3758_v58  ;;  %v3911_v58 = vunpack.c.l.bf16 %v3812_v31  ;;  %v3828_v42 = vld [vmem:[%s10184_s5 + $0x1b4] sm:$0xff] }
 0x294   :  { %4276 = vmatmul.mubr.f32.gmra.mxu1 %v3937_v63  ;;  %4346 = vmatmul.mubr.f32.vlgmr.msra.gmra.mxu0 %v3834_v34  ;;  %v3919_v63 = vunpack.c.h.bf16 %v3816_v24  ;;  %v3918_v34 = vunpack.c.l.bf16 %v3816_v24  ;;  %v3939_v48 = vunpack.c.l.bf16 %v3828_v42 }
 0x295   :  { %4350 = vmatprep.mubr.f32.mxu0 %v3842_v39  ;;  %6933 = vmatprep.mubr.msk.f32.mxu1 %vm3942_vm2, %v3836_v35  ;;  %v3932_v39 = vunpack.c.l.bf16 %v3824_v8  ;;  %v3940_v35 = vunpack.c.h.bf16 %v3828_v42 }
 0x296   :  { %6972 = vset.pattern.permute.xlu1 %v7058_v5  ;;  %6973 = vset.pattern.permute.xlu0 %v7058_v5 }
 0x298   :  { %4351 = vmatmul.mubr.f32.gmra.mxu0 %v3841_v6  ;;  %6934 = vmatmul.mubr.msk.f32.vlgmr.msra.gmra.mxu1 %vm3942_vm2, %v3843_v9 }
 0x299   :  { %4355 = vmatprep.mubr.f32.mxu0 %v3849_v0  ;;  %6936 = vmatprep.mubr.msk.f32.mxu1 %vm3942_vm2, %v3850_v20 }
 0x29c   :  { %4356 = vmatmul.mubr.f32.gmra.mxu0 %v3848_v10  ;;  %6937 = vmatmul.mubr.msk.f32.gmra.mxu1 %vm3942_vm2, %v3857_v30 }
 0x29d   :  { %4360 = vmatprep.mubr.f32.mxu0 %v3856_v38  ;;  %6939 = vmatprep.mubr.msk.f32.mxu1 %vm3942_vm2, %v3864_v18 }
 0x2a0   :  { %4361 = vmatmul.mubr.f32.gmra.mxu0 %v3855_v4  ;;  %6940 = vmatmul.mubr.msk.f32.gmra.mxu1 %vm3942_vm2, %v3871_v49 }
 0x2a1   :  { %4365 = vmatprep.mubr.f32.mxu0 %v3863_v46  ;;  %6942 = vmatprep.mubr.msk.f32.mxu1 %vm3942_vm2, %v3878_v60 }
 0x2a4   :  { %4366 = vmatmul.mubr.f32.gmra.mxu0 %v3862_v33  ;;  %6943 = vmatmul.mubr.msk.f32.gmra.mxu1 %vm3942_vm2, %v3885_v25 }
 0x2a5   :  { %4370 = vmatprep.mubr.f32.mxu0 %v3870_v27  ;;  %6945 = vmatprep.mubr.msk.f32.mxu1 %vm3942_vm2, %v3892_v3 }
 0x2a8   :  { %4371 = vmatmul.mubr.f32.gmra.mxu0 %v3869_v15  ;;  %6946 = vmatmul.mubr.msk.f32.gmra.mxu1 %vm3942_vm2, %v3899_v44 }
 0x2a9   :  { %4375 = vmatprep.mubr.f32.mxu0 %v3877_v12  ;;  %6948 = vmatprep.mubr.msk.f32.mxu1 %vm3942_vm2, %v3906_v52 }
 0x2ac   :  { %4376 = vmatmul.mubr.f32.gmra.mxu0 %v3876_v32  ;;  %6949 = vmatmul.mubr.msk.f32.gmra.mxu1 %vm3942_vm2, %v3913_v40 }
 0x2ad   :  { %4380 = vmatprep.mubr.f32.mxu0 %v3884_v41  ;;  %6951 = vmatprep.mubr.msk.f32.mxu1 %vm3942_vm2, %v3920_v19 }
 0x2b0   :  { %4381 = vmatmul.mubr.f32.gmra.mxu0 %v3883_v59  ;;  %6952 = vmatmul.mubr.msk.f32.gmra.mxu1 %vm3942_vm2, %v3927_v51 }
 0x2b1   :  { %4385 = vmatprep.mubr.f32.mxu0 %v3891_v21  ;;  %6954 = vmatprep.mubr.msk.f32.mxu1 %vm3942_vm2, %v3934_v47 }
 0x2b4   :  { %4386 = vmatmul.mubr.f32.gmra.mxu0 %v3890_v57  ;;  %6955 = vmatmul.mubr.msk.f32.gmra.mxu1 %vm3942_vm2, %v3941_v62 }
 0x2b5   :  { %4390 = vmatprep.mubr.f32.mxu0 %v3898_v36 }
 0x2b8   :  { %4391 = vmatmul.mubr.f32.gmra.mxu0 %v3897_v14 }
 0x2b9   :  { %4395 = vmatprep.mubr.f32.mxu0 %v3905_v11 }
 0x2bc   :  { %4396 = vmatmul.mubr.f32.gmra.mxu0 %v3904_v29 }
 0x2bd   :  { %4400 = vmatprep.mubr.f32.mxu0 %v3912_v43 }
 0x2c0   :  { %4401 = vmatmul.mubr.f32.gmra.mxu0 %v3911_v58 }
 0x2c1   :  { %4405 = vmatprep.mubr.f32.mxu0 %v3919_v63 }
 0x2c4   :  { %4406 = vmatmul.mubr.f32.gmra.mxu0 %v3918_v34 }
 0x2c5   :  { %4410 = vmatprep.mubr.f32.mxu0 %v3926_v37 }
 0x2c8   :  { %4411 = vmatmul.mubr.f32.gmra.mxu0 %v3925_v55 }
 0x2c9   :  { %4415 = vmatprep.mubr.f32.mxu0 %v3933_v28 }
 0x2cc   :  { %4416 = vmatmul.mubr.f32.gmra.mxu0 %v3932_v39 }
 0x2cd   :  { %4420 = vmatprep.mubr.f32.mxu0 %v3940_v35 }
 0x2d0   :  { %4421 = vmatmul.mubr.f32.gmra.mxu0 %v3939_v48 }
 0x2d1   :  { %v9664_v26 = vpop.f32.mrf.mxu0 }
 0x2d3   :  { %v9666_v6 = vpop.f32.mrf.mxu0 }
 0x2d5   :  { %v9668_v9 = vpop.f32.mrf.mxu0 }
 0x2d7   :  { %v9670_v0 = vpop.f32.mrf.mxu0 }
 0x2d9   :  { %v6011_v20 = vpop.f32.mrf.mxu0 }
 0x2db   :  { %v6012_v1 = vpop.f32.mrf.mxu0 }
 0x2dc   :  { %v9672_v7 = vadd.f32 %v6012_v1, %v6011_v20 }
 0x2dd   :  { %v6014_v10 = vpop.f32.mrf.mxu0 }
 0x2df   :  { %v6015_v30 = vpop.f32.mrf.mxu0 }
 0x2e0   :  { %v9674_v38 = vadd.f32 %v6015_v30, %v6014_v10 }
 0x2e1   :  { %v9676_v18 = vpop.f32.mrf.mxu0 }
 0x2e3   :  { %v9678_v2 = vpop.f32.mrf.mxu0 }
 0x2e5   :  { %v6020_v45 = vpop.f32.mrf.mxu0 }
 0x2e7   :  { %v6021_v4 = vpop.f32.mrf.mxu0 }
 0x2e8   :  { %v9680_v49 = vadd.f32 %v6021_v4, %v6020_v45 }
 0x2e9   :  { %v9682_v46 = vpop.f32.mrf.mxu0 }
 0x2eb   :  { %v9684_v60 = vpop.f32.mrf.mxu0 }
 0x2ed   :  { %v6026_v50 = vpop.f32.mrf.mxu0 }
 0x2ef   :  { %v6027_v22 = vpop.f32.mrf.mxu0 }
 0x2f0   :  { %v9686_v33 = vadd.f32 %v6027_v22, %v6026_v50 }
 0x2f1   :  { %v9688_v25 = vpop.f32.mrf.mxu0 }
 0x2f3   :  { %v9690_v27 = vpop.f32.mrf.mxu0 }
 0x2f5   :  { %v6032_v3 = vpop.f32.mrf.mxu0 }
 0x2f7   :  { %v6033_v54 = vpop.f32.mrf.mxu0 }
 0x2f8   :  { %v9692_v23 = vadd.f32 %v6033_v54, %v6032_v3  ;;  %v6007_v54 = vadd.f32 %v9666_v6, %v9664_v26 }
 0x2f9   :  { %v9694_v15 = vpop.f32.mrf.mxu0 }
 0x2fb   :  { %v9696_v44 = vpop.f32.mrf.mxu0 }
 0x2fd   :  { %v6038_v12 = vpop.f32.mrf.mxu0 }
 0x2ff   :  { %v6039_v52 = vpop.f32.mrf.mxu0 }
 0x300   :  { %v9698_v13 = vadd.f32 %v6039_v52, %v6038_v12 }
 0x301   :  { %v9700_v61 = vpop.f32.mrf.mxu0 }
 0x302   :  { %10696 = vst [vmem:[#allocation33_spill] sm:$0xff] %v9700_v61 }
 0x303   :  { %v9702_v32 = vpop.f32.mrf.mxu0 }
 0x304   :  { %10697 = vst [vmem:[#allocation114_spill] sm:$0xff] %v9702_v32 }
 0x305   :  { %v6044_v40 = vpop.f32.mrf.mxu0 }
 0x307   :  { %v6045_v41 = vpop.f32.mrf.mxu0 }
 0x308   :  { %v9704_v19 = vadd.f32 %v6045_v41, %v6044_v40 }
 0x309   :  { %v9740_v39 = vpop.f32.mrf.mxu0 }
 0x30a   :  { %10698 = vst [vmem:[#allocation107_spill] sm:$0xff] %v9704_v19  ;;  %10699 = vst [vmem:[#allocation41_spill] sm:$0xff] %v9740_v39 }
 0x30b   :  { %v9746_v20 = vpop.f32.mrf.mxu0 }
 0x30c   :  { %10701 = vst [vmem:[#allocation26_spill] sm:$0xff] %v9746_v20 }
 0x30d   :  { %v6050_v10 = vpop.f32.mrf.mxu0 }
 0x30f   :  { %v6051_v4 = vpop.f32.mrf.mxu0 }
 0x310   :  { %v6052_v12 = vadd.f32 %v6051_v4, %v6050_v10 }
 0x311   :  { %v6085_v17 = vpop.f32.mrf.mxu1 }
 0x313   :  { %v6086_v56 = vpop.f32.mrf.mxu1 }
 0x314   :  { %v6087_v50 = vadd.f32 %v6086_v56, %v6085_v17 }
 0x315   :  { %v6088_v59 = vpop.f32.mrf.mxu1 }
 0x316   :  { %v4203_v41 = vadd.f32 %v6087_v50, %v6007_v54 }
 0x317   :  { %v6089_v51 = vpop.f32.mrf.mxu1 }
 0x318   :  { %v6090_v5 = vadd.f32 %v6089_v51, %v6088_v59 }
 0x319   :  { %v6091_v21 = vpop.f32.mrf.mxu1 }
 0x31b   :  { %v6092_v47 = vpop.f32.mrf.mxu1 }
 0x31c   :  { %v6093_v61 = vadd.f32 %v6092_v47, %v6091_v21 }
 0x31d   :  { %v6094_v57 = vpop.f32.mrf.mxu1 }
 0x31f   :  { %v6095_v62 = vpop.f32.mrf.mxu1 }
 0x321   :  { %v9706_v36 = vpop.f32.mrf.mxu1 }
 0x323   :  { %v9708_v53 = vpop.f32.mrf.mxu1 }
 0x325   :  { %v9710_v14 = vpop.f32.mrf.mxu1 }
 0x327   :  { %v9712_v11 = vpop.f32.mrf.mxu1 }
 0x329   :  { %v9714_v31 = vpop.f32.mrf.mxu1 }
 0x32b   :  { %v9716_v29 = vpop.f32.mrf.mxu1 }
 0x32d   :  { %v9718_v43 = vpop.f32.mrf.mxu1 }
 0x32f   :  { %v9720_v24 = vpop.f32.mrf.mxu1 }
 0x331   :  { %v9722_v58 = vpop.f32.mrf.mxu1 }
 0x333   :  { %v9724_v63 = vpop.f32.mrf.mxu1 }
 0x335   :  { %v9726_v16 = vpop.f32.mrf.mxu1 }
 0x337   :  { %v9728_v34 = vpop.f32.mrf.mxu1 }
 0x339   :  { %v9730_v37 = vpop.f32.mrf.mxu1 }
 0x33b   :  { %v9732_v8 = vpop.f32.mrf.mxu1 }
 0x33d   :  { %v9734_v55 = vpop.f32.mrf.mxu1 }
 0x33f   :  { %v9736_v28 = vpop.f32.mrf.mxu1 }
 0x345   :  { %v9738_v42 = vpop.f32.mrf.mxu1 }
 0x347   :  { %v9742_v35 = vpop.f32.mrf.mxu1 }
 0x34a   :  { %v9744_v48 = vpop.f32.mrf.mxu1 }
 0x34b   :  { %10700 = vst [vmem:[#allocation32_spill] sm:$0xff] %v9744_v48 }
 0x34c   :  { %v9748_v1 = vpop.f32.mrf.mxu1 }
 0x34d   :  { %10702 = vst [vmem:[#allocation101_spill] sm:$0xff] %v9748_v1 }
 0x34f   :  { %v9750_v30 = vpop.f32.mrf.mxu1 }
 0x350   :  { %10703 = vst [vmem:[#allocation116_spill] sm:$0xff] %v9750_v30  ;;  %v6010_v30 = vadd.f32 %v9670_v0, %v9668_v9  ;;  %v6096_v9 = vadd.f32 %v6095_v62, %v6094_v57  ;;  %v6099_v57 = vadd.f32 %v9708_v53, %v9706_v36  ;;  %v6102_v36 = vadd.f32 %v9712_v11, %v9710_v14 }
 0x351   :  { %v9752_v45 = vpop.f32.mrf.mxu1  ;;  %v6105_v14 = vadd.f32 %v9716_v29, %v9714_v31 }
 0x352   :  { %10704 = vst [vmem:[#allocation108_spill] sm:$0xff] %v9752_v45  ;;  %v4208_v32 = vadd.f32 %v6090_v5, %v6010_v30 }
 0x354   :  { %v6130_v22 = vpop.f32.mrf.mxu1  ;;  %v6165_v3 = vpop.f32.mrf.mxu0 }
 0x356   :  { %v6131_v52 = vpop.f32.mrf.mxu1  ;;  %v6166_v40 = vpop.f32.mrf.mxu0 }
 0x357   :  { %v6132_v20 = vadd.f32 %v6131_v52, %v6130_v22  ;;  %v6167_v39 = vadd.f32 %v6166_v40, %v6165_v3  ;;  %v4218_v22 = vadd.f32 %v6096_v9, %v9674_v38 }
 0x358   :  { %v6168_v19 = vpop.f32.mrf.mxu0  ;;  %v6935_v1 = vpop.f32.mrf.mxu1 }
 0x359   :  { %v9758_v45 = vadd.f32 %v6132_v20, %v6052_v12  ;;  %v4348_v17 = vadd.f32 %v6167_v39, %v4203_v41  ;;  %v4213_v39 = vadd.f32 %v6093_v61, %v9672_v7  ;;  %v6019_v12 = vadd.f32 %v9678_v2, %v9676_v18 }
 0x35a   :  { %v6169_v56 = vpop.f32.mrf.mxu0  ;;  %v4492_v48 = vpop.f32.mrf.mxu1 }
 0x35b   :  { %v6170_v26 = vadd.f32 %v6169_v56, %v6168_v19  ;;  %v9760_v6 = vadd.f32 %v4492_v48, %v4348_v17  ;;  %v4223_v41 = vadd.f32 %v6099_v57, %v6019_v12 }
 0x35c   :  { %v6171_v10 = vpop.f32.mrf.mxu0  ;;  %v6938_v4 = vpop.f32.mrf.mxu1 }
 0x35d   :  { %v4353_v59 = vadd.f32 %v6170_v26, %v4208_v32  ;;  %v4571_v51 = vsel %vm61_vm1, %v9760_v6, 0.0  ;;  %v4619_v50 = vmul.f32 %v9760_v6, %v9760_v6 }
 0x35e   :  { %v6172_v0 = vpop.f32.mrf.mxu0  ;;  %4572 = vadd.xlane.f32.xlu0 %v4571_v51  ;;  %v4502_v47 = vpop.f32.mrf.mxu1 }
 0x35f   :  { %v9767_v20 = vadd.f32 %v6935_v1, %v4353_v59  ;;  %v6173_v21 = vadd.f32 %v6172_v0, %v6171_v10  ;;  %v4635_v48 = vsel %vm61_vm1, %v4619_v50, 0.0  ;;  %v4228_v59 = vadd.f32 %v6102_v36, %v9680_v49 }
 0x360   :  { %v6174_v19 = vpop.f32.mrf.mxu0  ;;  %v6941_v54 = vpop.f32.mrf.mxu1  ;;  %v6025_v49 = vadd.f32 %v9684_v60, %v9682_v46  ;;  %v6114_v36 = vadd.f32 %v9728_v34, %v9726_v16 }
 0x361   :  { %v4620_v32 = vmul.f32 %v9767_v20, %v9767_v20  ;;  %v4358_v30 = vadd.f32 %v6173_v21, %v4213_v39  ;;  %v4574_v38 = vsel %vm61_vm1, %v9767_v20, 0.0 }
 0x362   :  { %v6175_v3 = vpop.f32.mrf.mxu0  ;;  %4636 = vadd.xlane.f32.xlu0 %v4635_v48  ;;  %v4512_v2 = vpop.f32.mrf.mxu1  ;;  %v4233_v48 = vadd.f32 %v6105_v14, %v6025_v49 }
 0x363   :  { %v6176_v62 = vadd.f32 %v6175_v3, %v6174_v19  ;;  %v4638_v7 = vsel %vm61_vm1, %v4620_v32, 0.0  ;;  %v9776_v61 = vadd.f32 %v4502_v47, %v4358_v30  ;;  %v6108_v19 = vadd.f32 %v9720_v24, %v9718_v43 }
 0x364   :  { %v6177_v1 = vpop.f32.mrf.mxu0  ;;  %4639 = vadd.xlane.f32.xlu1 %v4638_v7  ;;  %v6944_v39 = vpop.f32.mrf.mxu1  ;;  %v6111_v7 = vadd.f32 %v9724_v63, %v9722_v58 }
 0x365   :  { %v4363_v52 = vadd.f32 %v6176_v62, %v4218_v22  ;;  %v4621_v40 = vmul.f32 %v9776_v61, %v9776_v61  ;;  %v4577_v56 = vsel %vm61_vm1, %v9776_v61, 0.0  ;;  %v4238_v62 = vadd.f32 %v6108_v19, %v9686_v33 }
 0x366   :  { %v6178_v53 = vpop.f32.mrf.mxu0  ;;  %4575 = vadd.xlane.f32.xlu0 %v4574_v38  ;;  %v4522_v46 = vpop.f32.mrf.mxu1  ;;  %v6031_v33 = vadd.f32 %v9690_v27, %v9688_v25 }
 0x367   :  { %v9786_v5 = vadd.f32 %v6938_v4, %v4363_v52  ;;  %v6179_v17 = vadd.f32 %v6178_v53, %v6177_v1  ;;  %v4641_v10 = vsel %vm61_vm1, %v4621_v40, 0.0 }
 0x368   :  { %v6180_v18 = vpop.f32.mrf.mxu0  ;;  %4578 = vadd.xlane.f32.xlu1 %v4577_v56  ;;  %v6947_v38 = vpop.f32.mrf.mxu1 }
 0x369   :  { %v4368_v26 = vadd.f32 %v6179_v17, %v4223_v41  ;;  %v4580_v50 = vsel %vm61_vm1, %v9786_v5, 0.0  ;;  %v4622_v9 = vmul.f32 %v9786_v5, %v9786_v5  ;;  %v4243_v41 = vadd.f32 %v6111_v7, %v6031_v33  ;;  %v10705_v7 = vld [vmem:[#allocation33_spill] sm:$0xff] }
 0x36a   :  { %v6181_v11 = vpop.f32.mrf.mxu0  ;;  %4642 = vadd.xlane.f32.xlu0 %v4641_v10  ;;  %v4532_v25 = vpop.f32.mrf.mxu1  ;;  %v4248_v10 = vadd.f32 %v6114_v36, %v9692_v23  ;;  %v6037_v23 = vadd.f32 %v9696_v44, %v9694_v15 }
 0x36b   :  { %v6182_v51 = vadd.f32 %v6181_v11, %v6180_v18  ;;  %v9794_v4 = vadd.f32 %v4512_v2, %v4368_v26  ;;  %v4644_v22 = vsel %vm61_vm1, %v4622_v9, 0.0 }
 0x36c   :  { %v6183_v0 = vpop.f32.mrf.mxu0  ;;  %4581 = vadd.xlane.f32.xlu1 %v4580_v50  ;;  %v6950_v9 = vpop.f32.mrf.mxu1 }
 0x36d   :  { %v4373_v21 = vadd.f32 %v6182_v51, %v4228_v59  ;;  %v4583_v31 = vsel %vm61_vm1, %v9794_v4, 0.0  ;;  %v4623_v29 = vmul.f32 %v9794_v4, %v9794_v4  ;;  %v6117_v59 = vadd.f32 %v9732_v8, %v9730_v37 }
 0x36e   :  { %v6184_v47 = vpop.f32.mrf.mxu0  ;;  %4584 = vadd.xlane.f32.xlu0 %v4583_v31  ;;  %v4542_v15 = vpop.f32.mrf.mxu1 }
 0x36f   :  { %v9808_v32 = vadd.f32 %v6941_v54, %v4373_v21  ;;  %v6185_v30 = vadd.f32 %v6184_v47, %v6183_v0  ;;  %v4647_v57 = vsel %vm61_vm1, %v4623_v29, 0.0  ;;  %v4253_v21 = vadd.f32 %v6117_v59, %v6037_v23  ;;  %v10713_v23 = vld [vmem:[#allocation26_spill] sm:$0xff] }
 0x370   :  { %v6186_v3 = vpop.f32.mrf.mxu0  ;;  %4645 = vadd.xlane.f32.xlu1 %v4644_v22  ;;  %v6123_v22 = vadd.f32 %v9742_v35, %v9738_v42 }
 0x371   :  { %v4378_v60 = vadd.f32 %v6185_v30, %v4233_v48  ;;  %v4586_v54 = vsel %vm61_vm1, %v9808_v32, 0.0  ;;  %v4624_v12 = vmul.f32 %v9808_v32, %v9808_v32 }
 0x372   :  { %v6187_v43 = vpop.f32.mrf.mxu0  ;;  %4648 = vadd.xlane.f32.xlu0 %v4647_v57 }
 0x373   :  { %v6188_v24 = vadd.f32 %v6187_v43, %v6186_v3  ;;  %v9815_v1 = vadd.f32 %v4522_v46, %v4378_v60  ;;  %v4650_v18 = vsel %vm61_vm1, %v4624_v12, 0.0  ;;  %v10706_v43 = vld [vmem:[#allocation114_spill] sm:$0xff]  ;;  %v10708_v12 = vld [vmem:[#allocation101_spill] sm:$0xff] }
 0x374   :  { %v6189_v52 = vpop.f32.mrf.mxu0  ;;  %4587 = vadd.xlane.f32.xlu1 %v4586_v54  ;;  %v10707_v54 = vld [vmem:[#allocation32_spill] sm:$0xff] }
 0x375   :  { %v4383_v40 = vadd.f32 %v6188_v24, %v4238_v62  ;;  %v4589_v58 = vsel %vm61_vm1, %v9815_v1, 0.0  ;;  %v4625_v63 = vmul.f32 %v9815_v1, %v9815_v1  ;;  %v6953_v62 = vpop.f32.mrf.mxu1 }
 0x376   :  { %v6190_v53 = vpop.f32.mrf.mxu0  ;;  %4590 = vadd.xlane.f32.xlu0 %v4589_v58 }
 0x377   :  { %v9829_v17 = vadd.f32 %v6944_v39, %v4383_v40  ;;  %v6191_v56 = vadd.f32 %v6190_v53, %v6189_v52  ;;  %v4653_v26 = vsel %vm61_vm1, %v4625_v63, 0.0  ;;  %v6120_v39 = vadd.f32 %v9736_v28, %v9734_v55  ;;  %v4552_v53 = vpop.f32.mrf.mxu1 }
 0x378   :  { %v6192_v2 = vpop.f32.mrf.mxu0  ;;  %4651 = vadd.xlane.f32.xlu1 %v4650_v18  ;;  %v6126_v52 = vadd.f32 %v10708_v12, %v10707_v54  ;;  %v10709_v18 = vld [vmem:[#allocation107_spill] sm:$0xff]  ;;  %v4943_v12 = vld [vmem:[%s10185_s7 + $0x18] sm:$0xff] }
 0x379   :  { %v4388_v27 = vadd.f32 %v6191_v56, %v4243_v41  ;;  %v4592_v11 = vsel %vm61_vm1, %v9829_v17, 0.0  ;;  %v4626_v51 = vmul.f32 %v9829_v17, %v9829_v17  ;;  %v4258_v30 = vadd.f32 %v6120_v39, %v9698_v13  ;;  %v4944_v54 = vld [vmem:[%s10185_s7 + $0x20] sm:$0xff] }
 0x37a   :  { %v6193_v16 = vpop.f32.mrf.mxu0  ;;  %4654 = vadd.xlane.f32.xlu0 %v4653_v26  ;;  %v6043_v13 = vadd.f32 %v10706_v43, %v10705_v7 }
 0x37b   :  { %v6194_v34 = vadd.f32 %v6193_v16, %v6192_v2  ;;  %v9836_v14 = vadd.f32 %v4532_v25, %v4388_v27  ;;  %v4656_v19 = vsel %vm61_vm1, %v4626_v51, 0.0  ;;  %v4268_v2 = vadd.f32 %v6126_v52, %v10709_v18  ;;  %v10710_v25 = vld [vmem:[#allocation116_spill] sm:$0xff]  ;;  %v4946_v18 = vld [vmem:[%s10185_s7 + $0x30] sm:$0xff] }
 0x37c   :  { %v6195_v50 = vpop.f32.mrf.mxu0  ;;  %4593 = vadd.xlane.f32.xlu1 %v4592_v11  ;;  %v4263_v33 = vadd.f32 %v6123_v22, %v6043_v13  ;;  %v10711_v27 = vld [vmem:[#allocation108_spill] sm:$0xff] }
 0x37d   :  { %v4393_v0 = vadd.f32 %v6194_v34, %v4248_v10  ;;  %v4595_v37 = vsel %vm61_vm1, %v9836_v14, 0.0  ;;  %v4627_v8 = vmul.f32 %v9836_v14, %v9836_v14  ;;  %v6129_v26 = vadd.f32 %v10711_v27, %v10710_v25  ;;  %v4945_v52 = vld [vmem:[%s10185_s7 + $0x28] sm:$0xff]  ;;  %v4948_v27 = vld [vmem:[%s10185_s7 + $0x40] sm:$0xff] }
 0x37e   :  { %v6196_v49 = vpop.f32.mrf.mxu0  ;;  %4596 = vadd.xlane.f32.xlu0 %v4595_v37 }
 0x37f   :  { %v9850_v31 = vadd.f32 %v6947_v38, %v4393_v0  ;;  %v6197_v29 = vadd.f32 %v6196_v49, %v6195_v50  ;;  %v4659_v48 = vsel %vm61_vm1, %v4627_v8, 0.0  ;;  %v6956_v50 = vpop.f32.mrf.mxu1 }
 0x380   :  { %v6198_v47 = vpop.f32.mrf.mxu0  ;;  %4657 = vadd.xlane.f32.xlu1 %v4656_v19 }
 0x381   :  { %v4398_v44 = vadd.f32 %v6197_v29, %v4253_v21  ;;  %v4598_v46 = vsel %vm61_vm1, %v9850_v31, 0.0  ;;  %v4628_v60 = vmul.f32 %v9850_v31, %v9850_v31 }
 0x382   :  { %v6199_v55 = vpop.f32.mrf.mxu0  ;;  %4660 = vadd.xlane.f32.xlu0 %v4659_v48 }
 0x383   :  { %v6200_v28 = vadd.f32 %v6199_v55, %v6198_v47  ;;  %v9857_v3 = vadd.f32 %v4542_v15, %v4398_v44  ;;  %v4662_v63 = vsel %vm61_vm1, %v4628_v60, 0.0  ;;  %v4562_v15 = vpop.f32.mrf.mxu1 }
 0x384   :  { %v6201_v57 = vpop.f32.mrf.mxu0  ;;  %4599 = vadd.xlane.f32.xlu1 %v4598_v46 }
 0x385   :  { %v4403_v24 = vadd.f32 %v6200_v28, %v4258_v30  ;;  %v4601_v42 = vsel %vm61_vm1, %v9857_v3, 0.0  ;;  %v4629_v35 = vmul.f32 %v9857_v3, %v9857_v3 }
 0x386   :  { %v6202_v38 = vpop.f32.mrf.mxu0  ;;  %4602 = vadd.xlane.f32.xlu0 %v4601_v42  ;;  %v4940_v42 = vld [vmem:[%s10185_s7] sm:$0xff] }
 0x387   :  { %v9871_v40 = vadd.f32 %v6950_v9, %v4403_v24  ;;  %v6203_v58 = vadd.f32 %v6202_v38, %v6201_v57  ;;  %v4665_v56 = vsel %vm61_vm1, %v4629_v35, 0.0  ;;  %v10712_v9 = vld [vmem:[#allocation41_spill] sm:$0xff]  ;;  %v4947_v38 = vld [vmem:[%s10185_s7 + $0x38] sm:$0xff] }
 0x388   :  { %v6204_v36 = vpop.f32.mrf.mxu0  ;;  %4663 = vadd.xlane.f32.xlu1 %v4662_v63  ;;  %v6049_v0 = vadd.f32 %v10713_v23, %v10712_v9  ;;  %v4942_v35 = vld [vmem:[%s10185_s7 + $0x10] sm:$0xff]  ;;  %v4953_v63 = vld [vmem:[%s10185_s7 + $0x68] sm:$0xff] }
 0x389   :  { %v4408_v41 = vadd.f32 %v6203_v58, %v4263_v33  ;;  %v4604_v34 = vsel %vm61_vm1, %v9871_v40, 0.0  ;;  %v4630_v11 = vmul.f32 %v9871_v40, %v9871_v40  ;;  %v4949_v33 = vld [vmem:[%s10185_s7 + $0x48] sm:$0xff]  ;;  %v4951_v58 = vld [vmem:[%s10185_s7 + $0x58] sm:$0xff] }
 0x38a   :  { %v6205_v10 = vpop.f32.mrf.mxu0  ;;  %4666 = vadd.xlane.f32.xlu0 %v4665_v56  ;;  %v4273_v21 = vadd.f32 %v6129_v26, %v6049_v0 }
 0x38b   :  { %v6206_v59 = vadd.f32 %v6205_v10, %v6204_v36  ;;  %v9878_v16 = vadd.f32 %v4552_v53, %v4408_v41  ;;  %v4668_v47 = vsel %vm61_vm1, %v4630_v11, 0.0 }
 0x38c   :  { %v6207_v51 = vpop.f32.mrf.mxu0  ;;  %4605 = vadd.xlane.f32.xlu1 %v4604_v34 }
 0x38d   :  { %v4413_v37 = vadd.f32 %v6206_v59, %v4268_v2  ;;  %v4607_v8 = vsel %vm61_vm1, %v9878_v16, 0.0  ;;  %v4631_v39 = vmul.f32 %v9878_v16, %v9878_v16 }
 0x38e   :  { %v6208_v49 = vpop.f32.mrf.mxu0  ;;  %4608 = vadd.xlane.f32.xlu0 %v4607_v8 }
 0x38f   :  { %v9890_v29 = vadd.f32 %v6953_v62, %v4413_v37  ;;  %v6209_v19 = vadd.f32 %v6208_v49, %v6207_v51  ;;  %v4671_v30 = vsel %vm61_vm1, %v4631_v39, 0.0  ;;  %v4950_v51 = vld [vmem:[%s10185_s7 + $0x50] sm:$0xff] }
 0x390   :  { %4669 = vadd.xlane.f32.xlu1 %v4668_v47  ;;  %v6210_v44 = vpop.f32.mrf.mxu0 }
 0x391   :  { %v4418_v48 = vadd.f32 %v6209_v19, %v4273_v21  ;;  %v4610_v28 = vsel %vm61_vm1, %v9890_v29, 0.0  ;;  %v4632_v46 = vmul.f32 %v9890_v29, %v9890_v29  ;;  %v4952_v21 = vld [vmem:[%s10185_s7 + $0x60] sm:$0xff] }
 0x392   :  { %4672 = vadd.xlane.f32.xlu0 %v4671_v30  ;;  %v6211_v22 = vpop.f32.mrf.mxu0 }
 0x393   :  { %v9894_v55 = vadd.f32 %v4562_v15, %v4418_v48  ;;  %v6212_v60 = vadd.f32 %v6211_v22, %v6210_v44  ;;  %v4674_v43 = vsel %vm61_vm1, %v4632_v46, 0.0 }
 0x394   :  { %4611 = vadd.xlane.f32.xlu1 %v4610_v28 }
 0x395   :  { %v4613_v57 = vsel %vm61_vm1, %v9894_v55, 0.0  ;;  %v4633_v62 = vmul.f32 %v9894_v55, %v9894_v55  ;;  %v4423_v7 = vadd.f32 %v6212_v60, %v9758_v45  ;;  %v4941_v45 = vld [vmem:[%s10185_s7 + $0x8] sm:$0xff] }
 0x396   :  { %4614 = vadd.xlane.f32.xlu0 %v4613_v57 }
 0x397   :  { %v9906_v13 = vadd.f32 %v6956_v50, %v4423_v7  ;;  %v4677_v24 = vsel %vm61_vm1, %v4633_v62, 0.0 }
 0x398   :  { %4675 = vadd.xlane.f32.xlu1 %v4674_v43 }
 0x399   :  { %v4616_v36 = vsel %vm61_vm1, %v9906_v13, 0.0  ;;  %v4634_v53 = vmul.f32 %v9906_v13, %v9906_v13 }
 0x39a   :  { %4678 = vadd.xlane.f32.xlu0 %v4677_v24 }
 0x39b   :  { %v4680_v41 = vsel %vm61_vm1, %v4634_v53, 0.0 }
 0x3a9   :  { %4958 = vperm.xlu1 %6972, %v4940_v42  }
 0x3ad   :  { %4968 = vperm.xlu1 %6972, %v4942_v35  }
 0x3b0   :  { %4963 = vperm.xlu0 %6973, %v4941_v45  }
 0x3b1   :  { %4978 = vperm.xlu1 %6972, %v4944_v54  }
 0x3b4   :  { %4973 = vperm.xlu0 %6973, %v4943_v12  }
 0x3b8   :  { %4983 = vperm.xlu0 %6973, %v4945_v52  }
 0x3bc   :  { %4993 = vperm.xlu0 %6973, %v4947_v38  }
 0x3c0   :  { %5003 = vperm.xlu0 %6973, %v4949_v33  }
 0x3c4   :  { %5013 = vperm.xlu0 %6973, %v4951_v58  }
 0x3c8   :  { %5023 = vperm.xlu0 %6973, %v4953_v63  }
 0x3d5   :  { %4617 = vadd.xlane.f32.xlu1 %v4616_v36 }
 0x3d9   :  { %4681 = vadd.xlane.f32.xlu1 %v4680_v41  ;;  %v4796_v41 = vld [vmem:[%s10186_s6] sm:$0xff] }
 0x3e7   :  { %v4573_v56 = vpop.xlane.xlu0 %4572 }
 0x3e8   :  { %v9947_v2 = vmul.f32 0.020408163, %v4573_v56 }
 0x3ea   :  { %4988 = vperm.xlu1 %6972, %v4946_v18   ;;  %v4716_v26 = vmul.f32 %v9947_v2, %v9947_v2 }
 0x3eb   :  { %v4637_v25 = vpop.xlane.xlu0 %4636 }
 0x3ec   :  { %v4700_v10 = vmul.f32 0.020408163, %v4637_v25 }
 0x3ed   :  { %v4640_v59 = vpop.xlane.xlu1 %4639 }
 0x3ee   :  { %v4732_v34 = vsub.f32 %v4700_v10, %v4716_v26  ;;  %4998 = vperm.xlu1 %6972, %v4948_v27   ;;  %v4701_v37 = vmul.f32 0.020408163, %v4640_v59 }
 0x3ef   :  { %v4576_v11 = vpop.xlane.xlu0 %4575 }
 0x3f0   :  { %v4748_v50 = vmax.f32 %v4732_v34, 0.0  ;;  %v9957_v9 = vmul.f32 0.020408163, %v4576_v11 }
 0x3f1   :  { %v4579_v23 = vpop.xlane.xlu1 %4578 }
 0x3f2   :  { %v4764_v0 = vadd.f32 0.001, %v4748_v50  ;;  %v4717_v8 = vmul.f32 %v9957_v9, %v9957_v9  ;;  %v9961_v39 = vmul.f32 0.020408163, %v4579_v23  ;;  %5008 = vperm.xlu1 %6972, %v4950_v51  }
 0x3f3   :  { %v4643_v49 = vpop.xlane.xlu0 %4642 }
 0x3f4   :  { %6974 = vrsqrt.f32 %v4764_v0  ;;  %v4733_v19 = vsub.f32 %v4701_v37, %v4717_v8  ;;  %v4718_v47 = vmul.f32 %v9961_v39, %v9961_v39  ;;  %v4702_v15 = vmul.f32 0.020408163, %v4643_v49  ;;  %v4797_v8 = vld [vmem:[%s10186_s6 + $0x8] sm:$0xff] }
 0x3f5   :  { %v4582_v44 = vpop.xlane.xlu1 %4581 }
 0x3f6   :  { %v4749_v48 = vmax.f32 %v4733_v19, 0.0  ;;  %v4734_v30 = vsub.f32 %v4702_v15, %v4718_v47  ;;  %v9968_v22 = vmul.f32 0.020408163, %v4582_v44  ;;  %5018 = vperm.xlu1 %6972, %v4952_v21  }
 0x3f7   :  { %v4585_v28 = vpop.xlane.xlu0 %4584 }
 0x3f8   :  { %v4765_v46 = vadd.f32 0.001, %v4749_v48  ;;  %v4750_v60 = vmax.f32 %v4734_v30, 0.0  ;;  %v9970_v57 = vmul.f32 0.020408163, %v4585_v28  ;;  %v4719_v43 = vmul.f32 %v9968_v22, %v9968_v22 }
 0x3f9   :  { %v4646_v62 = vpop.xlane.xlu1 %4645 }
 0x3fa   :  { %6976 = vrsqrt.f32 %v4765_v46  ;;  %v4766_v7 = vadd.f32 0.001, %v4750_v60  ;;  %v4703_v24 = vmul.f32 0.020408163, %v4646_v62  ;;  %v4720_v35 = vmul.f32 %v9970_v57, %v9970_v57  ;;  %v4798_v62 = vld [vmem:[%s10186_s6 + $0x10] sm:$0xff] }
 0x3fb   :  { %v4649_v42 = vpop.xlane.xlu0 %4648 }
 0x3fc   :  { %v4735_v45 = vsub.f32 %v4703_v24, %v4719_v43  ;;  %v4704_v54 = vmul.f32 0.020408163, %v4649_v42  ;;  %6978 = vrsqrt.f32 %v4766_v7 }
 0x3fd   :  { %v4588_v12 = vpop.xlane.xlu1 %4587 }
 0x3fe   :  { %v4751_v52 = vmax.f32 %v4735_v45, 0.0  ;;  %v4736_v38 = vsub.f32 %v4704_v54, %v4720_v35  ;;  %v9976_v33 = vmul.f32 0.020408163, %v4588_v12 }
 0x3ff   :  { %v4591_v58 = vpop.xlane.xlu0 %4590 }
 0x400   :  { %v4767_v63 = vadd.f32 0.001, %v4751_v52  ;;  %v4752_v36 = vmax.f32 %v4736_v38, 0.0  ;;  %v9978_v53 = vmul.f32 0.020408163, %v4591_v58  ;;  %v4721_v27 = vmul.f32 %v9976_v33, %v9976_v33  ;;  %v4799_v38 = vld [vmem:[%s10186_s6 + $0x18] sm:$0xff] }
 0x401   :  { %v6975_v56 = vpop.eup %6974  ;;  %v4652_v18 = vpop.xlane.xlu1 %4651 }
 0x402   :  { %6980 = vrsqrt.f32 %v4767_v63  ;;  %v4768_v25 = vadd.f32 0.001, %v4752_v36  ;;  %v4705_v26 = vmul.f32 0.020408163, %v4652_v18  ;;  %v4812_v59 = vmul.f32 %v6975_v56, %v4796_v41 }
 0x403   :  { %v4655_v10 = vpop.xlane.xlu0 %4654  ;;  %v4722_v34 = vmul.f32 %v9978_v53, %v9978_v53 }
 0x404   :  { %v4737_v11 = vsub.f32 %v4705_v26, %v4721_v27  ;;  %v4706_v51 = vmul.f32 0.020408163, %v4655_v10  ;;  %6982 = vrsqrt.f32 %v4768_v25  ;;  %4846 = vperm.xlu0 %6973, %v4812_v59  }
 0x405   :  { %v4594_v50 = vpop.xlane.xlu1 %4593 }
 0x406   :  { %v4753_v23 = vmax.f32 %v4737_v11, 0.0  ;;  %v4738_v0 = vsub.f32 %v4706_v51, %v4722_v34  ;;  %v9987_v37 = vmul.f32 0.020408163, %v4594_v50  ;;  %v4800_v34 = vld [vmem:[%s10186_s6 + $0x20] sm:$0xff] }
 0x407   :  { %v6977_v49 = vpop.eup %6976  ;;  %v4597_v21 = vpop.xlane.xlu0 %4596 }
 0x408   :  { %v4769_v19 = vadd.f32 0.001, %v4753_v23  ;;  %v4754_v47 = vmax.f32 %v4738_v0, 0.0  ;;  %v9992_v15 = vmul.f32 0.020408163, %v4597_v21  ;;  %v4813_v48 = vmul.f32 %v6977_v49, %v4797_v8 }
 0x409   :  { %v4658_v44 = vpop.xlane.xlu1 %4657  ;;  %v6979_v30 = vpop.eup %6978  ;;  %v4723_v46 = vmul.f32 %v9987_v37, %v9987_v37 }
 0x40a   :  { %6984 = vrsqrt.f32 %v4769_v19  ;;  %v4770_v28 = vadd.f32 0.001, %v4754_v47  ;;  %v4707_v60 = vmul.f32 0.020408163, %v4658_v44  ;;  %4851 = vperm.xlu1 %6972, %v4813_v48   ;;  %v4724_v43 = vmul.f32 %v9992_v15, %v9992_v15  ;;  %v4801_v47 = vld [vmem:[%s10186_s6 + $0x28] sm:$0xff] }
 0x40b   :  { %v4661_v7 = vpop.xlane.xlu0 %4660  ;;  %v4814_v45 = vmul.f32 %v6979_v30, %v4798_v62 }
 0x40c   :  { %v4739_v24 = vsub.f32 %v4707_v60, %v4723_v46  ;;  %v4708_v42 = vmul.f32 0.020408163, %v4661_v7  ;;  %6986 = vrsqrt.f32 %v4770_v28 }
 0x40d   :  { %v4600_v35 = vpop.xlane.xlu1 %4599 }
 0x40e   :  { %v4755_v54 = vmax.f32 %v4739_v24, 0.0  ;;  %v4740_v12 = vsub.f32 %v4708_v42, %v4724_v43  ;;  %v10001_v52 = vmul.f32 0.020408163, %v4600_v35  ;;  %4856 = vperm.xlu1 %6972, %v4814_v45   ;;  %v4802_v35 = vld [vmem:[%s10186_s6 + $0x30] sm:$0xff] }
 0x40f   :  { %v6981_v58 = vpop.eup %6980  ;;  %v4603_v63 = vpop.xlane.xlu0 %4602 }
 0x410   :  { %v4771_v36 = vadd.f32 0.001, %v4755_v54  ;;  %v4756_v41 = vmax.f32 %v4740_v12, 0.0  ;;  %v10006_v56 = vmul.f32 0.020408163, %v4603_v63  ;;  %v4815_v25 = vmul.f32 %v6981_v58, %v4799_v38 }
 0x411   :  { %v4664_v18 = vpop.xlane.xlu1 %4663  ;;  %v6983_v27 = vpop.eup %6982  ;;  %v4725_v10 = vmul.f32 %v10001_v52, %v10001_v52 }
 0x412   :  { %6988 = vrsqrt.f32 %v4771_v36  ;;  %v4772_v26 = vadd.f32 0.001, %v4756_v41  ;;  %v4709_v59 = vmul.f32 0.020408163, %v4664_v18  ;;  %4861 = vperm.xlu1 %6972, %v4815_v25   ;;  %v4726_v51 = vmul.f32 %v10006_v56, %v10006_v56  ;;  %v4803_v25 = vld [vmem:[%s10186_s6 + $0x38] sm:$0xff] }
 0x413   :  { %v4667_v11 = vpop.xlane.xlu0 %4666  ;;  %v4816_v8 = vmul.f32 %v6983_v27, %v4800_v34 }
 0x414   :  { %v4741_v50 = vsub.f32 %v4709_v59, %v4725_v10  ;;  %v4710_v23 = vmul.f32 0.020408163, %v4667_v11  ;;  %6990 = vrsqrt.f32 %v4772_v26 }
 0x415   :  { %v4606_v0 = vpop.xlane.xlu1 %4605 }
 0x416   :  { %v4757_v49 = vmax.f32 %v4741_v50, 0.0  ;;  %v4742_v21 = vsub.f32 %v4710_v23, %v4726_v51  ;;  %v10015_v19 = vmul.f32 0.020408163, %v4606_v0  ;;  %4866 = vperm.xlu1 %6972, %v4816_v8  }
 0x417   :  { %v6985_v44 = vpop.eup %6984  ;;  %v4609_v48 = vpop.xlane.xlu0 %4608 }
 0x418   :  { %v4773_v30 = vadd.f32 0.001, %v4757_v49  ;;  %v4758_v28 = vmax.f32 %v4742_v21, 0.0  ;;  %v10020_v46 = vmul.f32 0.020408163, %v4609_v48  ;;  %v4817_v62 = vmul.f32 %v6985_v44, %v4801_v47  ;;  %v4804_v49 = vld [vmem:[%s10186_s6 + $0x40] sm:$0xff] }
 0x419   :  { %v4670_v60 = vpop.xlane.xlu1 %4669  ;;  %v6987_v7 = vpop.eup %6986  ;;  %v4727_v24 = vmul.f32 %v10015_v19, %v10015_v19 }
 0x41a   :  { %6992 = vrsqrt.f32 %v4773_v30  ;;  %v4774_v43 = vadd.f32 0.001, %v4758_v28  ;;  %v4711_v42 = vmul.f32 0.020408163, %v4670_v60  ;;  %4871 = vperm.xlu1 %6972, %v4817_v62   ;;  %v4728_v54 = vmul.f32 %v10020_v46, %v10020_v46  ;;  %v4805_v28 = vld [vmem:[%s10186_s6 + $0x48] sm:$0xff] }
 0x41b   :  { %v4673_v45 = vpop.xlane.xlu0 %4672  ;;  %v4818_v63 = vmul.f32 %v6987_v7, %v4802_v35 }
 0x41c   :  { %6994 = vrsqrt.f32 %v4774_v43  ;;  %v4743_v12 = vsub.f32 %v4711_v42, %v4727_v24  ;;  %v4712_v38 = vmul.f32 0.020408163, %v4673_v45  ;;  %v4806_v43 = vld [vmem:[%s10186_s6 + $0x50] sm:$0xff] }
 0x41d   :  { %v4612_v58 = vpop.xlane.xlu1 %4611 }
 0x41e   :  { %v4759_v36 = vmax.f32 %v4743_v12, 0.0  ;;  %v4744_v41 = vsub.f32 %v4712_v38, %v4728_v54  ;;  %v10029_v18 = vmul.f32 0.020408163, %v4612_v58  ;;  %4876 = vperm.xlu1 %6972, %v4818_v63   ;;  %v4807_v38 = vld [vmem:[%s10186_s6 + $0x58] sm:$0xff]  ;;  %v4808_v63 = vld [vmem:[%s10186_s6 + $0x60] sm:$0xff] }
 0x41f   :  { %v6989_v27 = vpop.eup %6988  ;;  %v4615_v26 = vpop.xlane.xlu0 %4614 }
 0x420   :  { %v4775_v10 = vadd.f32 0.001, %v4759_v36  ;;  %v4760_v59 = vmax.f32 %v4744_v41, 0.0  ;;  %v10034_v34 = vmul.f32 0.020408163, %v4615_v26  ;;  %v4819_v51 = vmul.f32 %v6989_v27, %v4803_v25  ;;  %v4809_v27 = vld [vmem:[%s10186_s6 + $0x68] sm:$0xff] }
 0x421   :  { %v4676_v11 = vpop.xlane.xlu1 %4675  ;;  %v6991_v50 = vpop.eup %6990  ;;  %v4729_v0 = vmul.f32 %v10029_v18, %v10029_v18 }
 0x422   :  { %6996 = vrsqrt.f32 %v4775_v10  ;;  %v4776_v23 = vadd.f32 0.001, %v4760_v59  ;;  %v4713_v8 = vmul.f32 0.020408163, %v4676_v11  ;;  %4881 = vperm.xlu1 %6972, %v4819_v51   ;;  %v4730_v47 = vmul.f32 %v10034_v34, %v10034_v34  ;;  %v4810_v10 = vld [vmem:[%s10186_s6 + $0x70] sm:$0xff] }
 0x423   :  { %v4679_v21 = vpop.xlane.xlu0 %4678  ;;  %v4820_v30 = vmul.f32 %v6991_v50, %v4804_v49  ;;  %v4954_v50 = vld [vmem:[%s10185_s7 + $0x70] sm:$0xff] }
 0x424   :  { %6998 = vrsqrt.f32 %v4776_v23  ;;  %v4745_v44 = vsub.f32 %v4713_v8, %v4729_v0  ;;  %v4714_v48 = vmul.f32 0.020408163, %v4679_v21 }
 0x425   :  { %v4959_v23 = vpop.permute.xlu1 %4958 }
 0x426   :  { %v4761_v60 = vmax.f32 %v4745_v44, 0.0  ;;  %v4746_v62 = vsub.f32 %v4714_v48, %v4730_v47  ;;  %4886 = vperm.xlu1 %6972, %v4820_v30  }
 0x427   :  { %v6993_v7 = vpop.eup %6992 }
 0x428   :  { %v4777_v24 = vadd.f32 0.001, %v4761_v60  ;;  %v4762_v42 = vmax.f32 %v4746_v62, 0.0  ;;  %v4821_v35 = vmul.f32 %v6993_v7, %v4805_v28 }
 0x429   :  { %v6995_v45 = vpop.eup %6994  ;;  %v4969_v0 = vpop.permute.xlu1 %4968 }
 0x42a   :  { %7000 = vrsqrt.f32 %v4777_v24  ;;  %v4778_v54 = vadd.f32 0.001, %v4762_v42  ;;  %4891 = vperm.xlu0 %6973, %v4821_v35   ;;  %v4822_v12 = vmul.f32 %v6995_v45, %v4806_v43 }
 0x42b   :  { %v4964_v8 = vpop.permute.xlu0 %4963 }
 0x42c   :  { %7002 = vrsqrt.f32 %v4778_v54  ;;  %4896 = vperm.xlu1 %6972, %v4822_v12   ;;  %v4811_v12 = vld [vmem:[%s10186_s6 + $0x78] sm:$0xff] }
 0x42d   :  { %v4979_v49 = vpop.permute.xlu1 %4978 }
 0x42f   :  { %v6997_v58 = vpop.eup %6996  ;;  %v4974_v21 = vpop.permute.xlu0 %4973 }
 0x430   :  { %v4823_v36 = vmul.f32 %v6997_v58, %v4807_v38 }
 0x431   :  { %v6999_v41 = vpop.eup %6998 }
 0x432   :  { %4901 = vperm.xlu0 %6973, %v4823_v36   ;;  %v4824_v25 = vmul.f32 %v6999_v41, %v4808_v63  ;;  %v4955_v41 = vld [vmem:[%s10185_s7 + $0x78] sm:$0xff] }
 0x433   :  { %v4984_v30 = vpop.permute.xlu0 %4983 }
 0x434   :  { %4906 = vperm.xlu1 %6972, %v4824_v25   ;;  %v4828_v25 = vsub.f32 %v9760_v6, %v9947_v2 }
 0x437   :  { %v7001_v26 = vpop.eup %7000  ;;  %v4994_v43 = vpop.permute.xlu0 %4993 }
 0x438   :  { %v4825_v59 = vmul.f32 %v7001_v26, %v4809_v27 }
 0x439   :  { %v7003_v11 = vpop.eup %7002 }
 0x43a   :  { %4911 = vperm.xlu0 %6973, %v4825_v59   ;;  %v4826_v51 = vmul.f32 %v7003_v11, %v4810_v10  ;;  %v4829_v11 = vsub.f32 %v9767_v20, %v9957_v9 }
 0x43b   :  { %v10068_v42 = vpop.permute.xlu0 %5003 }
 0x43c   :  { %4916 = vperm.xlu1 %6972, %v4826_v51  }
 0x43f   :  { %v10070_v45 = vpop.permute.xlu0 %5013 }
 0x440   :  { %5028 = vperm.xlu1 %6972, %v4954_v50  }
 0x443   :  { %v10075_v63 = vpop.permute.xlu0 %5023 }
 0x45e   :  { %v4618_v47 = vpop.xlane.xlu1 %4617 }
 0x45f   :  { %v10064_v44 = vmul.f32 0.020408163, %v4618_v47 }
 0x461   :  { %v4731_v28 = vmul.f32 %v10064_v44, %v10064_v44 }
 0x462   :  { %v4682_v48 = vpop.xlane.xlu1 %4681 }
 0x463   :  { %v4715_v60 = vmul.f32 0.020408163, %v4682_v48  ;;  %v4830_v48 = vsub.f32 %v9776_v61, %v9961_v39  ;;  %v4832_v61 = vsub.f32 %v9794_v4, %v9970_v57  ;;  %v4834_v4 = vsub.f32 %v9815_v1, %v9978_v53 }
 0x464   :  { %v4836_v1 = vsub.f32 %v9836_v14, %v9992_v15 }
 0x465   :  { %v4747_v62 = vsub.f32 %v4715_v60, %v4731_v28 }
 0x466   :  { %v4989_v35 = vpop.permute.xlu1 %4988 }
 0x467   :  { %v4763_v7 = vmax.f32 %v4747_v62, 0.0 }
 0x469   :  { %v4779_v24 = vadd.f32 0.001, %v4763_v7 }
 0x46a   :  { %v4999_v54 = vpop.permute.xlu1 %4998 }
 0x46b   :  { %7004 = vrsqrt.f32 %v4779_v24 }
 0x46e   :  { %v5009_v36 = vpop.permute.xlu1 %5008 }
 0x472   :  { %v5019_v10 = vpop.permute.xlu1 %5018 }
 0x478   :  { %v7005_v38 = vpop.eup %7004 }
 0x479   :  { %v4827_v58 = vmul.f32 %v7005_v38, %v4811_v12 }
 0x47b   :  { %4921 = vperm.xlu0 %6973, %v4827_v58   ;;  %v4838_v58 = vsub.f32 %v9857_v3, %v10006_v56  ;;  %v4839_v3 = vsub.f32 %v9871_v40, %v10015_v19  ;;  %v4841_v40 = vsub.f32 %v9890_v29, %v10029_v18  ;;  %v4843_v18 = vsub.f32 %v9906_v13, %v10064_v44 }
 0x47f   :  { %5033 = vperm.xlu0 %6973, %v4955_v41   ;;  %v4847_v27 = vpop.permute.xlu0 %4846 }
 0x480   :  { %v4924_v26 = vmul.f32 %v4847_v27, %v4828_v25  ;;  %v4842_v27 = vsub.f32 %v9894_v55, %v10034_v34 }
 0x482   :  { %v5036_v59 = vadd.f32 %v4959_v23, %v4924_v26  ;;  %v4831_v23 = vsub.f32 %v9786_v5, %v9968_v22  ;;  %v4833_v5 = vsub.f32 %v9808_v32, %v9976_v33  ;;  %v4835_v32 = vsub.f32 %v9829_v17, %v9987_v37 }
 0x483   :  { %v4837_v17 = vsub.f32 %v9850_v31, %v10001_v52 }
 0x484   :  { %5052 = vst.msk [vmem:[%s10187_s8] sm:$0xff] %vm61_vm1, %v5036_v59 }
 0x485   :  { %v4852_v51 = vpop.permute.xlu1 %4851 }
 0x486   :  { %v4925_v50 = vmul.f32 %v4852_v51, %v4829_v11 }
 0x488   :  { %v5037_v47 = vadd.f32 %v4964_v8, %v4925_v50 }
 0x489   :  { %v4857_v28 = vpop.permute.xlu1 %4856 }
 0x48a   :  { %5053 = vst.msk [vmem:[%s10187_s8 + $0x8] sm:$0xff] %vm61_vm1, %v5037_v47  ;;  %v4926_v6 = vmul.f32 %v4857_v28, %v4830_v48 }
 0x48c   :  { %v5038_v2 = vadd.f32 %v4969_v0, %v4926_v6 }
 0x48d   :  { %v4862_v60 = vpop.permute.xlu1 %4861 }
 0x48e   :  { %5054 = vst.msk [vmem:[%s10187_s8 + $0x10] sm:$0xff] %vm61_vm1, %v5038_v2  ;;  %v4927_v20 = vmul.f32 %v4862_v60, %v4831_v23 }
 0x490   :  { %v5039_v9 = vadd.f32 %v4974_v21, %v4927_v20 }
 0x491   :  { %v4867_v39 = vpop.permute.xlu1 %4866 }
 0x492   :  { %5055 = vst.msk [vmem:[%s10187_s8 + $0x18] sm:$0xff] %vm61_vm1, %v5039_v9  ;;  %v4928_v0 = vmul.f32 %v4867_v39, %v4832_v61 }
 0x494   :  { %v5040_v8 = vadd.f32 %v4979_v49, %v4928_v0 }
 0x495   :  { %v4872_v22 = vpop.permute.xlu1 %4871 }
 0x496   :  { %5056 = vst.msk [vmem:[%s10187_s8 + $0x20] sm:$0xff] %vm61_vm1, %v5040_v8  ;;  %v4929_v21 = vmul.f32 %v4872_v22, %v4833_v5 }
 0x498   :  { %v5041_v62 = vadd.f32 %v4984_v30, %v4929_v21 }
 0x499   :  { %v4877_v57 = vpop.permute.xlu1 %4876 }
 0x49a   :  { %5057 = vst.msk [vmem:[%s10187_s8 + $0x28] sm:$0xff] %vm61_vm1, %v5041_v62  ;;  %v4930_v49 = vmul.f32 %v4877_v57, %v4834_v4 }
 0x49c   :  { %v5042_v7 = vadd.f32 %v4989_v35, %v4930_v49 }
 0x49d   :  { %v4882_v33 = vpop.permute.xlu1 %4881 }
 0x49e   :  { %5058 = vst.msk [vmem:[%s10187_s8 + $0x30] sm:$0xff] %vm61_vm1, %v5042_v7  ;;  %v4931_v30 = vmul.f32 %v4882_v33, %v4835_v32 }
 0x4a0   :  { %v5043_v24 = vadd.f32 %v4994_v43, %v4931_v30 }
 0x4a1   :  { %v4887_v53 = vpop.permute.xlu1 %4886 }
 0x4a2   :  { %5059 = vst.msk [vmem:[%s10187_s8 + $0x38] sm:$0xff] %vm61_vm1, %v5043_v24  ;;  %v4932_v35 = vmul.f32 %v4887_v53, %v4836_v1 }
 0x4a4   :  { %v5044_v37 = vadd.f32 %v4999_v54, %v4932_v35 }
 0x4a5   :  { %v4892_v12 = vpop.permute.xlu0 %4891 }
 0x4a6   :  { %v4933_v38 = vmul.f32 %v4892_v12, %v4837_v17  ;;  %5060 = vst.msk [vmem:[%s10187_s8 + $0x40] sm:$0xff] %vm61_vm1, %v5044_v37 }
 0x4a7   :  { %v4897_v14 = vpop.permute.xlu1 %4896 }
 0x4a8   :  { %v5045_v15 = vadd.f32 %v10068_v42, %v4933_v38  ;;  %v4934_v43 = vmul.f32 %v4897_v14, %v4838_v58  ;;  %v4840_v42 = vsub.f32 %v9878_v16, %v10020_v46 }
 0x4aa   :  { %5061 = vst.msk [vmem:[%s10187_s8 + $0x48] sm:$0xff] %vm61_vm1, %v5045_v15  ;;  %v5046_v31 = vadd.f32 %v5009_v36, %v4934_v43 }
 0x4ac   :  { %5062 = vst.msk [vmem:[%s10187_s8 + $0x50] sm:$0xff] %vm61_vm1, %v5046_v31 }
 0x4ad   :  { %v4902_v52 = vpop.permute.xlu0 %4901 }
 0x4ae   :  { %v4935_v56 = vmul.f32 %v4902_v52, %v4839_v3 }
 0x4af   :  { %v4907_v54 = vpop.permute.xlu1 %4906 }
 0x4b0   :  { %v5047_v41 = vadd.f32 %v10070_v45, %v4935_v56  ;;  %v4936_v25 = vmul.f32 %v4907_v54, %v4840_v42 }
 0x4b2   :  { %5063 = vst.msk [vmem:[%s10187_s8 + $0x58] sm:$0xff] %vm61_vm1, %v5047_v41  ;;  %v5048_v36 = vadd.f32 %v5019_v10, %v4936_v25 }
 0x4b4   :  { %5064 = vst.msk [vmem:[%s10187_s8 + $0x60] sm:$0xff] %vm61_vm1, %v5048_v36 }
 0x4b5   :  { %v4912_v19 = vpop.permute.xlu0 %4911 }
 0x4b6   :  { %v4937_v16 = vmul.f32 %v4912_v19, %v4841_v40 }
 0x4b7   :  { %v4917_v46 = vpop.permute.xlu1 %4916 }
 0x4b8   :  { %v5049_v45 = vadd.f32 %v10075_v63, %v4937_v16  ;;  %v4938_v26 = vmul.f32 %v4917_v46, %v4842_v27 }
 0x4ba   :  { %5065 = vst.msk [vmem:[%s10187_s8 + $0x68] sm:$0xff] %vm61_vm1, %v5049_v45 }
 0x4bb   :  { %v5029_v10 = vpop.permute.xlu1 %5028 }
 0x4bc   :  { %v5050_v59 = vadd.f32 %v5029_v10, %v4938_v26 }
 0x4be   :  { %5066 = vst.msk [vmem:[%s10187_s8 + $0x70] sm:$0xff] %vm61_vm1, %v5050_v59 }
 0x4f6   :  { %v4922_v29 = vpop.permute.xlu0 %4921 }
 0x4f7   :  { %v4939_v63 = vmul.f32 %v4922_v29, %v4843_v18 }
 0x4fa   :  { %v5034_v11 = vpop.permute.xlu0 %5033 }
 0x4fb   :  { %v5051_v55 = vadd.f32 %v5034_v11, %v4939_v63 }
 0x4fd   :  { %5067 = vst.msk [vmem:[%s10187_s8 + $0x78] sm:$0xff] %vm61_vm1, %v5051_v55 }

</bundles_post_ra>
